<compile_context>
chip_gen: v6e
topology: v6e:2x2x1
jax: 0.10.0
libtpu: 0.0.40
codegen_flags: <defaults>
</compile_context>

<pallas_src>
import numpy as np
import jax
import jax.numpy as jnp
from jax.experimental import pallas as pl
from jax.experimental.pallas import tpu as pltpu

EPS = 1e-5
LRELU_SLOPE = 0.2


# ------------------------------ Pallas kernel -------------------------------

def _mfcc_fused_kernel(p1_ref, w1m_ref, g1_ref, b1_ref,
                       s2_ref, w2_ref, g2_ref, b2_ref,
                       s3_ref, g3_ref, b3_ref,
                       s4_ref,
                       w3_hbm_ref, w4_hbm_ref,
                       out_ref,
                       w3_vmem, w4_vmem, dma_sem):
    """conv1..conv4 + BN(batch stats) + LeakyReLU; bf16 MXU, f32 accumulate."""

    # Kick off HBM->VMEM copies of the conv3/conv4 flattened weights; they
    # complete while layers 1/2 run on the MXU.
    cp3 = pltpu.make_async_copy(w3_hbm_ref, w3_vmem, dma_sem.at[0])
    cp4 = pltpu.make_async_copy(w4_hbm_ref, w4_vmem, dma_sem.at[1])
    cp3.start()
    cp4.start()

    def bn_lrelu(xv, g_ref, b_ref):
        # training-mode BatchNorm (biased variance, one-pass stats) + LeakyReLU
        m = xv.shape[0]
        inv_m = 1.0 / m
        mean = jnp.sum(xv, axis=0, keepdims=True) * inv_m
        ex2 = jnp.sum(xv * xv, axis=0, keepdims=True) * inv_m
        var = jnp.maximum(ex2 - mean * mean, 0.0)
        scale = jax.lax.rsqrt(var + EPS) * g_ref[...]        # EUP slot
        shift = b_ref[...] - mean * scale
        y = xv * scale + shift
        return jnp.where(y > 0, y, LRELU_SLOPE * y)

    def gather_cat(s_ref, act_bf16):
        # im2col gather: per-tap 0/1 selection matmul (exact), lane-concatenated
        # into one (M, KhKw*Cin) slab ready for a single deep weight matmul.
        taps = [jnp.dot(s_ref[k], act_bf16, preferred_element_type=jnp.float32)
                for k in range(s_ref.shape[0])]              # static unroll (<= 9)
        return jnp.concatenate(taps, axis=1).astype(jnp.bfloat16)

    # ---- layer 1: patches (M1, 9) @ W1 (9, 128 padded) ----
    a1 = jnp.dot(p1_ref[...], w1m_ref[...], preferred_element_type=jnp.float32)
    a1 = bn_lrelu(a1, g1_ref, b1_ref).astype(jnp.bfloat16)   # (M1, 128), pad lanes 0

    # ---- layer 2: gathers + one (M2, 1152) @ (1152, 128) matmul ----
    x2 = gather_cat(s2_ref, a1)
    a2 = bn_lrelu(jnp.dot(x2, w2_ref[...], preferred_element_type=jnp.float32),
                  g2_ref, b2_ref).astype(jnp.bfloat16)       # (M2, 128)

    # ---- layer 3: gathers + one (M3, 1152) @ (1152, 256) matmul ----
    x3 = gather_cat(s3_ref, a2)
    cp3.wait()
    a3 = bn_lrelu(jnp.dot(x3, w3_vmem[...], preferred_element_type=jnp.float32),
                  g3_ref, b3_ref).astype(jnp.bfloat16)       # (M3, 256)

    # ---- layer 4 (no BN / activation): (M4p, 1024) @ (1024, 512) ----
    x4 = gather_cat(s4_ref, a3)                              # pad rows are exactly 0
    cp4.wait()
    out_ref[...] = jnp.dot(x4, w4_vmem[...], preferred_element_type=jnp.float32)


# ------------------------- trace-time (static) helpers ----------------------

def _round_up(a, b):
    return (a + b - 1) // b * b


def _conv_out_hw(h, w, kh, kw, sh, sw, ph, pw):
    return (h + 2 * ph - kh) // sh + 1, (w + 2 * pw - kw) // sw + 1


def _selection(n, h, w, kh, kw, sh, sw, ph, pw, m_out_pad=None):
    """Static 0/1 gather matrices S[k]: (m_out_pad, n*h*w), encode im2col + padding."""
    oh, ow = _conv_out_hw(h, w, kh, kw, sh, sw, ph, pw)
    m_out = n * oh * ow
    if m_out_pad is None:
        m_out_pad = m_out
    s = np.zeros((kh * kw, m_out_pad, n * h * w), np.float32)
    for ni in range(n):
        for oi in range(oh):
            for oj in range(ow):
                mo = (ni * oh + oi) * ow + oj
                for i in range(kh):
                    for j in range(kw):
                        hi = oi * sh + i - ph
                        wi = oj * sw + j - pw
                        if 0 <= hi < h and 0 <= wi < w:
                            s[i * kw + j, mo, (ni * h + hi) * w + wi] = 1.0
    return jnp.asarray(s), oh, ow


def _im2col_l1(x_nhwc, kh, kw, sh, sw, ph, pw):
    """Tiny layer-1 im2col (input has C=1); rows ordered (n, oh, ow)."""
    n, h, w, c = x_nhwc.shape
    xp = jnp.pad(x_nhwc, ((0, 0), (ph, ph), (pw, pw), (0, 0)))
    oh, ow = _conv_out_hw(h, w, kh, kw, sh, sw, ph, pw)
    cols = []
    for i in range(kh):
        for j in range(kw):
            cols.append(xp[:, i:i + sh * oh:sh, j:j + sw * ow:sw, :])
    p = jnp.stack(cols, axis=3)                              # (n, oh, ow, kh*kw, c)
    return p.reshape(n * oh * ow, kh * kw * c), oh, ow


def _wcat(w_oihw, cin_pad=None):
    """(Cout, Cin, KH, KW) -> (KH*KW*Cin_pad, Cout): flattened im2col weight."""
    co, ci, kh, kw = w_oihw.shape
    wt = jnp.transpose(w_oihw, (2, 3, 1, 0))                 # (KH, KW, Cin, Cout)
    if cin_pad is not None and cin_pad > ci:
        wt = jnp.pad(wt, ((0, 0), (0, 0), (0, cin_pad - ci), (0, 0)))
        ci = cin_pad
    return wt.reshape(kh * kw * ci, co)


# ------------------------------- forward pass --------------------------------

def mfcc_encoder_forward(x_nchw, params):
    n, _, h, w = x_nchw.shape
    x = jnp.transpose(x_nchw, (0, 2, 3, 1))                  # NCHW -> NHWC (C=1)

    # layer-1 patches (the raw input itself, ~3 KB in bf16)
    p1, h1, w1s = _im2col_l1(x, 3, 3, 3, 2, 1, 2)            # (n*h1*w1, 9)
    p1 = p1.astype(jnp.bfloat16)

    # layer-1 weights, Cout zero-padded 64 -> 128 (keeps every later lane-concat
    # 128-aligned; padded BN gamma/beta are 0 so the padded lanes stay exactly 0)
    c1 = params["w1"].shape[0]
    c1p = _round_up(c1, 128)
    w1m = jnp.transpose(params["w1"], (2, 3, 1, 0)).reshape(9, c1)
    w1m = jnp.pad(w1m, ((0, 0), (0, c1p - c1))).astype(jnp.bfloat16)
    g1 = jnp.pad(params["g1"], (0, c1p - c1)).reshape(1, c1p)
    b1 = jnp.pad(params["b1"], (0, c1p - c1)).reshape(1, c1p)

    # conv2..conv4: static 0/1 selection matrices (exact in bf16) + flattened weights
    s2, h2, w2s = _selection(n, h1, w1s, 3, 3, 2, 2, 1, 1)
    s3, h3, w3s = _selection(n, h2, w2s, 3, 3, 1, 1, 0, 0)
    oh4, ow4 = _conv_out_hw(h3, w3s, 2, 2, 1, 1, 0, 0)
    m4 = n * oh4 * ow4
    m4p = _round_up(m4, 8)                                   # sublane-aligned output slab
    s4, _, _ = _selection(n, h3, w3s, 2, 2, 1, 1, 0, 0, m_out_pad=m4p)
    s2 = s2.astype(jnp.bfloat16)
    s3 = s3.astype(jnp.bfloat16)
    s4 = s4.astype(jnp.bfloat16)

    c2 = params["w2"].shape[0]
    c3 = params["w3"].shape[0]
    c4 = params["w4"].shape[0]
    w2cat = _wcat(params["w2"], cin_pad=c1p).astype(jnp.bfloat16)   # (9*c1p, c2)
    w3cat = _wcat(params["w3"]).astype(jnp.bfloat16)                # (9*c2,  c3)
    w4cat = _wcat(params["w4"]).astype(jnp.bfloat16)                # (4*c3,  c4)
    g2 = params["g2"].reshape(1, c2); b2 = params["b2"].reshape(1, c2)
    g3 = params["g3"].reshape(1, c3); b3 = params["b3"].reshape(1, c3)

    vmem_spec = pl.BlockSpec(memory_space=pltpu.MemorySpace.VMEM)
    hbm_spec = pl.BlockSpec(memory_space=pl.ANY)              # manual DMA in-kernel

    out_pad = pl.pallas_call(
        _mfcc_fused_kernel,
        out_shape=jax.ShapeDtypeStruct((m4p, c4), jnp.float32),
        in_specs=[vmem_spec] * 12 + [hbm_spec, hbm_spec],
        out_specs=vmem_spec,
        scratch_shapes=[
            pltpu.VMEM(w3cat.shape, jnp.bfloat16),            # conv3 weight landing buffer
            pltpu.VMEM(w4cat.shape, jnp.bfloat16),            # conv4 weight landing buffer
            pltpu.SemaphoreType.DMA((2,)),
        ],
    )(p1, w1m, g1, b1,
      s2, w2cat, g2, b2,
      s3, g3, b3,
      s4,
      w3cat, w4cat)

    out = out_pad[:m4].reshape(n, oh4, ow4, c4)
    return jnp.transpose(out, (0, 3, 1, 2))                  # NHWC -> NCHW
# TODO(synk): BatchNorm running-stat (momentum) buffer updates are not reproduced
# (they do not affect the returned forward value).


# ----------------------------- pure-JAX reference ----------------------------

def _ref_forward(x, params):
    def conv(x, w, stride, pad):
        return jax.lax.conv_general_dilated(
            x, w, stride, pad, dimension_numbers=("NCHW", "OIHW", "NCHW"))

    def bn_lrelu(x, g, b):
        mean = jnp.mean(x, axis=(0, 2, 3), keepdims=True)
        var = jnp.mean((x - mean) ** 2, axis=(0, 2, 3), keepdims=True)
        y = (x - mean) / jnp.sqrt(var + EPS)
        y = y * g.reshape(1, -1, 1, 1) + b.reshape(1, -1, 1, 1)
        return jnp.where(y > 0, y, LRELU_SLOPE * y)

    x = bn_lrelu(conv(x, params["w1"], (3, 2), [(1, 1), (2, 2)]), params["g1"], params["b1"])
    x = bn_lrelu(conv(x, params["w2"], (2, 2), [(1, 1), (1, 1)]), params["g2"], params["b2"])
    x = bn_lrelu(conv(x, params["w3"], (1, 1), [(0, 0), (0, 0)]), params["g3"], params["b3"])
    x = conv(x, params["w4"], (1, 1), [(0, 0), (0, 0)])
    return x


# ----------------------------------- main ------------------------------------

if __name__ == "__main__":
    key = jax.random.PRNGKey(0)
    ks = jax.random.split(key, 16)

    # small input consistent with the conv stack: (N=2, C=1, H=24, W=20)
    x = jax.random.normal(ks[0], (2, 1, 24, 20), jnp.float32)

    params = {
        "w1": 0.10 * jax.random.normal(ks[1], (64, 1, 3, 3), jnp.float32),
        "g1": 1.0 + 0.1 * jax.random.normal(ks[2], (64,), jnp.float32),
        "b1": 0.1 * jax.random.normal(ks[3], (64,), jnp.float32),
        "w2": 0.04 * jax.random.normal(ks[4], (128, 64, 3, 3), jnp.float32),
        "g2": 1.0 + 0.1 * jax.random.normal(ks[5], (128,), jnp.float32),
        "b2": 0.1 * jax.random.normal(ks[6], (128,), jnp.float32),
        "w3": 0.03 * jax.random.normal(ks[7], (256, 128, 3, 3), jnp.float32),
        "g3": 1.0 + 0.1 * jax.random.normal(ks[8], (256,), jnp.float32),
        "b3": 0.1 * jax.random.normal(ks[9], (256,), jnp.float32),
        "w4": 0.03 * jax.random.normal(ks[10], (512, 256, 2, 2), jnp.float32),
    }

    out = jax.jit(mfcc_encoder_forward)(x, params)
    out = jax.block_until_ready(out)

    assert out.shape == (2, 512, 1, 3), out.shape

    ref = _ref_forward(x, params)
    max_err = float(jnp.max(jnp.abs(out - ref)))
    # bf16 MXU operands (f32 accumulation / BN math) => bf16-level tolerance.
    if not bool(jnp.allclose(out, ref, atol=2e-2, rtol=2e-2)):
        raise AssertionError(f"Pallas output mismatch vs reference, max err {max_err}")

    print("KERNEL_OK")
</pallas_src>

<mosaic_0001>
module attributes {stable_mosaic.version = 11 : i64} {
  func.func @_mfcc_fused_kernel(%arg0: memref<176x9xbf16, #tpu.memory_space<vmem>>, %arg1: memref<9x128xbf16, #tpu.memory_space<vmem>>, %arg2: memref<1x128xf32, #tpu.memory_space<vmem>>, %arg3: memref<1x128xf32, #tpu.memory_space<vmem>>, %arg4: memref<9x48x176xbf16, #tpu.memory_space<vmem>>, %arg5: memref<1152x128xbf16, #tpu.memory_space<vmem>>, %arg6: memref<1x128xf32, #tpu.memory_space<vmem>>, %arg7: memref<1x128xf32, #tpu.memory_space<vmem>>, %arg8: memref<9x16x48xbf16, #tpu.memory_space<vmem>>, %arg9: memref<1x256xf32, #tpu.memory_space<vmem>>, %arg10: memref<1x256xf32, #tpu.memory_space<vmem>>, %arg11: memref<4x8x16xbf16, #tpu.memory_space<vmem>>, %arg12: memref<1152x256xbf16, #tpu.memory_space<any>>, %arg13: memref<1024x512xbf16, #tpu.memory_space<any>>, %arg14: memref<8x512xf32, #tpu.memory_space<vmem>>, %arg15: memref<1152x256xbf16, #tpu.memory_space<vmem>>, %arg16: memref<1024x512xbf16, #tpu.memory_space<vmem>>, %arg17: memref<2x!tpu.dma_semaphore, #tpu.memory_space<semaphore_mem>>) attributes {dimension_semantics = [], scalar_prefetch = 0 : i64, scratch_operands = 3 : i64, tpu.core_type = #tpu.core_type<tc>} {
    %c0_i32 = arith.constant 0 : i32
    %0 = tpu.memref_slice %arg17[%c0_i32] : memref<2x!tpu.dma_semaphore, #tpu.memory_space<semaphore_mem>> -> memref<1x!tpu.dma_semaphore, #tpu.memory_space<semaphore_mem>>
    %1 = tpu.memref_squeeze %0 : memref<1x!tpu.dma_semaphore, #tpu.memory_space<semaphore_mem>> -> memref<!tpu.dma_semaphore, #tpu.memory_space<semaphore_mem>>
    tpu.enqueue_dma source(%arg12 : memref<1152x256xbf16, #tpu.memory_space<any>>) target(%arg15 : memref<1152x256xbf16, #tpu.memory_space<vmem>>) target_semaphore(%1 : memref<!tpu.dma_semaphore, #tpu.memory_space<semaphore_mem>>)
    %c1_i32 = arith.constant 1 : i32
    %2 = tpu.memref_slice %arg17[%c1_i32] : memref<2x!tpu.dma_semaphore, #tpu.memory_space<semaphore_mem>> -> memref<1x!tpu.dma_semaphore, #tpu.memory_space<semaphore_mem>>
    %3 = tpu.memref_squeeze %2 : memref<1x!tpu.dma_semaphore, #tpu.memory_space<semaphore_mem>> -> memref<!tpu.dma_semaphore, #tpu.memory_space<semaphore_mem>>
    tpu.enqueue_dma source(%arg13 : memref<1024x512xbf16, #tpu.memory_space<any>>) target(%arg16 : memref<1024x512xbf16, #tpu.memory_space<vmem>>) target_semaphore(%3 : memref<!tpu.dma_semaphore, #tpu.memory_space<semaphore_mem>>)
    %c0 = arith.constant 0 : index
    %c0_0 = arith.constant 0 : index
    %4 = vector.load %arg0[%c0, %c0_0] : memref<176x9xbf16, #tpu.memory_space<vmem>>, vector<176x9xbf16>
    %c0_1 = arith.constant 0 : index
    %c0_2 = arith.constant 0 : index
    %5 = vector.load %arg1[%c0_1, %c0_2] : memref<9x128xbf16, #tpu.memory_space<vmem>>, vector<9x128xbf16>
    %cst = arith.constant dense<0.000000e+00> : vector<176x128xf32>
    %6 = tpu.matmul %4, %5, %cst {dimension_numbers = #tpu.dot_dimension_numbers<[1], [0], [0], [1], [0, 0, 1, 1], [], []>} : vector<176x9xbf16>, vector<9x128xbf16>, vector<176x128xf32> -> vector<176x128xf32>
    %cst_3 = arith.constant dense<0.000000e+00> : vector<128xf32>
    %7 = vector.multi_reduction <add>, %6, %cst_3 [0] : vector<176x128xf32> to vector<128xf32>
    %8 = vector.shape_cast %7 : vector<128xf32> to vector<1x128xf32>
    %cst_4 = arith.constant 0.00568181835 : f32
    %9 = vector.broadcast %cst_4 : f32 to vector<1x128xf32>
    %10 = arith.mulf %8, %9 : vector<1x128xf32>
    %11 = arith.mulf %6, %6 : vector<176x128xf32>
    %cst_5 = arith.constant dense<0.000000e+00> : vector<128xf32>
    %12 = vector.multi_reduction <add>, %11, %cst_5 [0] : vector<176x128xf32> to vector<128xf32>
    %13 = vector.shape_cast %12 : vector<128xf32> to vector<1x128xf32>
    %cst_6 = arith.constant 0.00568181835 : f32
    %14 = vector.broadcast %cst_6 : f32 to vector<1x128xf32>
    %15 = arith.mulf %13, %14 : vector<1x128xf32>
    %16 = arith.mulf %10, %10 : vector<1x128xf32>
    %17 = arith.subf %15, %16 : vector<1x128xf32>
    %cst_7 = arith.constant 0.000000e+00 : f32
    %18 = vector.broadcast %cst_7 : f32 to vector<1x128xf32>
    %19 = arith.maximumf %17, %18 : vector<1x128xf32>
    %cst_8 = arith.constant 9.99999974E-6 : f32
    %20 = vector.broadcast %cst_8 : f32 to vector<1x128xf32>
    %21 = arith.addf %19, %20 : vector<1x128xf32>
    %22 = math.rsqrt %21 : vector<1x128xf32>
    %c0_9 = arith.constant 0 : index
    %c0_10 = arith.constant 0 : index
    %23 = vector.load %arg2[%c0_9, %c0_10] : memref<1x128xf32, #tpu.memory_space<vmem>>, vector<1x128xf32>
    %24 = arith.mulf %22, %23 : vector<1x128xf32>
    %c0_11 = arith.constant 0 : index
    %c0_12 = arith.constant 0 : index
    %25 = vector.load %arg3[%c0_11, %c0_12] : memref<1x128xf32, #tpu.memory_space<vmem>>, vector<1x128xf32>
    %26 = arith.mulf %10, %24 : vector<1x128xf32>
    %27 = arith.subf %25, %26 : vector<1x128xf32>
    %28 = vector.broadcast %24 : vector<1x128xf32> to vector<176x128xf32>
    %29 = arith.mulf %6, %28 : vector<176x128xf32>
    %30 = vector.broadcast %27 : vector<1x128xf32> to vector<176x128xf32>
    %31 = arith.addf %29, %30 : vector<176x128xf32>
    %cst_13 = arith.constant 0.000000e+00 : f32
    %32 = vector.broadcast %cst_13 : f32 to vector<176x128xf32>
    %33 = arith.cmpf ogt, %31, %32 : vector<176x128xf32>
    %cst_14 = arith.constant 2.000000e-01 : f32
    %34 = vector.broadcast %cst_14 : f32 to vector<176x128xf32>
    %35 = arith.mulf %34, %31 : vector<176x128xf32>
    %36 = arith.select %33, %31, %35 : vector<176x128xi1>, vector<176x128xf32>
    %37 = arith.truncf %36 : vector<176x128xf32> to vector<176x128xbf16>
    %c0_15 = arith.constant 0 : index
    %c0_16 = arith.constant 0 : index
    %c0_17 = arith.constant 0 : index
    %38 = vector.load %arg4[%c0_15, %c0_16, %c0_17] : memref<9x48x176xbf16, #tpu.memory_space<vmem>>, vector<1x48x176xbf16>
    %39 = vector.shape_cast %38 : vector<1x48x176xbf16> to vector<48x176xbf16>
    %cst_18 = arith.constant dense<0.000000e+00> : vector<48x128xf32>
    %40 = tpu.matmul %39, %37, %cst_18 {dimension_numbers = #tpu.dot_dimension_numbers<[1], [0], [0], [1], [0, 0, 1, 1], [], []>} : vector<48x176xbf16>, vector<176x128xbf16>, vector<48x128xf32> -> vector<48x128xf32>
    %c1 = arith.constant 1 : index
    %c0_19 = arith.constant 0 : index
    %c0_20 = arith.constant 0 : index
    %41 = vector.load %arg4[%c1, %c0_19, %c0_20] : memref<9x48x176xbf16, #tpu.memory_space<vmem>>, vector<1x48x176xbf16>
    %42 = vector.shape_cast %41 : vector<1x48x176xbf16> to vector<48x176xbf16>
    %cst_21 = arith.constant dense<0.000000e+00> : vector<48x128xf32>
    %43 = tpu.matmul %42, %37, %cst_21 {dimension_numbers = #tpu.dot_dimension_numbers<[1], [0], [0], [1], [0, 0, 1, 1], [], []>} : vector<48x176xbf16>, vector<176x128xbf16>, vector<48x128xf32> -> vector<48x128xf32>
    %c2 = arith.constant 2 : index
    %c0_22 = arith.constant 0 : index
    %c0_23 = arith.constant 0 : index
    %44 = vector.load %arg4[%c2, %c0_22, %c0_23] : memref<9x48x176xbf16, #tpu.memory_space<vmem>>, vector<1x48x176xbf16>
    %45 = vector.shape_cast %44 : vector<1x48x176xbf16> to vector<48x176xbf16>
    %cst_24 = arith.constant dense<0.000000e+00> : vector<48x128xf32>
    %46 = tpu.matmul %45, %37, %cst_24 {dimension_numbers = #tpu.dot_dimension_numbers<[1], [0], [0], [1], [0, 0, 1, 1], [], []>} : vector<48x176xbf16>, vector<176x128xbf16>, vector<48x128xf32> -> vector<48x128xf32>
    %c3 = arith.constant 3 : index
    %c0_25 = arith.constant 0 : index
    %c0_26 = arith.constant 0 : index
    %47 = vector.load %arg4[%c3, %c0_25, %c0_26] : memref<9x48x176xbf16, #tpu.memory_space<vmem>>, vector<1x48x176xbf16>
    %48 = vector.shape_cast %47 : vector<1x48x176xbf16> to vector<48x176xbf16>
    %cst_27 = arith.constant dense<0.000000e+00> : vector<48x128xf32>
    %49 = tpu.matmul %48, %37, %cst_27 {dimension_numbers = #tpu.dot_dimension_numbers<[1], [0], [0], [1], [0, 0, 1, 1], [], []>} : vector<48x176xbf16>, vector<176x128xbf16>, vector<48x128xf32> -> vector<48x128xf32>
    %c4 = arith.constant 4 : index
    %c0_28 = arith.constant 0 : index
    %c0_29 = arith.constant 0 : index
    %50 = vector.load %arg4[%c4, %c0_28, %c0_29] : memref<9x48x176xbf16, #tpu.memory_space<vmem>>, vector<1x48x176xbf16>
    %51 = vector.shape_cast %50 : vector<1x48x176xbf16> to vector<48x176xbf16>
    %cst_30 = arith.constant dense<0.000000e+00> : vector<48x128xf32>
    %52 = tpu.matmul %51, %37, %cst_30 {dimension_numbers = #tpu.dot_dimension_numbers<[1], [0], [0], [1], [0, 0, 1, 1], [], []>} : vector<48x176xbf16>, vector<176x128xbf16>, vector<48x128xf32> -> vector<48x128xf32>
    %c5 = arith.constant 5 : index
    %c0_31 = arith.constant 0 : index
    %c0_32 = arith.constant 0 : index
    %53 = vector.load %arg4[%c5, %c0_31, %c0_32] : memref<9x48x176xbf16, #tpu.memory_space<vmem>>, vector<1x48x176xbf16>
    %54 = vector.shape_cast %53 : vector<1x48x176xbf16> to vector<48x176xbf16>
    %cst_33 = arith.constant dense<0.000000e+00> : vector<48x128xf32>
    %55 = tpu.matmul %54, %37, %cst_33 {dimension_numbers = #tpu.dot_dimension_numbers<[1], [0], [0], [1], [0, 0, 1, 1], [], []>} : vector<48x176xbf16>, vector<176x128xbf16>, vector<48x128xf32> -> vector<48x128xf32>
    %c6 = arith.constant 6 : index
    %c0_34 = arith.constant 0 : index
    %c0_35 = arith.constant 0 : index
    %56 = vector.load %arg4[%c6, %c0_34, %c0_35] : memref<9x48x176xbf16, #tpu.memory_space<vmem>>, vector<1x48x176xbf16>
    %57 = vector.shape_cast %56 : vector<1x48x176xbf16> to vector<48x176xbf16>
    %cst_36 = arith.constant dense<0.000000e+00> : vector<48x128xf32>
    %58 = tpu.matmul %57, %37, %cst_36 {dimension_numbers = #tpu.dot_dimension_numbers<[1], [0], [0], [1], [0, 0, 1, 1], [], []>} : vector<48x176xbf16>, vector<176x128xbf16>, vector<48x128xf32> -> vector<48x128xf32>
    %c7 = arith.constant 7 : index
    %c0_37 = arith.constant 0 : index
    %c0_38 = arith.constant 0 : index
    %59 = vector.load %arg4[%c7, %c0_37, %c0_38] : memref<9x48x176xbf16, #tpu.memory_space<vmem>>, vector<1x48x176xbf16>
    %60 = vector.shape_cast %59 : vector<1x48x176xbf16> to vector<48x176xbf16>
    %cst_39 = arith.constant dense<0.000000e+00> : vector<48x128xf32>
    %61 = tpu.matmul %60, %37, %cst_39 {dimension_numbers = #tpu.dot_dimension_numbers<[1], [0], [0], [1], [0, 0, 1, 1], [], []>} : vector<48x176xbf16>, vector<176x128xbf16>, vector<48x128xf32> -> vector<48x128xf32>
    %c8 = arith.constant 8 : index
    %c0_40 = arith.constant 0 : index
    %c0_41 = arith.constant 0 : index
    %62 = vector.load %arg4[%c8, %c0_40, %c0_41] : memref<9x48x176xbf16, #tpu.memory_space<vmem>>, vector<1x48x176xbf16>
    %63 = vector.shape_cast %62 : vector<1x48x176xbf16> to vector<48x176xbf16>
    %cst_42 = arith.constant dense<0.000000e+00> : vector<48x128xf32>
    %64 = tpu.matmul %63, %37, %cst_42 {dimension_numbers = #tpu.dot_dimension_numbers<[1], [0], [0], [1], [0, 0, 1, 1], [], []>} : vector<48x176xbf16>, vector<176x128xbf16>, vector<48x128xf32> -> vector<48x128xf32>
    %65 = tpu.concatenate %40, %43, %46, %49, %52, %55, %58, %61, %64 in 1 : vector<48x128xf32>, vector<48x128xf32>, vector<48x128xf32>, vector<48x128xf32>, vector<48x128xf32>, vector<48x128xf32>, vector<48x128xf32>, vector<48x128xf32>, vector<48x128xf32> -> vector<48x1152xf32>
    %66 = arith.truncf %65 : vector<48x1152xf32> to vector<48x1152xbf16>
    %c0_43 = arith.constant 0 : index
    %c0_44 = arith.constant 0 : index
    %67 = vector.load %arg5[%c0_43, %c0_44] : memref<1152x128xbf16, #tpu.memory_space<vmem>>, vector<1152x128xbf16>
    %cst_45 = arith.constant dense<0.000000e+00> : vector<48x128xf32>
    %68 = tpu.matmul %66, %67, %cst_45 {dimension_numbers = #tpu.dot_dimension_numbers<[1], [0], [0], [1], [0, 0, 1, 1], [], []>} : vector<48x1152xbf16>, vector<1152x128xbf16>, vector<48x128xf32> -> vector<48x128xf32>
    %cst_46 = arith.constant dense<0.000000e+00> : vector<128xf32>
    %69 = vector.multi_reduction <add>, %68, %cst_46 [0] : vector<48x128xf32> to vector<128xf32>
    %70 = vector.shape_cast %69 : vector<128xf32> to vector<1x128xf32>
    %cst_47 = arith.constant 0.020833334 : f32
    %71 = vector.broadcast %cst_47 : f32 to vector<1x128xf32>
    %72 = arith.mulf %70, %71 : vector<1x128xf32>
    %73 = arith.mulf %68, %68 : vector<48x128xf32>
    %cst_48 = arith.constant dense<0.000000e+00> : vector<128xf32>
    %74 = vector.multi_reduction <add>, %73, %cst_48 [0] : vector<48x128xf32> to vector<128xf32>
    %75 = vector.shape_cast %74 : vector<128xf32> to vector<1x128xf32>
    %cst_49 = arith.constant 0.020833334 : f32
    %76 = vector.broadcast %cst_49 : f32 to vector<1x128xf32>
    %77 = arith.mulf %75, %76 : vector<1x128xf32>
    %78 = arith.mulf %72, %72 : vector<1x128xf32>
    %79 = arith.subf %77, %78 : vector<1x128xf32>
    %cst_50 = arith.constant 0.000000e+00 : f32
    %80 = vector.broadcast %cst_50 : f32 to vector<1x128xf32>
    %81 = arith.maximumf %79, %80 : vector<1x128xf32>
    %cst_51 = arith.constant 9.99999974E-6 : f32
    %82 = vector.broadcast %cst_51 : f32 to vector<1x128xf32>
    %83 = arith.addf %81, %82 : vector<1x128xf32>
    %84 = math.rsqrt %83 : vector<1x128xf32>
    %c0_52 = arith.constant 0 : index
    %c0_53 = arith.constant 0 : index
    %85 = vector.load %arg6[%c0_52, %c0_53] : memref<1x128xf32, #tpu.memory_space<vmem>>, vector<1x128xf32>
    %86 = arith.mulf %84, %85 : vector<1x128xf32>
    %c0_54 = arith.constant 0 : index
    %c0_55 = arith.constant 0 : index
    %87 = vector.load %arg7[%c0_54, %c0_55] : memref<1x128xf32, #tpu.memory_space<vmem>>, vector<1x128xf32>
    %88 = arith.mulf %72, %86 : vector<1x128xf32>
    %89 = arith.subf %87, %88 : vector<1x128xf32>
    %90 = vector.broadcast %86 : vector<1x128xf32> to vector<48x128xf32>
    %91 = arith.mulf %68, %90 : vector<48x128xf32>
    %92 = vector.broadcast %89 : vector<1x128xf32> to vector<48x128xf32>
    %93 = arith.addf %91, %92 : vector<48x128xf32>
    %cst_56 = arith.constant 0.000000e+00 : f32
    %94 = vector.broadcast %cst_56 : f32 to vector<48x128xf32>
    %95 = arith.cmpf ogt, %93, %94 : vector<48x128xf32>
    %cst_57 = arith.constant 2.000000e-01 : f32
    %96 = vector.broadcast %cst_57 : f32 to vector<48x128xf32>
    %97 = arith.mulf %96, %93 : vector<48x128xf32>
    %98 = arith.select %95, %93, %97 : vector<48x128xi1>, vector<48x128xf32>
    %99 = arith.truncf %98 : vector<48x128xf32> to vector<48x128xbf16>
    %c0_58 = arith.constant 0 : index
    %c0_59 = arith.constant 0 : index
    %c0_60 = arith.constant 0 : index
    %100 = vector.load %arg8[%c0_58, %c0_59, %c0_60] : memref<9x16x48xbf16, #tpu.memory_space<vmem>>, vector<1x16x48xbf16>
    %101 = vector.shape_cast %100 : vector<1x16x48xbf16> to vector<16x48xbf16>
    %cst_61 = arith.constant dense<0.000000e+00> : vector<16x128xf32>
    %102 = tpu.matmul %101, %99, %cst_61 {dimension_numbers = #tpu.dot_dimension_numbers<[1], [0], [0], [1], [0, 0, 1, 1], [], []>} : vector<16x48xbf16>, vector<48x128xbf16>, vector<16x128xf32> -> vector<16x128xf32>
    %c1_62 = arith.constant 1 : index
    %c0_63 = arith.constant 0 : index
    %c0_64 = arith.constant 0 : index
    %103 = vector.load %arg8[%c1_62, %c0_63, %c0_64] : memref<9x16x48xbf16, #tpu.memory_space<vmem>>, vector<1x16x48xbf16>
    %104 = vector.shape_cast %103 : vector<1x16x48xbf16> to vector<16x48xbf16>
    %cst_65 = arith.constant dense<0.000000e+00> : vector<16x128xf32>
    %105 = tpu.matmul %104, %99, %cst_65 {dimension_numbers = #tpu.dot_dimension_numbers<[1], [0], [0], [1], [0, 0, 1, 1], [], []>} : vector<16x48xbf16>, vector<48x128xbf16>, vector<16x128xf32> -> vector<16x128xf32>
    %c2_66 = arith.constant 2 : index
    %c0_67 = arith.constant 0 : index
    %c0_68 = arith.constant 0 : index
    %106 = vector.load %arg8[%c2_66, %c0_67, %c0_68] : memref<9x16x48xbf16, #tpu.memory_space<vmem>>, vector<1x16x48xbf16>
    %107 = vector.shape_cast %106 : vector<1x16x48xbf16> to vector<16x48xbf16>
    %cst_69 = arith.constant dense<0.000000e+00> : vector<16x128xf32>
    %108 = tpu.matmul %107, %99, %cst_69 {dimension_numbers = #tpu.dot_dimension_numbers<[1], [0], [0], [1], [0, 0, 1, 1], [], []>} : vector<16x48xbf16>, vector<48x128xbf16>, vector<16x128xf32> -> vector<16x128xf32>
    %c3_70 = arith.constant 3 : index
    %c0_71 = arith.constant 0 : index
    %c0_72 = arith.constant 0 : index
    %109 = vector.load %arg8[%c3_70, %c0_71, %c0_72] : memref<9x16x48xbf16, #tpu.memory_space<vmem>>, vector<1x16x48xbf16>
    %110 = vector.shape_cast %109 : vector<1x16x48xbf16> to vector<16x48xbf16>
    %cst_73 = arith.constant dense<0.000000e+00> : vector<16x128xf32>
    %111 = tpu.matmul %110, %99, %cst_73 {dimension_numbers = #tpu.dot_dimension_numbers<[1], [0], [0], [1], [0, 0, 1, 1], [], []>} : vector<16x48xbf16>, vector<48x128xbf16>, vector<16x128xf32> -> vector<16x128xf32>
    %c4_74 = arith.constant 4 : index
    %c0_75 = arith.constant 0 : index
    %c0_76 = arith.constant 0 : index
    %112 = vector.load %arg8[%c4_74, %c0_75, %c0_76] : memref<9x16x48xbf16, #tpu.memory_space<vmem>>, vector<1x16x48xbf16>
    %113 = vector.shape_cast %112 : vector<1x16x48xbf16> to vector<16x48xbf16>
    %cst_77 = arith.constant dense<0.000000e+00> : vector<16x128xf32>
    %114 = tpu.matmul %113, %99, %cst_77 {dimension_numbers = #tpu.dot_dimension_numbers<[1], [0], [0], [1], [0, 0, 1, 1], [], []>} : vector<16x48xbf16>, vector<48x128xbf16>, vector<16x128xf32> -> vector<16x128xf32>
    %c5_78 = arith.constant 5 : index
    %c0_79 = arith.constant 0 : index
    %c0_80 = arith.constant 0 : index
    %115 = vector.load %arg8[%c5_78, %c0_79, %c0_80] : memref<9x16x48xbf16, #tpu.memory_space<vmem>>, vector<1x16x48xbf16>
    %116 = vector.shape_cast %115 : vector<1x16x48xbf16> to vector<16x48xbf16>
    %cst_81 = arith.constant dense<0.000000e+00> : vector<16x128xf32>
    %117 = tpu.matmul %116, %99, %cst_81 {dimension_numbers = #tpu.dot_dimension_numbers<[1], [0], [0], [1], [0, 0, 1, 1], [], []>} : vector<16x48xbf16>, vector<48x128xbf16>, vector<16x128xf32> -> vector<16x128xf32>
    %c6_82 = arith.constant 6 : index
    %c0_83 = arith.constant 0 : index
    %c0_84 = arith.constant 0 : index
    %118 = vector.load %arg8[%c6_82, %c0_83, %c0_84] : memref<9x16x48xbf16, #tpu.memory_space<vmem>>, vector<1x16x48xbf16>
    %119 = vector.shape_cast %118 : vector<1x16x48xbf16> to vector<16x48xbf16>
    %cst_85 = arith.constant dense<0.000000e+00> : vector<16x128xf32>
    %120 = tpu.matmul %119, %99, %cst_85 {dimension_numbers = #tpu.dot_dimension_numbers<[1], [0], [0], [1], [0, 0, 1, 1], [], []>} : vector<16x48xbf16>, vector<48x128xbf16>, vector<16x128xf32> -> vector<16x128xf32>
    %c7_86 = arith.constant 7 : index
    %c0_87 = arith.constant 0 : index
    %c0_88 = arith.constant 0 : index
    %121 = vector.load %arg8[%c7_86, %c0_87, %c0_88] : memref<9x16x48xbf16, #tpu.memory_space<vmem>>, vector<1x16x48xbf16>
    %122 = vector.shape_cast %121 : vector<1x16x48xbf16> to vector<16x48xbf16>
    %cst_89 = arith.constant dense<0.000000e+00> : vector<16x128xf32>
    %123 = tpu.matmul %122, %99, %cst_89 {dimension_numbers = #tpu.dot_dimension_numbers<[1], [0], [0], [1], [0, 0, 1, 1], [], []>} : vector<16x48xbf16>, vector<48x128xbf16>, vector<16x128xf32> -> vector<16x128xf32>
    %c8_90 = arith.constant 8 : index
    %c0_91 = arith.constant 0 : index
    %c0_92 = arith.constant 0 : index
    %124 = vector.load %arg8[%c8_90, %c0_91, %c0_92] : memref<9x16x48xbf16, #tpu.memory_space<vmem>>, vector<1x16x48xbf16>
    %125 = vector.shape_cast %124 : vector<1x16x48xbf16> to vector<16x48xbf16>
    %cst_93 = arith.constant dense<0.000000e+00> : vector<16x128xf32>
    %126 = tpu.matmul %125, %99, %cst_93 {dimension_numbers = #tpu.dot_dimension_numbers<[1], [0], [0], [1], [0, 0, 1, 1], [], []>} : vector<16x48xbf16>, vector<48x128xbf16>, vector<16x128xf32> -> vector<16x128xf32>
    %127 = tpu.concatenate %102, %105, %108, %111, %114, %117, %120, %123, %126 in 1 : vector<16x128xf32>, vector<16x128xf32>, vector<16x128xf32>, vector<16x128xf32>, vector<16x128xf32>, vector<16x128xf32>, vector<16x128xf32>, vector<16x128xf32>, vector<16x128xf32> -> vector<16x1152xf32>
    %128 = arith.truncf %127 : vector<16x1152xf32> to vector<16x1152xbf16>
    %c0_i32_94 = arith.constant 0 : i32
    %129 = tpu.memref_slice %arg17[%c0_i32_94] : memref<2x!tpu.dma_semaphore, #tpu.memory_space<semaphore_mem>> -> memref<1x!tpu.dma_semaphore, #tpu.memory_space<semaphore_mem>>
    %130 = tpu.memref_squeeze %129 : memref<1x!tpu.dma_semaphore, #tpu.memory_space<semaphore_mem>> -> memref<!tpu.dma_semaphore, #tpu.memory_space<semaphore_mem>>
    tpu.wait_dma2 semaphore(%130 : memref<!tpu.dma_semaphore, #tpu.memory_space<semaphore_mem>>) src(%arg12 : memref<1152x256xbf16, #tpu.memory_space<any>>) dst(%arg15 : memref<1152x256xbf16, #tpu.memory_space<vmem>>)
    %c0_95 = arith.constant 0 : index
    %c0_96 = arith.constant 0 : index
    %131 = vector.load %arg15[%c0_95, %c0_96] : memref<1152x256xbf16, #tpu.memory_space<vmem>>, vector<1152x256xbf16>
    %cst_97 = arith.constant dense<0.000000e+00> : vector<16x256xf32>
    %132 = tpu.matmul %128, %131, %cst_97 {dimension_numbers = #tpu.dot_dimension_numbers<[1], [0], [0], [1], [0, 0, 1, 1], [], []>} : vector<16x1152xbf16>, vector<1152x256xbf16>, vector<16x256xf32> -> vector<16x256xf32>
    %cst_98 = arith.constant dense<0.000000e+00> : vector<256xf32>
    %133 = vector.multi_reduction <add>, %132, %cst_98 [0] : vector<16x256xf32> to vector<256xf32>
    %134 = vector.shape_cast %133 : vector<256xf32> to vector<1x256xf32>
    %cst_99 = arith.constant 6.250000e-02 : f32
    %135 = vector.broadcast %cst_99 : f32 to vector<1x256xf32>
    %136 = arith.mulf %134, %135 : vector<1x256xf32>
    %137 = arith.mulf %132, %132 : vector<16x256xf32>
    %cst_100 = arith.constant dense<0.000000e+00> : vector<256xf32>
    %138 = vector.multi_reduction <add>, %137, %cst_100 [0] : vector<16x256xf32> to vector<256xf32>
    %139 = vector.shape_cast %138 : vector<256xf32> to vector<1x256xf32>
    %cst_101 = arith.constant 6.250000e-02 : f32
    %140 = vector.broadcast %cst_101 : f32 to vector<1x256xf32>
    %141 = arith.mulf %139, %140 : vector<1x256xf32>
    %142 = arith.mulf %136, %136 : vector<1x256xf32>
    %143 = arith.subf %141, %142 : vector<1x256xf32>
    %cst_102 = arith.constant 0.000000e+00 : f32
    %144 = vector.broadcast %cst_102 : f32 to vector<1x256xf32>
    %145 = arith.maximumf %143, %144 : vector<1x256xf32>
    %cst_103 = arith.constant 9.99999974E-6 : f32
    %146 = vector.broadcast %cst_103 : f32 to vector<1x256xf32>
    %147 = arith.addf %145, %146 : vector<1x256xf32>
    %148 = math.rsqrt %147 : vector<1x256xf32>
    %c0_104 = arith.constant 0 : index
    %c0_105 = arith.constant 0 : index
    %149 = vector.load %arg9[%c0_104, %c0_105] : memref<1x256xf32, #tpu.memory_space<vmem>>, vector<1x256xf32>
    %150 = arith.mulf %148, %149 : vector<1x256xf32>
    %c0_106 = arith.constant 0 : index
    %c0_107 = arith.constant 0 : index
    %151 = vector.load %arg10[%c0_106, %c0_107] : memref<1x256xf32, #tpu.memory_space<vmem>>, vector<1x256xf32>
    %152 = arith.mulf %136, %150 : vector<1x256xf32>
    %153 = arith.subf %151, %152 : vector<1x256xf32>
    %154 = vector.broadcast %150 : vector<1x256xf32> to vector<16x256xf32>
    %155 = arith.mulf %132, %154 : vector<16x256xf32>
    %156 = vector.broadcast %153 : vector<1x256xf32> to vector<16x256xf32>
    %157 = arith.addf %155, %156 : vector<16x256xf32>
    %cst_108 = arith.constant 0.000000e+00 : f32
    %158 = vector.broadcast %cst_108 : f32 to vector<16x256xf32>
    %159 = arith.cmpf ogt, %157, %158 : vector<16x256xf32>
    %cst_109 = arith.constant 2.000000e-01 : f32
    %160 = vector.broadcast %cst_109 : f32 to vector<16x256xf32>
    %161 = arith.mulf %160, %157 : vector<16x256xf32>
    %162 = arith.select %159, %157, %161 : vector<16x256xi1>, vector<16x256xf32>
    %163 = arith.truncf %162 : vector<16x256xf32> to vector<16x256xbf16>
    %c0_110 = arith.constant 0 : index
    %c0_111 = arith.constant 0 : index
    %c0_112 = arith.constant 0 : index
    %164 = vector.load %arg11[%c0_110, %c0_111, %c0_112] : memref<4x8x16xbf16, #tpu.memory_space<vmem>>, vector<1x8x16xbf16>
    %165 = vector.shape_cast %164 : vector<1x8x16xbf16> to vector<8x16xbf16>
    %cst_113 = arith.constant dense<0.000000e+00> : vector<8x256xf32>
    %166 = tpu.matmul %165, %163, %cst_113 {dimension_numbers = #tpu.dot_dimension_numbers<[1], [0], [0], [1], [0, 0, 1, 1], [], []>} : vector<8x16xbf16>, vector<16x256xbf16>, vector<8x256xf32> -> vector<8x256xf32>
    %c1_114 = arith.constant 1 : index
    %c0_115 = arith.constant 0 : index
    %c0_116 = arith.constant 0 : index
    %167 = vector.load %arg11[%c1_114, %c0_115, %c0_116] : memref<4x8x16xbf16, #tpu.memory_space<vmem>>, vector<1x8x16xbf16>
    %168 = vector.shape_cast %167 : vector<1x8x16xbf16> to vector<8x16xbf16>
    %cst_117 = arith.constant dense<0.000000e+00> : vector<8x256xf32>
    %169 = tpu.matmul %168, %163, %cst_117 {dimension_numbers = #tpu.dot_dimension_numbers<[1], [0], [0], [1], [0, 0, 1, 1], [], []>} : vector<8x16xbf16>, vector<16x256xbf16>, vector<8x256xf32> -> vector<8x256xf32>
    %c2_118 = arith.constant 2 : index
    %c0_119 = arith.constant 0 : index
    %c0_120 = arith.constant 0 : index
    %170 = vector.load %arg11[%c2_118, %c0_119, %c0_120] : memref<4x8x16xbf16, #tpu.memory_space<vmem>>, vector<1x8x16xbf16>
    %171 = vector.shape_cast %170 : vector<1x8x16xbf16> to vector<8x16xbf16>
    %cst_121 = arith.constant dense<0.000000e+00> : vector<8x256xf32>
    %172 = tpu.matmul %171, %163, %cst_121 {dimension_numbers = #tpu.dot_dimension_numbers<[1], [0], [0], [1], [0, 0, 1, 1], [], []>} : vector<8x16xbf16>, vector<16x256xbf16>, vector<8x256xf32> -> vector<8x256xf32>
    %c3_122 = arith.constant 3 : index
    %c0_123 = arith.constant 0 : index
    %c0_124 = arith.constant 0 : index
    %173 = vector.load %arg11[%c3_122, %c0_123, %c0_124] : memref<4x8x16xbf16, #tpu.memory_space<vmem>>, vector<1x8x16xbf16>
    %174 = vector.shape_cast %173 : vector<1x8x16xbf16> to vector<8x16xbf16>
    %cst_125 = arith.constant dense<0.000000e+00> : vector<8x256xf32>
    %175 = tpu.matmul %174, %163, %cst_125 {dimension_numbers = #tpu.dot_dimension_numbers<[1], [0], [0], [1], [0, 0, 1, 1], [], []>} : vector<8x16xbf16>, vector<16x256xbf16>, vector<8x256xf32> -> vector<8x256xf32>
    %176 = tpu.concatenate %166, %169, %172, %175 in 1 : vector<8x256xf32>, vector<8x256xf32>, vector<8x256xf32>, vector<8x256xf32> -> vector<8x1024xf32>
    %177 = arith.truncf %176 : vector<8x1024xf32> to vector<8x1024xbf16>
    %c1_i32_126 = arith.constant 1 : i32
    %178 = tpu.memref_slice %arg17[%c1_i32_126] : memref<2x!tpu.dma_semaphore, #tpu.memory_space<semaphore_mem>> -> memref<1x!tpu.dma_semaphore, #tpu.memory_space<semaphore_mem>>
    %179 = tpu.memref_squeeze %178 : memref<1x!tpu.dma_semaphore, #tpu.memory_space<semaphore_mem>> -> memref<!tpu.dma_semaphore, #tpu.memory_space<semaphore_mem>>
    tpu.wait_dma2 semaphore(%179 : memref<!tpu.dma_semaphore, #tpu.memory_space<semaphore_mem>>) src(%arg13 : memref<1024x512xbf16, #tpu.memory_space<any>>) dst(%arg16 : memref<1024x512xbf16, #tpu.memory_space<vmem>>)
    %c0_127 = arith.constant 0 : index
    %c0_128 = arith.constant 0 : index
    %180 = vector.load %arg16[%c0_127, %c0_128] : memref<1024x512xbf16, #tpu.memory_space<vmem>>, vector<1024x512xbf16>
    %cst_129 = arith.constant dense<0.000000e+00> : vector<8x512xf32>
    %181 = tpu.matmul %177, %180, %cst_129 {dimension_numbers = #tpu.dot_dimension_numbers<[1], [0], [0], [1], [0, 0, 1, 1], [], []>} : vector<8x1024xbf16>, vector<1024x512xbf16>, vector<8x512xf32> -> vector<8x512xf32>
    %c0_130 = arith.constant 0 : index
    %c0_131 = arith.constant 0 : index
    %182 = vector.load %arg14[%c0_130, %c0_131] : memref<8x512xf32, #tpu.memory_space<vmem>>, vector<8x512xf32>
    tpu.vector_store %arg14[%c0_130, %c0_131], %181 {strides = array<i32>} : memref<8x512xf32, #tpu.memory_space<vmem>>, vector<8x512xf32>,
    return
  }
}

</mosaic_0001>

<bundles_post_ra>
// kernel: mfcc_encoder_forward.1
= control target key start
LH: loop header
LB: loop body
LE: loop exit
PB: predicated region body
PF: predicated region fallthrough
CT: control target
= control target key end

     0   :  { %s12451_s0 = inlined_call_operand.vmem [shape: bf16[176,9], index: 0, kind: input, shape index: {}]   ;;  %s12452_s1 = inlined_call_operand.vmem [shape: bf16[9,128], index: 1, kind: input, shape index: {}]   ;;  %s12453_s2 = inlined_call_operand.vmem [shape: f32[1,128], index: 2, kind: input, shape index: {}]   ;;  %s12454_s3 = inlined_call_operand.vmem [shape: f32[1,128], index: 3, kind: input, shape index: {}]   ;;  %s12455_s4 = inlined_call_operand.vmem [shape: bf16[9,48,176], index: 4, kind: input, shape index: {}]   ;;  %s12456_s5 = inlined_call_operand.vmem [shape: bf16[1152,128], index: 5, kind: input, shape index: {}]   ;;  %s12457_s6 = inlined_call_operand.vmem [shape: f32[1,128], index: 6, kind: input, shape index: {}]   ;;  %s12458_s7 = inlined_call_operand.vmem [shape: f32[1,128], index: 7, kind: input, shape index: {}]   ;;  %s12459_s8 = inlined_call_operand.vmem [shape: bf16[9,16,48], index: 8, kind: input, shape index: {}]   ;;  %s12460_s9 = inlined_call_operand.vmem [shape: f32[1,256], index: 9, kind: input, shape index: {}]   ;;  %s12461_s10 = inlined_call_operand.vmem [shape: f32[1,256], index: 10, kind: input, shape index: {}]   ;;  %s12462_s11 = inlined_call_operand.vmem [shape: bf16[4,8,16], index: 11, kind: input, shape index: {}]   ;;  %s12463_s12 = inlined_call_operand.vmem [shape: bf16[1152,256], index: 12, kind: input, shape index: {}]   ;;  %s12464_s13 = inlined_call_operand.vmem [shape: bf16[1024,512], index: 13, kind: input, shape index: {}]   ;;  %s12465_s14 = inlined_call_operand.vmem [shape: f32[8,512], index: 14, kind: output, shape index: {}]  }
   0x1   :  { %v8344_v0 = vld [vmem:[%s12463_s12] sm:$0xff]  ;;  %v8349_v1 = vld [vmem:[%s12463_s12 + $0x8] sm:$0xff]  ;;  %v8354_v2 = vld [vmem:[%s12463_s12 + $0x10] sm:$0xff] }
   0x2   :  { %12867 = vst [vmem:[#allocation9_spill] sm:$0xff] %v8344_v0  ;;  %12868 = vst [vmem:[#allocation10_spill] sm:$0xff] %v8349_v1  ;;  %v8359_v3 = vld [vmem:[%s12463_s12 + $0x18] sm:$0xff]  ;;  %v8364_v4 = vld [vmem:[%s12463_s12 + $0x20] sm:$0xff] }
   0x3   :  { %12869 = vst [vmem:[#allocation11_spill] sm:$0xff] %v8354_v2  ;;  %12870 = vst [vmem:[#allocation12_spill] sm:$0xff] %v8359_v3  ;;  %v8369_v5 = vld [vmem:[%s12463_s12 + $0x28] sm:$0xff]  ;;  %v8374_v6 = vld [vmem:[%s12463_s12 + $0x30] sm:$0xff] }
   0x4   :  { %12871 = vst [vmem:[#allocation13_spill] sm:$0xff] %v8364_v4  ;;  %12872 = vst [vmem:[#allocation14_spill] sm:$0xff] %v8369_v5  ;;  %v8379_v7 = vld [vmem:[%s12463_s12 + $0x38] sm:$0xff]  ;;  %v8384_v8 = vld [vmem:[%s12463_s12 + $0x40] sm:$0xff] }
   0x5   :  { %12873 = vst [vmem:[#allocation15_spill] sm:$0xff] %v8374_v6  ;;  %12874 = vst [vmem:[#allocation16_spill] sm:$0xff] %v8379_v7  ;;  %v8389_v9 = vld [vmem:[%s12463_s12 + $0x48] sm:$0xff]  ;;  %v8394_v10 = vld [vmem:[%s12463_s12 + $0x50] sm:$0xff] }
   0x6   :  { %12875 = vst [vmem:[#allocation17_spill] sm:$0xff] %v8384_v8  ;;  %12876 = vst [vmem:[#allocation18_spill] sm:$0xff] %v8389_v9  ;;  %v8399_v11 = vld [vmem:[%s12463_s12 + $0x58] sm:$0xff]  ;;  %v8404_v12 = vld [vmem:[%s12463_s12 + $0x60] sm:$0xff] }
   0x7   :  { %12877 = vst [vmem:[#allocation19_spill] sm:$0xff] %v8394_v10  ;;  %12878 = vst [vmem:[#allocation20_spill] sm:$0xff] %v8399_v11  ;;  %v8409_v13 = vld [vmem:[%s12463_s12 + $0x68] sm:$0xff]  ;;  %v8414_v14 = vld [vmem:[%s12463_s12 + $0x70] sm:$0xff] }
   0x8   :  { %v8419_v15 = vld [vmem:[%s12463_s12 + $0x78] sm:$0xff]  ;;  %v8424_v16 = vld [vmem:[%s12463_s12 + $0x80] sm:$0xff]  ;;  %v8429_v17 = vld [vmem:[%s12463_s12 + $0x88] sm:$0xff] }
   0x9   :  { %12879 = vst [vmem:[#allocation21_spill] sm:$0xff] %v8424_v16  ;;  %12880 = vst [vmem:[#allocation22_spill] sm:$0xff] %v8429_v17  ;;  %v8434_v18 = vld [vmem:[%s12463_s12 + $0x90] sm:$0xff]  ;;  %v8439_v19 = vld [vmem:[%s12463_s12 + $0x98] sm:$0xff] }
   0xa   :  { %12881 = vst [vmem:[#allocation23_spill] sm:$0xff] %v8434_v18  ;;  %12882 = vst [vmem:[#allocation24_spill] sm:$0xff] %v8439_v19  ;;  %v8444_v20 = vld [vmem:[%s12463_s12 + $0xa0] sm:$0xff]  ;;  %v8449_v21 = vld [vmem:[%s12463_s12 + $0xa8] sm:$0xff] }
   0xb   :  { %12883 = vst [vmem:[#allocation25_spill] sm:$0xff] %v8444_v20  ;;  %12884 = vst [vmem:[#allocation26_spill] sm:$0xff] %v8449_v21  ;;  %v8454_v22 = vld [vmem:[%s12463_s12 + $0xb0] sm:$0xff]  ;;  %v8459_v23 = vld [vmem:[%s12463_s12 + $0xb8] sm:$0xff] }
   0xc   :  { %12885 = vst [vmem:[#allocation27_spill] sm:$0xff] %v8454_v22  ;;  %12886 = vst [vmem:[#allocation28_spill] sm:$0xff] %v8459_v23  ;;  %v8464_v24 = vld [vmem:[%s12463_s12 + $0xc0] sm:$0xff]  ;;  %v8469_v25 = vld [vmem:[%s12463_s12 + $0xc8] sm:$0xff] }
   0xd   :  { %12887 = vst [vmem:[#allocation29_spill] sm:$0xff] %v8464_v24  ;;  %12888 = vst [vmem:[#allocation30_spill] sm:$0xff] %v8469_v25  ;;  %v8474_v26 = vld [vmem:[%s12463_s12 + $0xd0] sm:$0xff]  ;;  %v8479_v27 = vld [vmem:[%s12463_s12 + $0xd8] sm:$0xff] }
   0xe   :  { %12889 = vst [vmem:[#allocation31_spill] sm:$0xff] %v8474_v26  ;;  %12890 = vst [vmem:[#allocation32_spill] sm:$0xff] %v8479_v27  ;;  %v8484_v28 = vld [vmem:[%s12463_s12 + $0xe0] sm:$0xff]  ;;  %v8489_v29 = vld [vmem:[%s12463_s12 + $0xe8] sm:$0xff] }
   0xf   :  { %12891 = vst [vmem:[#allocation33_spill] sm:$0xff] %v8484_v28  ;;  %12892 = vst [vmem:[#allocation34_spill] sm:$0xff] %v8489_v29  ;;  %v8494_v30 = vld [vmem:[%s12463_s12 + $0xf0] sm:$0xff]  ;;  %v8499_v31 = vld [vmem:[%s12463_s12 + $0xf8] sm:$0xff] }
  0x10   :  { %12893 = vst [vmem:[#allocation35_spill] sm:$0xff] %v8494_v30  ;;  %12894 = vst [vmem:[#allocation36_spill] sm:$0xff] %v8499_v31  ;;  %v8504_v32 = vld [vmem:[%s12463_s12 + $0x100] sm:$0xff]  ;;  %v8509_v33 = vld [vmem:[%s12463_s12 + $0x108] sm:$0xff] }
  0x11   :  { %12895 = vst [vmem:[#allocation37_spill] sm:$0xff] %v8504_v32  ;;  %12896 = vst [vmem:[#allocation38_spill] sm:$0xff] %v8509_v33  ;;  %v8514_v34 = vld [vmem:[%s12463_s12 + $0x110] sm:$0xff]  ;;  %v8519_v35 = vld [vmem:[%s12463_s12 + $0x118] sm:$0xff] }
  0x12   :  { %12897 = vst [vmem:[#allocation39_spill] sm:$0xff] %v8514_v34  ;;  %12898 = vst [vmem:[#allocation40_spill] sm:$0xff] %v8519_v35  ;;  %v8524_v36 = vld [vmem:[%s12463_s12 + $0x120] sm:$0xff]  ;;  %v8529_v37 = vld [vmem:[%s12463_s12 + $0x128] sm:$0xff] }
  0x13   :  { %12899 = vst [vmem:[#allocation41_spill] sm:$0xff] %v8524_v36  ;;  %12900 = vst [vmem:[#allocation42_spill] sm:$0xff] %v8529_v37  ;;  %v8534_v38 = vld [vmem:[%s12463_s12 + $0x130] sm:$0xff]  ;;  %v8539_v39 = vld [vmem:[%s12463_s12 + $0x138] sm:$0xff] }
  0x14   :  { %12901 = vst [vmem:[#allocation43_spill] sm:$0xff] %v8534_v38  ;;  %12902 = vst [vmem:[#allocation44_spill] sm:$0xff] %v8539_v39  ;;  %v8544_v40 = vld [vmem:[%s12463_s12 + $0x140] sm:$0xff]  ;;  %v8549_v41 = vld [vmem:[%s12463_s12 + $0x148] sm:$0xff] }
  0x15   :  { %12903 = vst [vmem:[#allocation45_spill] sm:$0xff] %v8544_v40  ;;  %12904 = vst [vmem:[#allocation46_spill] sm:$0xff] %v8549_v41  ;;  %v8554_v42 = vld [vmem:[%s12463_s12 + $0x150] sm:$0xff]  ;;  %v8559_v43 = vld [vmem:[%s12463_s12 + $0x158] sm:$0xff] }
  0x16   :  { %12905 = vst [vmem:[#allocation47_spill] sm:$0xff] %v8554_v42  ;;  %12906 = vst [vmem:[#allocation48_spill] sm:$0xff] %v8559_v43  ;;  %v8564_v44 = vld [vmem:[%s12463_s12 + $0x160] sm:$0xff]  ;;  %v8569_v45 = vld [vmem:[%s12463_s12 + $0x168] sm:$0xff] }
  0x17   :  { %12907 = vst [vmem:[#allocation49_spill] sm:$0xff] %v8564_v44  ;;  %12908 = vst [vmem:[#allocation50_spill] sm:$0xff] %v8569_v45  ;;  %v8574_v46 = vld [vmem:[%s12463_s12 + $0x170] sm:$0xff]  ;;  %v8579_v47 = vld [vmem:[%s12463_s12 + $0x178] sm:$0xff] }
  0x18   :  { %v8584_v48 = vld [vmem:[%s12463_s12 + $0x180] sm:$0xff]  ;;  %v8589_v49 = vld [vmem:[%s12463_s12 + $0x188] sm:$0xff]  ;;  %v8594_v50 = vld [vmem:[%s12463_s12 + $0x190] sm:$0xff] }
  0x19   :  { %12909 = vst [vmem:[#allocation51_spill] sm:$0xff] %v8584_v48  ;;  %12910 = vst [vmem:[#allocation52_spill] sm:$0xff] %v8589_v49  ;;  %v8599_v51 = vld [vmem:[%s12463_s12 + $0x198] sm:$0xff]  ;;  %v8604_v52 = vld [vmem:[%s12463_s12 + $0x1a0] sm:$0xff] }
  0x1a   :  { %12911 = vst [vmem:[#allocation53_spill] sm:$0xff] %v8594_v50  ;;  %12912 = vst [vmem:[#allocation54_spill] sm:$0xff] %v8599_v51  ;;  %v8609_v53 = vld [vmem:[%s12463_s12 + $0x1a8] sm:$0xff]  ;;  %v8614_v54 = vld [vmem:[%s12463_s12 + $0x1b0] sm:$0xff] }
  0x1b   :  { %12913 = vst [vmem:[#allocation55_spill] sm:$0xff] %v8604_v52  ;;  %12914 = vst [vmem:[#allocation56_spill] sm:$0xff] %v8609_v53  ;;  %v8619_v55 = vld [vmem:[%s12463_s12 + $0x1b8] sm:$0xff]  ;;  %v8624_v56 = vld [vmem:[%s12463_s12 + $0x1c0] sm:$0xff] }
  0x1c   :  { %12915 = vst [vmem:[#allocation57_spill] sm:$0xff] %v8614_v54  ;;  %12916 = vst [vmem:[#allocation58_spill] sm:$0xff] %v8619_v55  ;;  %v8629_v57 = vld [vmem:[%s12463_s12 + $0x1c8] sm:$0xff]  ;;  %v8634_v58 = vld [vmem:[%s12463_s12 + $0x1d0] sm:$0xff] }
  0x1d   :  { %12917 = vst [vmem:[#allocation59_spill] sm:$0xff] %v8624_v56  ;;  %12918 = vst [vmem:[#allocation60_spill] sm:$0xff] %v8629_v57  ;;  %v8639_v59 = vld [vmem:[%s12463_s12 + $0x1d8] sm:$0xff]  ;;  %v8644_v60 = vld [vmem:[%s12463_s12 + $0x1e0] sm:$0xff] }
  0x1e   :  { %12919 = vst [vmem:[#allocation61_spill] sm:$0xff] %v8634_v58  ;;  %12920 = vst [vmem:[#allocation62_spill] sm:$0xff] %v8639_v59  ;;  %v8649_v61 = vld [vmem:[%s12463_s12 + $0x1e8] sm:$0xff]  ;;  %v8654_v62 = vld [vmem:[%s12463_s12 + $0x1f0] sm:$0xff] }
  0x1f   :  { %12921 = vst [vmem:[#allocation63_spill] sm:$0xff] %v8644_v60  ;;  %12922 = vst [vmem:[#allocation64_spill] sm:$0xff] %v8649_v61  ;;  %v8659_v63 = vld [vmem:[%s12463_s12 + $0x1f8] sm:$0xff]  ;;  %v8664_v48 = vld [vmem:[%s12463_s12 + $0x200] sm:$0xff] }
  0x20   :  { %12923 = vst [vmem:[#allocation65_spill] sm:$0xff] %v8654_v62  ;;  %12924 = vst [vmem:[#allocation66_spill] sm:$0xff] %v8659_v63  ;;  %v8669_v49 = vld [vmem:[%s12463_s12 + $0x208] sm:$0xff]  ;;  %v8674_v16 = vld [vmem:[%s12463_s12 + $0x210] sm:$0xff] }
  0x21   :  { %12925 = vst [vmem:[#allocation67_spill] sm:$0xff] %v8664_v48  ;;  %12926 = vst [vmem:[#allocation68_spill] sm:$0xff] %v8669_v49  ;;  %v8679_v17 = vld [vmem:[%s12463_s12 + $0x218] sm:$0xff]  ;;  %v8684_v50 = vld [vmem:[%s12463_s12 + $0x220] sm:$0xff] }
  0x22   :  { %12927 = vst [vmem:[#allocation69_spill] sm:$0xff] %v8674_v16  ;;  %12928 = vst [vmem:[#allocation70_spill] sm:$0xff] %v8679_v17  ;;  %v8689_v48 = vld [vmem:[%s12463_s12 + $0x228] sm:$0xff]  ;;  %v8694_v49 = vld [vmem:[%s12463_s12 + $0x230] sm:$0xff] }
  0x23   :  { %12929 = vst [vmem:[#allocation71_spill] sm:$0xff] %v8684_v50  ;;  %12930 = vst [vmem:[#allocation72_spill] sm:$0xff] %v8689_v48  ;;  %v8699_v16 = vld [vmem:[%s12463_s12 + $0x238] sm:$0xff]  ;;  %v8704_v17 = vld [vmem:[%s12463_s12 + $0x240] sm:$0xff] }
  0x24   :  { %12931 = vst [vmem:[#allocation73_spill] sm:$0xff] %v8694_v49  ;;  %12932 = vst [vmem:[#allocation74_spill] sm:$0xff] %v8699_v16  ;;  %v8709_v50 = vld [vmem:[%s12463_s12 + $0x248] sm:$0xff]  ;;  %v8714_v48 = vld [vmem:[%s12463_s12 + $0x250] sm:$0xff] }
  0x25   :  { %12933 = vst [vmem:[#allocation75_spill] sm:$0xff] %v8704_v17  ;;  %12934 = vst [vmem:[#allocation76_spill] sm:$0xff] %v8709_v50  ;;  %v8719_v49 = vld [vmem:[%s12463_s12 + $0x258] sm:$0xff]  ;;  %v8724_v16 = vld [vmem:[%s12463_s12 + $0x260] sm:$0xff] }
  0x26   :  { %12935 = vst [vmem:[#allocation77_spill] sm:$0xff] %v8714_v48  ;;  %12936 = vst [vmem:[#allocation78_spill] sm:$0xff] %v8719_v49  ;;  %v8729_v17 = vld [vmem:[%s12463_s12 + $0x268] sm:$0xff]  ;;  %v8734_v50 = vld [vmem:[%s12463_s12 + $0x270] sm:$0xff] }
  0x27   :  { %12937 = vst [vmem:[#allocation79_spill] sm:$0xff] %v8724_v16  ;;  %12938 = vst [vmem:[#allocation80_spill] sm:$0xff] %v8729_v17  ;;  %v8739_v48 = vld [vmem:[%s12463_s12 + $0x278] sm:$0xff]  ;;  %v8744_v49 = vld [vmem:[%s12463_s12 + $0x280] sm:$0xff] }
  0x28   :  { %12939 = vst [vmem:[#allocation81_spill] sm:$0xff] %v8734_v50  ;;  %12940 = vst [vmem:[#allocation82_spill] sm:$0xff] %v8739_v48  ;;  %v8749_v16 = vld [vmem:[%s12463_s12 + $0x288] sm:$0xff]  ;;  %v8754_v17 = vld [vmem:[%s12463_s12 + $0x290] sm:$0xff] }
  0x29   :  { %12941 = vst [vmem:[#allocation83_spill] sm:$0xff] %v8744_v49  ;;  %12942 = vst [vmem:[#allocation84_spill] sm:$0xff] %v8749_v16  ;;  %v8759_v50 = vld [vmem:[%s12463_s12 + $0x298] sm:$0xff]  ;;  %v8764_v48 = vld [vmem:[%s12463_s12 + $0x2a0] sm:$0xff] }
  0x2a   :  { %12943 = vst [vmem:[#allocation85_spill] sm:$0xff] %v8754_v17  ;;  %12944 = vst [vmem:[#allocation86_spill] sm:$0xff] %v8759_v50  ;;  %v8769_v49 = vld [vmem:[%s12463_s12 + $0x2a8] sm:$0xff]  ;;  %v8774_v16 = vld [vmem:[%s12463_s12 + $0x2b0] sm:$0xff] }
  0x2b   :  { %12945 = vst [vmem:[#allocation87_spill] sm:$0xff] %v8764_v48  ;;  %12946 = vst [vmem:[#allocation88_spill] sm:$0xff] %v8769_v49  ;;  %v8779_v17 = vld [vmem:[%s12463_s12 + $0x2b8] sm:$0xff]  ;;  %v8784_v50 = vld [vmem:[%s12463_s12 + $0x2c0] sm:$0xff] }
  0x2c   :  { %12947 = vst [vmem:[#allocation89_spill] sm:$0xff] %v8774_v16  ;;  %12948 = vst [vmem:[#allocation90_spill] sm:$0xff] %v8779_v17  ;;  %v8789_v48 = vld [vmem:[%s12463_s12 + $0x2c8] sm:$0xff]  ;;  %v8794_v49 = vld [vmem:[%s12463_s12 + $0x2d0] sm:$0xff] }
  0x2d   :  { %12949 = vst [vmem:[#allocation91_spill] sm:$0xff] %v8784_v50  ;;  %12950 = vst [vmem:[#allocation92_spill] sm:$0xff] %v8789_v48  ;;  %v8799_v16 = vld [vmem:[%s12463_s12 + $0x2d8] sm:$0xff]  ;;  %v8804_v17 = vld [vmem:[%s12463_s12 + $0x2e0] sm:$0xff] }
  0x2e   :  { %12951 = vst [vmem:[#allocation93_spill] sm:$0xff] %v8794_v49  ;;  %12952 = vst [vmem:[#allocation94_spill] sm:$0xff] %v8799_v16  ;;  %v8809_v50 = vld [vmem:[%s12463_s12 + $0x2e8] sm:$0xff]  ;;  %v8814_v48 = vld [vmem:[%s12463_s12 + $0x2f0] sm:$0xff] }
  0x2f   :  { %12953 = vst [vmem:[#allocation95_spill] sm:$0xff] %v8804_v17  ;;  %12954 = vst [vmem:[#allocation96_spill] sm:$0xff] %v8809_v50  ;;  %v8819_v49 = vld [vmem:[%s12463_s12 + $0x2f8] sm:$0xff]  ;;  %v8824_v16 = vld [vmem:[%s12463_s12 + $0x300] sm:$0xff] }
  0x30   :  { %12955 = vst [vmem:[#allocation97_spill] sm:$0xff] %v8814_v48  ;;  %12956 = vst [vmem:[#allocation98_spill] sm:$0xff] %v8819_v49  ;;  %v8829_v17 = vld [vmem:[%s12463_s12 + $0x308] sm:$0xff]  ;;  %v8834_v50 = vld [vmem:[%s12463_s12 + $0x310] sm:$0xff] }
  0x31   :  { %12957 = vst [vmem:[#allocation99_spill] sm:$0xff] %v8824_v16  ;;  %12958 = vst [vmem:[#allocation100_spill] sm:$0xff] %v8829_v17  ;;  %v8839_v48 = vld [vmem:[%s12463_s12 + $0x318] sm:$0xff]  ;;  %v8844_v49 = vld [vmem:[%s12463_s12 + $0x320] sm:$0xff] }
  0x32   :  { %12959 = vst [vmem:[#allocation101_spill] sm:$0xff] %v8834_v50  ;;  %12960 = vst [vmem:[#allocation102_spill] sm:$0xff] %v8839_v48  ;;  %v8849_v16 = vld [vmem:[%s12463_s12 + $0x328] sm:$0xff]  ;;  %v8854_v17 = vld [vmem:[%s12463_s12 + $0x330] sm:$0xff] }
  0x33   :  { %12961 = vst [vmem:[#allocation103_spill] sm:$0xff] %v8844_v49  ;;  %12962 = vst [vmem:[#allocation104_spill] sm:$0xff] %v8849_v16  ;;  %v8859_v50 = vld [vmem:[%s12463_s12 + $0x338] sm:$0xff]  ;;  %v8864_v48 = vld [vmem:[%s12463_s12 + $0x340] sm:$0xff] }
  0x34   :  { %12963 = vst [vmem:[#allocation105_spill] sm:$0xff] %v8854_v17  ;;  %12964 = vst [vmem:[#allocation106_spill] sm:$0xff] %v8859_v50  ;;  %v8869_v49 = vld [vmem:[%s12463_s12 + $0x348] sm:$0xff]  ;;  %v8874_v16 = vld [vmem:[%s12463_s12 + $0x350] sm:$0xff] }
  0x35   :  { %12965 = vst [vmem:[#allocation107_spill] sm:$0xff] %v8864_v48  ;;  %12966 = vst [vmem:[#allocation108_spill] sm:$0xff] %v8869_v49  ;;  %v8879_v17 = vld [vmem:[%s12463_s12 + $0x358] sm:$0xff]  ;;  %v8884_v50 = vld [vmem:[%s12463_s12 + $0x360] sm:$0xff] }
  0x36   :  { %12967 = vst [vmem:[#allocation109_spill] sm:$0xff] %v8874_v16  ;;  %12968 = vst [vmem:[#allocation110_spill] sm:$0xff] %v8879_v17  ;;  %v8889_v48 = vld [vmem:[%s12463_s12 + $0x368] sm:$0xff]  ;;  %v8894_v49 = vld [vmem:[%s12463_s12 + $0x370] sm:$0xff] }
  0x37   :  { %12969 = vst [vmem:[#allocation111_spill] sm:$0xff] %v8884_v50  ;;  %12970 = vst [vmem:[#allocation112_spill] sm:$0xff] %v8889_v48  ;;  %v8899_v16 = vld [vmem:[%s12463_s12 + $0x378] sm:$0xff]  ;;  %v8904_v17 = vld [vmem:[%s12463_s12 + $0x380] sm:$0xff] }
  0x38   :  { %12971 = vst [vmem:[#allocation113_spill] sm:$0xff] %v8894_v49  ;;  %12972 = vst [vmem:[#allocation114_spill] sm:$0xff] %v8899_v16  ;;  %v8909_v50 = vld [vmem:[%s12463_s12 + $0x388] sm:$0xff]  ;;  %v8914_v48 = vld [vmem:[%s12463_s12 + $0x390] sm:$0xff] }
  0x39   :  { %12973 = vst [vmem:[#allocation115_spill] sm:$0xff] %v8904_v17  ;;  %12974 = vst [vmem:[#allocation116_spill] sm:$0xff] %v8909_v50  ;;  %v8919_v49 = vld [vmem:[%s12463_s12 + $0x398] sm:$0xff]  ;;  %v8924_v16 = vld [vmem:[%s12463_s12 + $0x3a0] sm:$0xff] }
  0x3a   :  { %12975 = vst [vmem:[#allocation117_spill] sm:$0xff] %v8914_v48  ;;  %12976 = vst [vmem:[#allocation118_spill] sm:$0xff] %v8919_v49  ;;  %v8929_v17 = vld [vmem:[%s12463_s12 + $0x3a8] sm:$0xff]  ;;  %v8934_v50 = vld [vmem:[%s12463_s12 + $0x3b0] sm:$0xff] }
  0x3b   :  { %12977 = vst [vmem:[#allocation119_spill] sm:$0xff] %v8924_v16  ;;  %12978 = vst [vmem:[#allocation120_spill] sm:$0xff] %v8929_v17  ;;  %v8939_v48 = vld [vmem:[%s12463_s12 + $0x3b8] sm:$0xff]  ;;  %v8944_v49 = vld [vmem:[%s12463_s12 + $0x3c0] sm:$0xff] }
  0x3c   :  { %12979 = vst [vmem:[#allocation121_spill] sm:$0xff] %v8934_v50  ;;  %12980 = vst [vmem:[#allocation122_spill] sm:$0xff] %v8939_v48  ;;  %v8949_v16 = vld [vmem:[%s12463_s12 + $0x3c8] sm:$0xff]  ;;  %v8954_v17 = vld [vmem:[%s12463_s12 + $0x3d0] sm:$0xff] }
  0x3d   :  { %12981 = vst [vmem:[#allocation123_spill] sm:$0xff] %v8944_v49  ;;  %12982 = vst [vmem:[#allocation124_spill] sm:$0xff] %v8949_v16  ;;  %v8959_v50 = vld [vmem:[%s12463_s12 + $0x3d8] sm:$0xff]  ;;  %v8964_v48 = vld [vmem:[%s12463_s12 + $0x3e0] sm:$0xff] }
  0x3e   :  { %12983 = vst [vmem:[#allocation125_spill] sm:$0xff] %v8954_v17  ;;  %12984 = vst [vmem:[#allocation126_spill] sm:$0xff] %v8959_v50  ;;  %v8969_v49 = vld [vmem:[%s12463_s12 + $0x3e8] sm:$0xff]  ;;  %v8974_v16 = vld [vmem:[%s12463_s12 + $0x3f0] sm:$0xff] }
  0x3f   :  { %12985 = vst [vmem:[#allocation127_spill] sm:$0xff] %v8964_v48  ;;  %12986 = vst [vmem:[#allocation128_spill] sm:$0xff] %v8969_v49  ;;  %v8979_v17 = vld [vmem:[%s12463_s12 + $0x3f8] sm:$0xff]  ;;  %v8984_v50 = vld [vmem:[%s12463_s12 + $0x400] sm:$0xff] }
  0x40   :  { %12987 = vst [vmem:[#allocation129_spill] sm:$0xff] %v8974_v16  ;;  %12988 = vst [vmem:[#allocation130_spill] sm:$0xff] %v8979_v17  ;;  %v8989_v48 = vld [vmem:[%s12463_s12 + $0x408] sm:$0xff]  ;;  %v8994_v49 = vld [vmem:[%s12463_s12 + $0x410] sm:$0xff] }
  0x41   :  { %12989 = vst [vmem:[#allocation131_spill] sm:$0xff] %v8984_v50  ;;  %12990 = vst [vmem:[#allocation132_spill] sm:$0xff] %v8989_v48  ;;  %v8999_v16 = vld [vmem:[%s12463_s12 + $0x418] sm:$0xff]  ;;  %v9004_v17 = vld [vmem:[%s12463_s12 + $0x420] sm:$0xff] }
  0x42   :  { %12991 = vst [vmem:[#allocation133_spill] sm:$0xff] %v8994_v49  ;;  %12992 = vst [vmem:[#allocation134_spill] sm:$0xff] %v8999_v16  ;;  %v9009_v50 = vld [vmem:[%s12463_s12 + $0x428] sm:$0xff]  ;;  %v9014_v48 = vld [vmem:[%s12463_s12 + $0x430] sm:$0xff] }
  0x43   :  { %12993 = vst [vmem:[#allocation135_spill] sm:$0xff] %v9004_v17  ;;  %12994 = vst [vmem:[#allocation136_spill] sm:$0xff] %v9009_v50  ;;  %v9019_v49 = vld [vmem:[%s12463_s12 + $0x438] sm:$0xff]  ;;  %v9024_v16 = vld [vmem:[%s12463_s12 + $0x440] sm:$0xff] }
  0x44   :  { %12995 = vst [vmem:[#allocation137_spill] sm:$0xff] %v9014_v48  ;;  %12996 = vst [vmem:[#allocation138_spill] sm:$0xff] %v9019_v49  ;;  %v9029_v17 = vld [vmem:[%s12463_s12 + $0x448] sm:$0xff]  ;;  %v9034_v50 = vld [vmem:[%s12463_s12 + $0x450] sm:$0xff] }
  0x45   :  { %12997 = vst [vmem:[#allocation139_spill] sm:$0xff] %v9024_v16  ;;  %12998 = vst [vmem:[#allocation140_spill] sm:$0xff] %v9029_v17  ;;  %v9039_v48 = vld [vmem:[%s12463_s12 + $0x458] sm:$0xff]  ;;  %v9044_v49 = vld [vmem:[%s12463_s12 + $0x460] sm:$0xff] }
  0x46   :  { %12999 = vst [vmem:[#allocation141_spill] sm:$0xff] %v9034_v50  ;;  %13000 = vst [vmem:[#allocation142_spill] sm:$0xff] %v9039_v48  ;;  %v9049_v16 = vld [vmem:[%s12463_s12 + $0x468] sm:$0xff]  ;;  %v9054_v17 = vld [vmem:[%s12463_s12 + $0x470] sm:$0xff] }
  0x47   :  { %13001 = vst [vmem:[#allocation143_spill] sm:$0xff] %v9044_v49  ;;  %13002 = vst [vmem:[#allocation144_spill] sm:$0xff] %v9049_v16  ;;  %v9059_v50 = vld [vmem:[%s12463_s12 + $0x478] sm:$0xff] }
  0x48   :  { %13003 = vst [vmem:[#allocation145_spill] sm:$0xff] %v9054_v17  ;;  %13004 = vst [vmem:[#allocation146_spill] sm:$0xff] %v9059_v50 }
  0x49   :  { %372 = vsyncadd [#allocation4], 18432  ;;  %v9064_v48 = vld [vmem:[%s12464_s13] sm:$0xff]  ;;  %v9069_v49 = vld [vmem:[%s12464_s13 + $0x8] sm:$0xff] }
  0x4a   :  { %13005 = vst [vmem:[#allocation147_spill] sm:$0xff] %v9064_v48  ;;  %13006 = vst [vmem:[#allocation148_spill] sm:$0xff] %v9069_v49  ;;  %v9074_v16 = vld [vmem:[%s12464_s13 + $0x10] sm:$0xff]  ;;  %v9079_v17 = vld [vmem:[%s12464_s13 + $0x18] sm:$0xff] }
  0x4b   :  { %13007 = vst [vmem:[#allocation149_spill] sm:$0xff] %v9074_v16  ;;  %13008 = vst [vmem:[#allocation150_spill] sm:$0xff] %v9079_v17  ;;  %v9084_v50 = vld [vmem:[%s12464_s13 + $0x20] sm:$0xff]  ;;  %v9089_v48 = vld [vmem:[%s12464_s13 + $0x28] sm:$0xff] }
  0x4c   :  { %13009 = vst [vmem:[#allocation151_spill] sm:$0xff] %v9084_v50  ;;  %13010 = vst [vmem:[#allocation152_spill] sm:$0xff] %v9089_v48  ;;  %v9094_v49 = vld [vmem:[%s12464_s13 + $0x30] sm:$0xff]  ;;  %v9099_v16 = vld [vmem:[%s12464_s13 + $0x38] sm:$0xff] }
  0x4d   :  { %13011 = vst [vmem:[#allocation153_spill] sm:$0xff] %v9094_v49  ;;  %13012 = vst [vmem:[#allocation154_spill] sm:$0xff] %v9099_v16  ;;  %v9104_v17 = vld [vmem:[%s12464_s13 + $0x40] sm:$0xff]  ;;  %v9109_v50 = vld [vmem:[%s12464_s13 + $0x48] sm:$0xff] }
  0x4e   :  { %13013 = vst [vmem:[#allocation155_spill] sm:$0xff] %v9104_v17  ;;  %13014 = vst [vmem:[#allocation156_spill] sm:$0xff] %v9109_v50  ;;  %v9114_v48 = vld [vmem:[%s12464_s13 + $0x50] sm:$0xff]  ;;  %v9119_v49 = vld [vmem:[%s12464_s13 + $0x58] sm:$0xff] }
  0x4f   :  { %13015 = vst [vmem:[#allocation157_spill] sm:$0xff] %v9114_v48  ;;  %13016 = vst [vmem:[#allocation158_spill] sm:$0xff] %v9119_v49  ;;  %v9124_v16 = vld [vmem:[%s12464_s13 + $0x60] sm:$0xff]  ;;  %v9129_v17 = vld [vmem:[%s12464_s13 + $0x68] sm:$0xff] }
  0x50   :  { %13017 = vst [vmem:[#allocation159_spill] sm:$0xff] %v9124_v16  ;;  %13018 = vst [vmem:[#allocation160_spill] sm:$0xff] %v9129_v17  ;;  %v9134_v50 = vld [vmem:[%s12464_s13 + $0x70] sm:$0xff]  ;;  %v9139_v48 = vld [vmem:[%s12464_s13 + $0x78] sm:$0xff] }
  0x51   :  { %13019 = vst [vmem:[#allocation161_spill] sm:$0xff] %v9134_v50  ;;  %13020 = vst [vmem:[#allocation162_spill] sm:$0xff] %v9139_v48  ;;  %v9144_v49 = vld [vmem:[%s12464_s13 + $0x80] sm:$0xff]  ;;  %v9149_v16 = vld [vmem:[%s12464_s13 + $0x88] sm:$0xff] }
  0x52   :  { %13021 = vst [vmem:[#allocation163_spill] sm:$0xff] %v9144_v49  ;;  %13022 = vst [vmem:[#allocation164_spill] sm:$0xff] %v9149_v16  ;;  %v9154_v17 = vld [vmem:[%s12464_s13 + $0x90] sm:$0xff]  ;;  %v9159_v50 = vld [vmem:[%s12464_s13 + $0x98] sm:$0xff] }
  0x53   :  { %13023 = vst [vmem:[#allocation165_spill] sm:$0xff] %v9154_v17  ;;  %13024 = vst [vmem:[#allocation166_spill] sm:$0xff] %v9159_v50  ;;  %v9164_v48 = vld [vmem:[%s12464_s13 + $0xa0] sm:$0xff]  ;;  %v9169_v49 = vld [vmem:[%s12464_s13 + $0xa8] sm:$0xff] }
  0x54   :  { %13025 = vst [vmem:[#allocation167_spill] sm:$0xff] %v9164_v48  ;;  %13026 = vst [vmem:[#allocation168_spill] sm:$0xff] %v9169_v49  ;;  %v9174_v16 = vld [vmem:[%s12464_s13 + $0xb0] sm:$0xff]  ;;  %v9179_v17 = vld [vmem:[%s12464_s13 + $0xb8] sm:$0xff] }
  0x55   :  { %13027 = vst [vmem:[#allocation169_spill] sm:$0xff] %v9174_v16  ;;  %13028 = vst [vmem:[#allocation170_spill] sm:$0xff] %v9179_v17  ;;  %v9184_v50 = vld [vmem:[%s12464_s13 + $0xc0] sm:$0xff]  ;;  %v9189_v48 = vld [vmem:[%s12464_s13 + $0xc8] sm:$0xff] }
  0x56   :  { %13029 = vst [vmem:[#allocation171_spill] sm:$0xff] %v9184_v50  ;;  %13030 = vst [vmem:[#allocation172_spill] sm:$0xff] %v9189_v48  ;;  %v9194_v49 = vld [vmem:[%s12464_s13 + $0xd0] sm:$0xff]  ;;  %v9199_v16 = vld [vmem:[%s12464_s13 + $0xd8] sm:$0xff] }
  0x57   :  { %13031 = vst [vmem:[#allocation173_spill] sm:$0xff] %v9194_v49  ;;  %13032 = vst [vmem:[#allocation174_spill] sm:$0xff] %v9199_v16  ;;  %v9204_v17 = vld [vmem:[%s12464_s13 + $0xe0] sm:$0xff]  ;;  %v9209_v50 = vld [vmem:[%s12464_s13 + $0xe8] sm:$0xff] }
  0x58   :  { %13033 = vst [vmem:[#allocation175_spill] sm:$0xff] %v9204_v17  ;;  %13034 = vst [vmem:[#allocation176_spill] sm:$0xff] %v9209_v50  ;;  %v9214_v48 = vld [vmem:[%s12464_s13 + $0xf0] sm:$0xff]  ;;  %v9219_v49 = vld [vmem:[%s12464_s13 + $0xf8] sm:$0xff] }
  0x59   :  { %13035 = vst [vmem:[#allocation177_spill] sm:$0xff] %v9214_v48  ;;  %13036 = vst [vmem:[#allocation178_spill] sm:$0xff] %v9219_v49  ;;  %v9224_v16 = vld [vmem:[%s12464_s13 + $0x100] sm:$0xff]  ;;  %v9229_v17 = vld [vmem:[%s12464_s13 + $0x108] sm:$0xff] }
  0x5a   :  { %13037 = vst [vmem:[#allocation179_spill] sm:$0xff] %v9224_v16  ;;  %13038 = vst [vmem:[#allocation180_spill] sm:$0xff] %v9229_v17  ;;  %v9234_v50 = vld [vmem:[%s12464_s13 + $0x110] sm:$0xff]  ;;  %v9239_v48 = vld [vmem:[%s12464_s13 + $0x118] sm:$0xff] }
  0x5b   :  { %13039 = vst [vmem:[#allocation181_spill] sm:$0xff] %v9234_v50  ;;  %13040 = vst [vmem:[#allocation182_spill] sm:$0xff] %v9239_v48  ;;  %v9244_v49 = vld [vmem:[%s12464_s13 + $0x120] sm:$0xff]  ;;  %v9249_v16 = vld [vmem:[%s12464_s13 + $0x128] sm:$0xff] }
  0x5c   :  { %13041 = vst [vmem:[#allocation183_spill] sm:$0xff] %v9244_v49  ;;  %13042 = vst [vmem:[#allocation184_spill] sm:$0xff] %v9249_v16  ;;  %v9254_v17 = vld [vmem:[%s12464_s13 + $0x130] sm:$0xff]  ;;  %v9259_v50 = vld [vmem:[%s12464_s13 + $0x138] sm:$0xff] }
  0x5d   :  { %13043 = vst [vmem:[#allocation185_spill] sm:$0xff] %v9254_v17  ;;  %13044 = vst [vmem:[#allocation186_spill] sm:$0xff] %v9259_v50  ;;  %v9264_v48 = vld [vmem:[%s12464_s13 + $0x140] sm:$0xff]  ;;  %v9269_v49 = vld [vmem:[%s12464_s13 + $0x148] sm:$0xff] }
  0x5e   :  { %13045 = vst [vmem:[#allocation187_spill] sm:$0xff] %v9264_v48  ;;  %13046 = vst [vmem:[#allocation188_spill] sm:$0xff] %v9269_v49  ;;  %v9274_v16 = vld [vmem:[%s12464_s13 + $0x150] sm:$0xff]  ;;  %v9279_v17 = vld [vmem:[%s12464_s13 + $0x158] sm:$0xff] }
  0x5f   :  { %13047 = vst [vmem:[#allocation189_spill] sm:$0xff] %v9274_v16  ;;  %13048 = vst [vmem:[#allocation190_spill] sm:$0xff] %v9279_v17  ;;  %v9284_v50 = vld [vmem:[%s12464_s13 + $0x160] sm:$0xff]  ;;  %v9289_v48 = vld [vmem:[%s12464_s13 + $0x168] sm:$0xff] }
  0x60   :  { %13049 = vst [vmem:[#allocation191_spill] sm:$0xff] %v9284_v50  ;;  %13050 = vst [vmem:[#allocation192_spill] sm:$0xff] %v9289_v48  ;;  %v9294_v49 = vld [vmem:[%s12464_s13 + $0x170] sm:$0xff]  ;;  %v9299_v16 = vld [vmem:[%s12464_s13 + $0x178] sm:$0xff] }
  0x61   :  { %13051 = vst [vmem:[#allocation193_spill] sm:$0xff] %v9294_v49  ;;  %13052 = vst [vmem:[#allocation194_spill] sm:$0xff] %v9299_v16  ;;  %v9304_v17 = vld [vmem:[%s12464_s13 + $0x180] sm:$0xff]  ;;  %v9309_v50 = vld [vmem:[%s12464_s13 + $0x188] sm:$0xff] }
  0x62   :  { %13053 = vst [vmem:[#allocation195_spill] sm:$0xff] %v9304_v17  ;;  %13054 = vst [vmem:[#allocation196_spill] sm:$0xff] %v9309_v50  ;;  %v9314_v48 = vld [vmem:[%s12464_s13 + $0x190] sm:$0xff]  ;;  %v9319_v49 = vld [vmem:[%s12464_s13 + $0x198] sm:$0xff] }
  0x63   :  { %13055 = vst [vmem:[#allocation197_spill] sm:$0xff] %v9314_v48  ;;  %13056 = vst [vmem:[#allocation198_spill] sm:$0xff] %v9319_v49  ;;  %v9324_v16 = vld [vmem:[%s12464_s13 + $0x1a0] sm:$0xff]  ;;  %v9329_v17 = vld [vmem:[%s12464_s13 + $0x1a8] sm:$0xff] }
  0x64   :  { %13057 = vst [vmem:[#allocation199_spill] sm:$0xff] %v9324_v16  ;;  %13058 = vst [vmem:[#allocation200_spill] sm:$0xff] %v9329_v17  ;;  %v9334_v50 = vld [vmem:[%s12464_s13 + $0x1b0] sm:$0xff]  ;;  %v9339_v48 = vld [vmem:[%s12464_s13 + $0x1b8] sm:$0xff] }
  0x65   :  { %13059 = vst [vmem:[#allocation201_spill] sm:$0xff] %v9334_v50  ;;  %13060 = vst [vmem:[#allocation202_spill] sm:$0xff] %v9339_v48  ;;  %v9344_v49 = vld [vmem:[%s12464_s13 + $0x1c0] sm:$0xff]  ;;  %v9349_v16 = vld [vmem:[%s12464_s13 + $0x1c8] sm:$0xff] }
  0x66   :  { %13061 = vst [vmem:[#allocation203_spill] sm:$0xff] %v9344_v49  ;;  %13062 = vst [vmem:[#allocation204_spill] sm:$0xff] %v9349_v16  ;;  %v9354_v17 = vld [vmem:[%s12464_s13 + $0x1d0] sm:$0xff]  ;;  %v9359_v50 = vld [vmem:[%s12464_s13 + $0x1d8] sm:$0xff] }
  0x67   :  { %13063 = vst [vmem:[#allocation205_spill] sm:$0xff] %v9354_v17  ;;  %13064 = vst [vmem:[#allocation206_spill] sm:$0xff] %v9359_v50  ;;  %v9364_v48 = vld [vmem:[%s12464_s13 + $0x1e0] sm:$0xff]  ;;  %v9369_v49 = vld [vmem:[%s12464_s13 + $0x1e8] sm:$0xff] }
  0x68   :  { %13065 = vst [vmem:[#allocation207_spill] sm:$0xff] %v9364_v48  ;;  %13066 = vst [vmem:[#allocation208_spill] sm:$0xff] %v9369_v49  ;;  %v9374_v16 = vld [vmem:[%s12464_s13 + $0x1f0] sm:$0xff]  ;;  %v9379_v17 = vld [vmem:[%s12464_s13 + $0x1f8] sm:$0xff] }
  0x69   :  { %13067 = vst [vmem:[#allocation209_spill] sm:$0xff] %v9374_v16  ;;  %13068 = vst [vmem:[#allocation210_spill] sm:$0xff] %v9379_v17  ;;  %v9384_v50 = vld [vmem:[%s12464_s13 + $0x200] sm:$0xff]  ;;  %v9389_v48 = vld [vmem:[%s12464_s13 + $0x208] sm:$0xff] }
  0x6a   :  { %13069 = vst [vmem:[#allocation211_spill] sm:$0xff] %v9384_v50  ;;  %13070 = vst [vmem:[#allocation212_spill] sm:$0xff] %v9389_v48  ;;  %v9394_v49 = vld [vmem:[%s12464_s13 + $0x210] sm:$0xff]  ;;  %v9399_v16 = vld [vmem:[%s12464_s13 + $0x218] sm:$0xff] }
  0x6b   :  { %13071 = vst [vmem:[#allocation213_spill] sm:$0xff] %v9394_v49  ;;  %13072 = vst [vmem:[#allocation214_spill] sm:$0xff] %v9399_v16  ;;  %v9404_v17 = vld [vmem:[%s12464_s13 + $0x220] sm:$0xff]  ;;  %v9409_v50 = vld [vmem:[%s12464_s13 + $0x228] sm:$0xff] }
  0x6c   :  { %13073 = vst [vmem:[#allocation215_spill] sm:$0xff] %v9404_v17  ;;  %13074 = vst [vmem:[#allocation216_spill] sm:$0xff] %v9409_v50  ;;  %v9414_v48 = vld [vmem:[%s12464_s13 + $0x230] sm:$0xff]  ;;  %v9419_v49 = vld [vmem:[%s12464_s13 + $0x238] sm:$0xff] }
  0x6d   :  { %13075 = vst [vmem:[#allocation217_spill] sm:$0xff] %v9414_v48  ;;  %13076 = vst [vmem:[#allocation218_spill] sm:$0xff] %v9419_v49  ;;  %v9424_v16 = vld [vmem:[%s12464_s13 + $0x240] sm:$0xff]  ;;  %v9429_v17 = vld [vmem:[%s12464_s13 + $0x248] sm:$0xff] }
  0x6e   :  { %13077 = vst [vmem:[#allocation219_spill] sm:$0xff] %v9424_v16  ;;  %13078 = vst [vmem:[#allocation220_spill] sm:$0xff] %v9429_v17  ;;  %v9434_v50 = vld [vmem:[%s12464_s13 + $0x250] sm:$0xff]  ;;  %v9439_v48 = vld [vmem:[%s12464_s13 + $0x258] sm:$0xff] }
  0x6f   :  { %13079 = vst [vmem:[#allocation221_spill] sm:$0xff] %v9434_v50  ;;  %13080 = vst [vmem:[#allocation222_spill] sm:$0xff] %v9439_v48  ;;  %v9444_v49 = vld [vmem:[%s12464_s13 + $0x260] sm:$0xff]  ;;  %v9449_v16 = vld [vmem:[%s12464_s13 + $0x268] sm:$0xff] }
  0x70   :  { %13081 = vst [vmem:[#allocation223_spill] sm:$0xff] %v9444_v49  ;;  %13082 = vst [vmem:[#allocation224_spill] sm:$0xff] %v9449_v16  ;;  %v9454_v17 = vld [vmem:[%s12464_s13 + $0x270] sm:$0xff]  ;;  %v9459_v50 = vld [vmem:[%s12464_s13 + $0x278] sm:$0xff] }
  0x71   :  { %13083 = vst [vmem:[#allocation225_spill] sm:$0xff] %v9454_v17  ;;  %13084 = vst [vmem:[#allocation226_spill] sm:$0xff] %v9459_v50  ;;  %v9464_v48 = vld [vmem:[%s12464_s13 + $0x280] sm:$0xff]  ;;  %v9469_v49 = vld [vmem:[%s12464_s13 + $0x288] sm:$0xff] }
  0x72   :  { %13085 = vst [vmem:[#allocation227_spill] sm:$0xff] %v9464_v48  ;;  %13086 = vst [vmem:[#allocation228_spill] sm:$0xff] %v9469_v49  ;;  %v9474_v16 = vld [vmem:[%s12464_s13 + $0x290] sm:$0xff]  ;;  %v9479_v17 = vld [vmem:[%s12464_s13 + $0x298] sm:$0xff] }
  0x73   :  { %13087 = vst [vmem:[#allocation229_spill] sm:$0xff] %v9474_v16  ;;  %13088 = vst [vmem:[#allocation230_spill] sm:$0xff] %v9479_v17  ;;  %v9484_v50 = vld [vmem:[%s12464_s13 + $0x2a0] sm:$0xff]  ;;  %v9489_v48 = vld [vmem:[%s12464_s13 + $0x2a8] sm:$0xff] }
  0x74   :  { %13089 = vst [vmem:[#allocation231_spill] sm:$0xff] %v9484_v50  ;;  %13090 = vst [vmem:[#allocation232_spill] sm:$0xff] %v9489_v48  ;;  %v9494_v49 = vld [vmem:[%s12464_s13 + $0x2b0] sm:$0xff]  ;;  %v9499_v16 = vld [vmem:[%s12464_s13 + $0x2b8] sm:$0xff] }
  0x75   :  { %13091 = vst [vmem:[#allocation233_spill] sm:$0xff] %v9494_v49  ;;  %13092 = vst [vmem:[#allocation234_spill] sm:$0xff] %v9499_v16  ;;  %v9504_v17 = vld [vmem:[%s12464_s13 + $0x2c0] sm:$0xff]  ;;  %v9509_v50 = vld [vmem:[%s12464_s13 + $0x2c8] sm:$0xff] }
  0x76   :  { %13093 = vst [vmem:[#allocation235_spill] sm:$0xff] %v9504_v17  ;;  %13094 = vst [vmem:[#allocation236_spill] sm:$0xff] %v9509_v50  ;;  %v9514_v48 = vld [vmem:[%s12464_s13 + $0x2d0] sm:$0xff]  ;;  %v9519_v49 = vld [vmem:[%s12464_s13 + $0x2d8] sm:$0xff] }
  0x77   :  { %13095 = vst [vmem:[#allocation237_spill] sm:$0xff] %v9514_v48  ;;  %13096 = vst [vmem:[#allocation238_spill] sm:$0xff] %v9519_v49  ;;  %v9524_v16 = vld [vmem:[%s12464_s13 + $0x2e0] sm:$0xff]  ;;  %v9529_v17 = vld [vmem:[%s12464_s13 + $0x2e8] sm:$0xff] }
  0x78   :  { %13097 = vst [vmem:[#allocation239_spill] sm:$0xff] %v9524_v16  ;;  %13098 = vst [vmem:[#allocation240_spill] sm:$0xff] %v9529_v17  ;;  %v9534_v50 = vld [vmem:[%s12464_s13 + $0x2f0] sm:$0xff]  ;;  %v9539_v48 = vld [vmem:[%s12464_s13 + $0x2f8] sm:$0xff] }
  0x79   :  { %13099 = vst [vmem:[#allocation241_spill] sm:$0xff] %v9534_v50  ;;  %13100 = vst [vmem:[#allocation242_spill] sm:$0xff] %v9539_v48  ;;  %v9544_v49 = vld [vmem:[%s12464_s13 + $0x300] sm:$0xff]  ;;  %v9549_v16 = vld [vmem:[%s12464_s13 + $0x308] sm:$0xff] }
  0x7a   :  { %13101 = vst [vmem:[#allocation243_spill] sm:$0xff] %v9544_v49  ;;  %13102 = vst [vmem:[#allocation244_spill] sm:$0xff] %v9549_v16  ;;  %v9554_v17 = vld [vmem:[%s12464_s13 + $0x310] sm:$0xff]  ;;  %v9559_v50 = vld [vmem:[%s12464_s13 + $0x318] sm:$0xff] }
  0x7b   :  { %13103 = vst [vmem:[#allocation245_spill] sm:$0xff] %v9554_v17  ;;  %13104 = vst [vmem:[#allocation246_spill] sm:$0xff] %v9559_v50  ;;  %v9564_v48 = vld [vmem:[%s12464_s13 + $0x320] sm:$0xff]  ;;  %v9569_v49 = vld [vmem:[%s12464_s13 + $0x328] sm:$0xff] }
  0x7c   :  { %13105 = vst [vmem:[#allocation247_spill] sm:$0xff] %v9564_v48  ;;  %13106 = vst [vmem:[#allocation248_spill] sm:$0xff] %v9569_v49  ;;  %v9574_v16 = vld [vmem:[%s12464_s13 + $0x330] sm:$0xff]  ;;  %v9579_v17 = vld [vmem:[%s12464_s13 + $0x338] sm:$0xff] }
  0x7d   :  { %13107 = vst [vmem:[#allocation249_spill] sm:$0xff] %v9574_v16  ;;  %13108 = vst [vmem:[#allocation250_spill] sm:$0xff] %v9579_v17  ;;  %v9584_v50 = vld [vmem:[%s12464_s13 + $0x340] sm:$0xff]  ;;  %v9589_v48 = vld [vmem:[%s12464_s13 + $0x348] sm:$0xff] }
  0x7e   :  { %13109 = vst [vmem:[#allocation251_spill] sm:$0xff] %v9584_v50  ;;  %13110 = vst [vmem:[#allocation252_spill] sm:$0xff] %v9589_v48  ;;  %v9594_v49 = vld [vmem:[%s12464_s13 + $0x350] sm:$0xff]  ;;  %v9599_v16 = vld [vmem:[%s12464_s13 + $0x358] sm:$0xff] }
  0x7f   :  { %13111 = vst [vmem:[#allocation253_spill] sm:$0xff] %v9594_v49  ;;  %13112 = vst [vmem:[#allocation254_spill] sm:$0xff] %v9599_v16  ;;  %v9604_v17 = vld [vmem:[%s12464_s13 + $0x360] sm:$0xff]  ;;  %v9609_v50 = vld [vmem:[%s12464_s13 + $0x368] sm:$0xff] }
  0x80   :  { %13113 = vst [vmem:[#allocation255_spill] sm:$0xff] %v9604_v17  ;;  %13114 = vst [vmem:[#allocation256_spill] sm:$0xff] %v9609_v50  ;;  %v9614_v48 = vld [vmem:[%s12464_s13 + $0x370] sm:$0xff]  ;;  %v9619_v49 = vld [vmem:[%s12464_s13 + $0x378] sm:$0xff] }
  0x81   :  { %13115 = vst [vmem:[#allocation257_spill] sm:$0xff] %v9614_v48  ;;  %13116 = vst [vmem:[#allocation258_spill] sm:$0xff] %v9619_v49  ;;  %v9624_v16 = vld [vmem:[%s12464_s13 + $0x380] sm:$0xff]  ;;  %v9629_v17 = vld [vmem:[%s12464_s13 + $0x388] sm:$0xff] }
  0x82   :  { %13117 = vst [vmem:[#allocation259_spill] sm:$0xff] %v9624_v16  ;;  %13118 = vst [vmem:[#allocation260_spill] sm:$0xff] %v9629_v17  ;;  %v9634_v50 = vld [vmem:[%s12464_s13 + $0x390] sm:$0xff]  ;;  %v9639_v48 = vld [vmem:[%s12464_s13 + $0x398] sm:$0xff] }
  0x83   :  { %13119 = vst [vmem:[#allocation261_spill] sm:$0xff] %v9634_v50  ;;  %13120 = vst [vmem:[#allocation262_spill] sm:$0xff] %v9639_v48  ;;  %v9644_v49 = vld [vmem:[%s12464_s13 + $0x3a0] sm:$0xff]  ;;  %v9649_v16 = vld [vmem:[%s12464_s13 + $0x3a8] sm:$0xff] }
  0x84   :  { %13121 = vst [vmem:[#allocation263_spill] sm:$0xff] %v9644_v49  ;;  %13122 = vst [vmem:[#allocation264_spill] sm:$0xff] %v9649_v16  ;;  %v9654_v17 = vld [vmem:[%s12464_s13 + $0x3b0] sm:$0xff]  ;;  %v9659_v50 = vld [vmem:[%s12464_s13 + $0x3b8] sm:$0xff] }
  0x85   :  { %13123 = vst [vmem:[#allocation265_spill] sm:$0xff] %v9654_v17  ;;  %13124 = vst [vmem:[#allocation266_spill] sm:$0xff] %v9659_v50  ;;  %v9664_v48 = vld [vmem:[%s12464_s13 + $0x3c0] sm:$0xff]  ;;  %v9669_v49 = vld [vmem:[%s12464_s13 + $0x3c8] sm:$0xff] }
  0x86   :  { %13125 = vst [vmem:[#allocation267_spill] sm:$0xff] %v9664_v48  ;;  %13126 = vst [vmem:[#allocation268_spill] sm:$0xff] %v9669_v49  ;;  %v9674_v16 = vld [vmem:[%s12464_s13 + $0x3d0] sm:$0xff]  ;;  %v9679_v17 = vld [vmem:[%s12464_s13 + $0x3d8] sm:$0xff] }
  0x87   :  { %13127 = vst [vmem:[#allocation269_spill] sm:$0xff] %v9674_v16  ;;  %13128 = vst [vmem:[#allocation270_spill] sm:$0xff] %v9679_v17  ;;  %v9684_v50 = vld [vmem:[%s12464_s13 + $0x3e0] sm:$0xff]  ;;  %v9689_v48 = vld [vmem:[%s12464_s13 + $0x3e8] sm:$0xff] }
  0x88   :  { %13129 = vst [vmem:[#allocation271_spill] sm:$0xff] %v9684_v50  ;;  %13130 = vst [vmem:[#allocation272_spill] sm:$0xff] %v9689_v48  ;;  %v9694_v49 = vld [vmem:[%s12464_s13 + $0x3f0] sm:$0xff]  ;;  %v9699_v16 = vld [vmem:[%s12464_s13 + $0x3f8] sm:$0xff] }
  0x89   :  { %13131 = vst [vmem:[#allocation273_spill] sm:$0xff] %v9694_v49  ;;  %13132 = vst [vmem:[#allocation274_spill] sm:$0xff] %v9699_v16  ;;  %v9704_v17 = vld [vmem:[%s12464_s13 + $0x400] sm:$0xff]  ;;  %v9709_v50 = vld [vmem:[%s12464_s13 + $0x408] sm:$0xff] }
  0x8a   :  { %13133 = vst [vmem:[#allocation275_spill] sm:$0xff] %v9704_v17  ;;  %13134 = vst [vmem:[#allocation276_spill] sm:$0xff] %v9709_v50  ;;  %v9714_v48 = vld [vmem:[%s12464_s13 + $0x410] sm:$0xff]  ;;  %v9719_v49 = vld [vmem:[%s12464_s13 + $0x418] sm:$0xff] }
  0x8b   :  { %13135 = vst [vmem:[#allocation277_spill] sm:$0xff] %v9714_v48  ;;  %13136 = vst [vmem:[#allocation278_spill] sm:$0xff] %v9719_v49  ;;  %v9724_v16 = vld [vmem:[%s12464_s13 + $0x420] sm:$0xff]  ;;  %v9729_v17 = vld [vmem:[%s12464_s13 + $0x428] sm:$0xff] }
  0x8c   :  { %13137 = vst [vmem:[#allocation279_spill] sm:$0xff] %v9724_v16  ;;  %13138 = vst [vmem:[#allocation280_spill] sm:$0xff] %v9729_v17  ;;  %v9734_v50 = vld [vmem:[%s12464_s13 + $0x430] sm:$0xff]  ;;  %v9739_v48 = vld [vmem:[%s12464_s13 + $0x438] sm:$0xff] }
  0x8d   :  { %13139 = vst [vmem:[#allocation281_spill] sm:$0xff] %v9734_v50  ;;  %13140 = vst [vmem:[#allocation282_spill] sm:$0xff] %v9739_v48  ;;  %v9744_v49 = vld [vmem:[%s12464_s13 + $0x440] sm:$0xff]  ;;  %v9749_v16 = vld [vmem:[%s12464_s13 + $0x448] sm:$0xff] }
  0x8e   :  { %13141 = vst [vmem:[#allocation283_spill] sm:$0xff] %v9744_v49  ;;  %13142 = vst [vmem:[#allocation284_spill] sm:$0xff] %v9749_v16  ;;  %v9754_v17 = vld [vmem:[%s12464_s13 + $0x450] sm:$0xff]  ;;  %v9759_v50 = vld [vmem:[%s12464_s13 + $0x458] sm:$0xff] }
  0x8f   :  { %13143 = vst [vmem:[#allocation285_spill] sm:$0xff] %v9754_v17  ;;  %13144 = vst [vmem:[#allocation286_spill] sm:$0xff] %v9759_v50  ;;  %v9764_v48 = vld [vmem:[%s12464_s13 + $0x460] sm:$0xff]  ;;  %v9769_v49 = vld [vmem:[%s12464_s13 + $0x468] sm:$0xff] }
  0x90   :  { %13145 = vst [vmem:[#allocation287_spill] sm:$0xff] %v9764_v48  ;;  %13146 = vst [vmem:[#allocation288_spill] sm:$0xff] %v9769_v49  ;;  %v9774_v16 = vld [vmem:[%s12464_s13 + $0x470] sm:$0xff]  ;;  %v9779_v17 = vld [vmem:[%s12464_s13 + $0x478] sm:$0xff] }
  0x91   :  { %13147 = vst [vmem:[#allocation289_spill] sm:$0xff] %v9774_v16  ;;  %13148 = vst [vmem:[#allocation290_spill] sm:$0xff] %v9779_v17  ;;  %v9784_v50 = vld [vmem:[%s12464_s13 + $0x480] sm:$0xff]  ;;  %v9789_v48 = vld [vmem:[%s12464_s13 + $0x488] sm:$0xff] }
  0x92   :  { %13149 = vst [vmem:[#allocation291_spill] sm:$0xff] %v9784_v50  ;;  %13150 = vst [vmem:[#allocation292_spill] sm:$0xff] %v9789_v48  ;;  %v9794_v49 = vld [vmem:[%s12464_s13 + $0x490] sm:$0xff]  ;;  %v9799_v16 = vld [vmem:[%s12464_s13 + $0x498] sm:$0xff] }
  0x93   :  { %13151 = vst [vmem:[#allocation293_spill] sm:$0xff] %v9794_v49  ;;  %13152 = vst [vmem:[#allocation294_spill] sm:$0xff] %v9799_v16  ;;  %v9804_v17 = vld [vmem:[%s12464_s13 + $0x4a0] sm:$0xff]  ;;  %v9809_v50 = vld [vmem:[%s12464_s13 + $0x4a8] sm:$0xff] }
  0x94   :  { %13153 = vst [vmem:[#allocation295_spill] sm:$0xff] %v9804_v17  ;;  %13154 = vst [vmem:[#allocation296_spill] sm:$0xff] %v9809_v50  ;;  %v9814_v48 = vld [vmem:[%s12464_s13 + $0x4b0] sm:$0xff]  ;;  %v9819_v49 = vld [vmem:[%s12464_s13 + $0x4b8] sm:$0xff] }
  0x95   :  { %13155 = vst [vmem:[#allocation297_spill] sm:$0xff] %v9814_v48  ;;  %13156 = vst [vmem:[#allocation298_spill] sm:$0xff] %v9819_v49  ;;  %v9824_v16 = vld [vmem:[%s12464_s13 + $0x4c0] sm:$0xff]  ;;  %v9829_v17 = vld [vmem:[%s12464_s13 + $0x4c8] sm:$0xff] }
  0x96   :  { %13157 = vst [vmem:[#allocation299_spill] sm:$0xff] %v9824_v16  ;;  %13158 = vst [vmem:[#allocation300_spill] sm:$0xff] %v9829_v17  ;;  %v9834_v50 = vld [vmem:[%s12464_s13 + $0x4d0] sm:$0xff]  ;;  %v9839_v48 = vld [vmem:[%s12464_s13 + $0x4d8] sm:$0xff] }
  0x97   :  { %13159 = vst [vmem:[#allocation301_spill] sm:$0xff] %v9834_v50  ;;  %13160 = vst [vmem:[#allocation302_spill] sm:$0xff] %v9839_v48  ;;  %v9844_v49 = vld [vmem:[%s12464_s13 + $0x4e0] sm:$0xff]  ;;  %v9849_v16 = vld [vmem:[%s12464_s13 + $0x4e8] sm:$0xff] }
  0x98   :  { %13161 = vst [vmem:[#allocation303_spill] sm:$0xff] %v9844_v49  ;;  %13162 = vst [vmem:[#allocation304_spill] sm:$0xff] %v9849_v16  ;;  %v9854_v17 = vld [vmem:[%s12464_s13 + $0x4f0] sm:$0xff]  ;;  %v9859_v50 = vld [vmem:[%s12464_s13 + $0x4f8] sm:$0xff] }
  0x99   :  { %13163 = vst [vmem:[#allocation305_spill] sm:$0xff] %v9854_v17  ;;  %13164 = vst [vmem:[#allocation306_spill] sm:$0xff] %v9859_v50  ;;  %v9864_v48 = vld [vmem:[%s12464_s13 + $0x500] sm:$0xff]  ;;  %v9869_v49 = vld [vmem:[%s12464_s13 + $0x508] sm:$0xff] }
  0x9a   :  { %13165 = vst [vmem:[#allocation307_spill] sm:$0xff] %v9864_v48  ;;  %13166 = vst [vmem:[#allocation308_spill] sm:$0xff] %v9869_v49  ;;  %v9874_v16 = vld [vmem:[%s12464_s13 + $0x510] sm:$0xff]  ;;  %v9879_v17 = vld [vmem:[%s12464_s13 + $0x518] sm:$0xff] }
  0x9b   :  { %13167 = vst [vmem:[#allocation309_spill] sm:$0xff] %v9874_v16  ;;  %13168 = vst [vmem:[#allocation310_spill] sm:$0xff] %v9879_v17  ;;  %v9884_v50 = vld [vmem:[%s12464_s13 + $0x520] sm:$0xff]  ;;  %v9889_v48 = vld [vmem:[%s12464_s13 + $0x528] sm:$0xff] }
  0x9c   :  { %13169 = vst [vmem:[#allocation311_spill] sm:$0xff] %v9884_v50  ;;  %13170 = vst [vmem:[#allocation312_spill] sm:$0xff] %v9889_v48  ;;  %v9894_v49 = vld [vmem:[%s12464_s13 + $0x530] sm:$0xff]  ;;  %v9899_v16 = vld [vmem:[%s12464_s13 + $0x538] sm:$0xff] }
  0x9d   :  { %13171 = vst [vmem:[#allocation313_spill] sm:$0xff] %v9894_v49  ;;  %13172 = vst [vmem:[#allocation314_spill] sm:$0xff] %v9899_v16  ;;  %v9904_v17 = vld [vmem:[%s12464_s13 + $0x540] sm:$0xff]  ;;  %v9909_v50 = vld [vmem:[%s12464_s13 + $0x548] sm:$0xff] }
  0x9e   :  { %13173 = vst [vmem:[#allocation315_spill] sm:$0xff] %v9904_v17  ;;  %13174 = vst [vmem:[#allocation316_spill] sm:$0xff] %v9909_v50  ;;  %v9914_v48 = vld [vmem:[%s12464_s13 + $0x550] sm:$0xff]  ;;  %v9919_v49 = vld [vmem:[%s12464_s13 + $0x558] sm:$0xff] }
  0x9f   :  { %13175 = vst [vmem:[#allocation317_spill] sm:$0xff] %v9914_v48  ;;  %13176 = vst [vmem:[#allocation318_spill] sm:$0xff] %v9919_v49  ;;  %v9924_v16 = vld [vmem:[%s12464_s13 + $0x560] sm:$0xff]  ;;  %v9929_v17 = vld [vmem:[%s12464_s13 + $0x568] sm:$0xff] }
  0xa0   :  { %13177 = vst [vmem:[#allocation319_spill] sm:$0xff] %v9924_v16  ;;  %13178 = vst [vmem:[#allocation320_spill] sm:$0xff] %v9929_v17  ;;  %v9934_v50 = vld [vmem:[%s12464_s13 + $0x570] sm:$0xff]  ;;  %v9939_v48 = vld [vmem:[%s12464_s13 + $0x578] sm:$0xff] }
  0xa1   :  { %13179 = vst [vmem:[#allocation321_spill] sm:$0xff] %v9934_v50  ;;  %13180 = vst [vmem:[#allocation322_spill] sm:$0xff] %v9939_v48  ;;  %v9944_v49 = vld [vmem:[%s12464_s13 + $0x580] sm:$0xff]  ;;  %v9949_v16 = vld [vmem:[%s12464_s13 + $0x588] sm:$0xff] }
  0xa2   :  { %13181 = vst [vmem:[#allocation323_spill] sm:$0xff] %v9944_v49  ;;  %13182 = vst [vmem:[#allocation324_spill] sm:$0xff] %v9949_v16  ;;  %v9954_v17 = vld [vmem:[%s12464_s13 + $0x590] sm:$0xff]  ;;  %v9959_v50 = vld [vmem:[%s12464_s13 + $0x598] sm:$0xff] }
  0xa3   :  { %13183 = vst [vmem:[#allocation325_spill] sm:$0xff] %v9954_v17  ;;  %13184 = vst [vmem:[#allocation326_spill] sm:$0xff] %v9959_v50  ;;  %v9964_v48 = vld [vmem:[%s12464_s13 + $0x5a0] sm:$0xff]  ;;  %v9969_v49 = vld [vmem:[%s12464_s13 + $0x5a8] sm:$0xff] }
  0xa4   :  { %13185 = vst [vmem:[#allocation327_spill] sm:$0xff] %v9964_v48  ;;  %13186 = vst [vmem:[#allocation328_spill] sm:$0xff] %v9969_v49  ;;  %v9974_v16 = vld [vmem:[%s12464_s13 + $0x5b0] sm:$0xff]  ;;  %v9979_v17 = vld [vmem:[%s12464_s13 + $0x5b8] sm:$0xff] }
  0xa5   :  { %13187 = vst [vmem:[#allocation329_spill] sm:$0xff] %v9974_v16  ;;  %13188 = vst [vmem:[#allocation330_spill] sm:$0xff] %v9979_v17  ;;  %v9984_v50 = vld [vmem:[%s12464_s13 + $0x5c0] sm:$0xff]  ;;  %v9989_v48 = vld [vmem:[%s12464_s13 + $0x5c8] sm:$0xff] }
  0xa6   :  { %13189 = vst [vmem:[#allocation331_spill] sm:$0xff] %v9984_v50  ;;  %13190 = vst [vmem:[#allocation332_spill] sm:$0xff] %v9989_v48  ;;  %v9994_v49 = vld [vmem:[%s12464_s13 + $0x5d0] sm:$0xff]  ;;  %v9999_v16 = vld [vmem:[%s12464_s13 + $0x5d8] sm:$0xff] }
  0xa7   :  { %13191 = vst [vmem:[#allocation333_spill] sm:$0xff] %v9994_v49  ;;  %13192 = vst [vmem:[#allocation334_spill] sm:$0xff] %v9999_v16  ;;  %v10004_v17 = vld [vmem:[%s12464_s13 + $0x5e0] sm:$0xff]  ;;  %v10009_v50 = vld [vmem:[%s12464_s13 + $0x5e8] sm:$0xff] }
  0xa8   :  { %13193 = vst [vmem:[#allocation335_spill] sm:$0xff] %v10004_v17  ;;  %13194 = vst [vmem:[#allocation336_spill] sm:$0xff] %v10009_v50  ;;  %v10014_v48 = vld [vmem:[%s12464_s13 + $0x5f0] sm:$0xff]  ;;  %v10019_v49 = vld [vmem:[%s12464_s13 + $0x5f8] sm:$0xff] }
  0xa9   :  { %13195 = vst [vmem:[#allocation337_spill] sm:$0xff] %v10014_v48  ;;  %13196 = vst [vmem:[#allocation338_spill] sm:$0xff] %v10019_v49  ;;  %v10024_v16 = vld [vmem:[%s12464_s13 + $0x600] sm:$0xff]  ;;  %v10029_v17 = vld [vmem:[%s12464_s13 + $0x608] sm:$0xff] }
  0xaa   :  { %13197 = vst [vmem:[#allocation339_spill] sm:$0xff] %v10024_v16  ;;  %13198 = vst [vmem:[#allocation340_spill] sm:$0xff] %v10029_v17  ;;  %v10034_v50 = vld [vmem:[%s12464_s13 + $0x610] sm:$0xff]  ;;  %v10039_v48 = vld [vmem:[%s12464_s13 + $0x618] sm:$0xff] }
  0xab   :  { %13199 = vst [vmem:[#allocation341_spill] sm:$0xff] %v10034_v50  ;;  %13200 = vst [vmem:[#allocation342_spill] sm:$0xff] %v10039_v48  ;;  %v10044_v49 = vld [vmem:[%s12464_s13 + $0x620] sm:$0xff]  ;;  %v10049_v16 = vld [vmem:[%s12464_s13 + $0x628] sm:$0xff] }
  0xac   :  { %13201 = vst [vmem:[#allocation343_spill] sm:$0xff] %v10044_v49  ;;  %13202 = vst [vmem:[#allocation344_spill] sm:$0xff] %v10049_v16  ;;  %v10054_v17 = vld [vmem:[%s12464_s13 + $0x630] sm:$0xff]  ;;  %v10059_v50 = vld [vmem:[%s12464_s13 + $0x638] sm:$0xff] }
  0xad   :  { %13203 = vst [vmem:[#allocation345_spill] sm:$0xff] %v10054_v17  ;;  %13204 = vst [vmem:[#allocation346_spill] sm:$0xff] %v10059_v50  ;;  %v10064_v48 = vld [vmem:[%s12464_s13 + $0x640] sm:$0xff]  ;;  %v10069_v49 = vld [vmem:[%s12464_s13 + $0x648] sm:$0xff] }
  0xae   :  { %13205 = vst [vmem:[#allocation347_spill] sm:$0xff] %v10064_v48  ;;  %13206 = vst [vmem:[#allocation348_spill] sm:$0xff] %v10069_v49  ;;  %v10074_v16 = vld [vmem:[%s12464_s13 + $0x650] sm:$0xff]  ;;  %v10079_v17 = vld [vmem:[%s12464_s13 + $0x658] sm:$0xff] }
  0xaf   :  { %13207 = vst [vmem:[#allocation349_spill] sm:$0xff] %v10074_v16  ;;  %13208 = vst [vmem:[#allocation350_spill] sm:$0xff] %v10079_v17  ;;  %v10084_v50 = vld [vmem:[%s12464_s13 + $0x660] sm:$0xff]  ;;  %v10089_v48 = vld [vmem:[%s12464_s13 + $0x668] sm:$0xff] }
  0xb0   :  { %13209 = vst [vmem:[#allocation351_spill] sm:$0xff] %v10084_v50  ;;  %13210 = vst [vmem:[#allocation352_spill] sm:$0xff] %v10089_v48  ;;  %v10094_v49 = vld [vmem:[%s12464_s13 + $0x670] sm:$0xff]  ;;  %v10099_v16 = vld [vmem:[%s12464_s13 + $0x678] sm:$0xff] }
  0xb1   :  { %13211 = vst [vmem:[#allocation353_spill] sm:$0xff] %v10094_v49  ;;  %13212 = vst [vmem:[#allocation354_spill] sm:$0xff] %v10099_v16  ;;  %v10104_v17 = vld [vmem:[%s12464_s13 + $0x680] sm:$0xff]  ;;  %v10109_v50 = vld [vmem:[%s12464_s13 + $0x688] sm:$0xff] }
  0xb2   :  { %13213 = vst [vmem:[#allocation355_spill] sm:$0xff] %v10104_v17  ;;  %13214 = vst [vmem:[#allocation356_spill] sm:$0xff] %v10109_v50  ;;  %v10114_v48 = vld [vmem:[%s12464_s13 + $0x690] sm:$0xff]  ;;  %v10119_v49 = vld [vmem:[%s12464_s13 + $0x698] sm:$0xff] }
  0xb3   :  { %13215 = vst [vmem:[#allocation357_spill] sm:$0xff] %v10114_v48  ;;  %13216 = vst [vmem:[#allocation358_spill] sm:$0xff] %v10119_v49  ;;  %v10124_v16 = vld [vmem:[%s12464_s13 + $0x6a0] sm:$0xff]  ;;  %v10129_v17 = vld [vmem:[%s12464_s13 + $0x6a8] sm:$0xff] }
  0xb4   :  { %13217 = vst [vmem:[#allocation359_spill] sm:$0xff] %v10124_v16  ;;  %13218 = vst [vmem:[#allocation360_spill] sm:$0xff] %v10129_v17  ;;  %v10134_v50 = vld [vmem:[%s12464_s13 + $0x6b0] sm:$0xff]  ;;  %v10139_v48 = vld [vmem:[%s12464_s13 + $0x6b8] sm:$0xff] }
  0xb5   :  { %13219 = vst [vmem:[#allocation361_spill] sm:$0xff] %v10134_v50  ;;  %13220 = vst [vmem:[#allocation362_spill] sm:$0xff] %v10139_v48  ;;  %v10144_v49 = vld [vmem:[%s12464_s13 + $0x6c0] sm:$0xff]  ;;  %v10149_v16 = vld [vmem:[%s12464_s13 + $0x6c8] sm:$0xff] }
  0xb6   :  { %13221 = vst [vmem:[#allocation363_spill] sm:$0xff] %v10144_v49  ;;  %13222 = vst [vmem:[#allocation364_spill] sm:$0xff] %v10149_v16  ;;  %v10154_v17 = vld [vmem:[%s12464_s13 + $0x6d0] sm:$0xff]  ;;  %v10159_v50 = vld [vmem:[%s12464_s13 + $0x6d8] sm:$0xff] }
  0xb7   :  { %13223 = vst [vmem:[#allocation365_spill] sm:$0xff] %v10154_v17  ;;  %13224 = vst [vmem:[#allocation366_spill] sm:$0xff] %v10159_v50  ;;  %v10164_v48 = vld [vmem:[%s12464_s13 + $0x6e0] sm:$0xff]  ;;  %v10169_v49 = vld [vmem:[%s12464_s13 + $0x6e8] sm:$0xff] }
  0xb8   :  { %13225 = vst [vmem:[#allocation367_spill] sm:$0xff] %v10164_v48  ;;  %13226 = vst [vmem:[#allocation368_spill] sm:$0xff] %v10169_v49  ;;  %v10174_v16 = vld [vmem:[%s12464_s13 + $0x6f0] sm:$0xff]  ;;  %v10179_v17 = vld [vmem:[%s12464_s13 + $0x6f8] sm:$0xff] }
  0xb9   :  { %13227 = vst [vmem:[#allocation369_spill] sm:$0xff] %v10174_v16  ;;  %13228 = vst [vmem:[#allocation370_spill] sm:$0xff] %v10179_v17  ;;  %v10184_v50 = vld [vmem:[%s12464_s13 + $0x700] sm:$0xff]  ;;  %v10189_v48 = vld [vmem:[%s12464_s13 + $0x708] sm:$0xff] }
  0xba   :  { %13229 = vst [vmem:[#allocation371_spill] sm:$0xff] %v10184_v50  ;;  %13230 = vst [vmem:[#allocation372_spill] sm:$0xff] %v10189_v48  ;;  %v10194_v49 = vld [vmem:[%s12464_s13 + $0x710] sm:$0xff]  ;;  %v10199_v16 = vld [vmem:[%s12464_s13 + $0x718] sm:$0xff] }
  0xbb   :  { %13231 = vst [vmem:[#allocation373_spill] sm:$0xff] %v10194_v49  ;;  %13232 = vst [vmem:[#allocation374_spill] sm:$0xff] %v10199_v16  ;;  %v10204_v17 = vld [vmem:[%s12464_s13 + $0x720] sm:$0xff]  ;;  %v10209_v50 = vld [vmem:[%s12464_s13 + $0x728] sm:$0xff] }
  0xbc   :  { %13233 = vst [vmem:[#allocation375_spill] sm:$0xff] %v10204_v17  ;;  %13234 = vst [vmem:[#allocation376_spill] sm:$0xff] %v10209_v50  ;;  %v10214_v48 = vld [vmem:[%s12464_s13 + $0x730] sm:$0xff]  ;;  %v10219_v49 = vld [vmem:[%s12464_s13 + $0x738] sm:$0xff] }
  0xbd   :  { %13235 = vst [vmem:[#allocation377_spill] sm:$0xff] %v10214_v48  ;;  %13236 = vst [vmem:[#allocation378_spill] sm:$0xff] %v10219_v49  ;;  %v10224_v16 = vld [vmem:[%s12464_s13 + $0x740] sm:$0xff]  ;;  %v10229_v17 = vld [vmem:[%s12464_s13 + $0x748] sm:$0xff] }
  0xbe   :  { %13237 = vst [vmem:[#allocation379_spill] sm:$0xff] %v10224_v16  ;;  %13238 = vst [vmem:[#allocation380_spill] sm:$0xff] %v10229_v17  ;;  %v10234_v50 = vld [vmem:[%s12464_s13 + $0x750] sm:$0xff]  ;;  %v10239_v48 = vld [vmem:[%s12464_s13 + $0x758] sm:$0xff] }
  0xbf   :  { %13239 = vst [vmem:[#allocation381_spill] sm:$0xff] %v10234_v50  ;;  %13240 = vst [vmem:[#allocation382_spill] sm:$0xff] %v10239_v48  ;;  %v10244_v49 = vld [vmem:[%s12464_s13 + $0x760] sm:$0xff]  ;;  %v10249_v16 = vld [vmem:[%s12464_s13 + $0x768] sm:$0xff] }
  0xc0   :  { %13241 = vst [vmem:[#allocation383_spill] sm:$0xff] %v10244_v49  ;;  %13242 = vst [vmem:[#allocation384_spill] sm:$0xff] %v10249_v16  ;;  %v10254_v17 = vld [vmem:[%s12464_s13 + $0x770] sm:$0xff]  ;;  %v10259_v50 = vld [vmem:[%s12464_s13 + $0x778] sm:$0xff] }
  0xc1   :  { %13243 = vst [vmem:[#allocation385_spill] sm:$0xff] %v10254_v17  ;;  %13244 = vst [vmem:[#allocation386_spill] sm:$0xff] %v10259_v50  ;;  %v10264_v48 = vld [vmem:[%s12464_s13 + $0x780] sm:$0xff]  ;;  %v10269_v49 = vld [vmem:[%s12464_s13 + $0x788] sm:$0xff] }
  0xc2   :  { %13245 = vst [vmem:[#allocation387_spill] sm:$0xff] %v10264_v48  ;;  %13246 = vst [vmem:[#allocation388_spill] sm:$0xff] %v10269_v49  ;;  %v10274_v16 = vld [vmem:[%s12464_s13 + $0x790] sm:$0xff]  ;;  %v10279_v17 = vld [vmem:[%s12464_s13 + $0x798] sm:$0xff] }
  0xc3   :  { %13247 = vst [vmem:[#allocation389_spill] sm:$0xff] %v10274_v16  ;;  %13248 = vst [vmem:[#allocation390_spill] sm:$0xff] %v10279_v17  ;;  %v10284_v50 = vld [vmem:[%s12464_s13 + $0x7a0] sm:$0xff]  ;;  %v10289_v48 = vld [vmem:[%s12464_s13 + $0x7a8] sm:$0xff] }
  0xc4   :  { %13249 = vst [vmem:[#allocation391_spill] sm:$0xff] %v10284_v50  ;;  %13250 = vst [vmem:[#allocation392_spill] sm:$0xff] %v10289_v48  ;;  %v10294_v49 = vld [vmem:[%s12464_s13 + $0x7b0] sm:$0xff]  ;;  %v10299_v16 = vld [vmem:[%s12464_s13 + $0x7b8] sm:$0xff] }
  0xc5   :  { %13251 = vst [vmem:[#allocation393_spill] sm:$0xff] %v10294_v49  ;;  %13252 = vst [vmem:[#allocation394_spill] sm:$0xff] %v10299_v16  ;;  %v10304_v17 = vld [vmem:[%s12464_s13 + $0x7c0] sm:$0xff]  ;;  %v10309_v50 = vld [vmem:[%s12464_s13 + $0x7c8] sm:$0xff] }
  0xc6   :  { %13253 = vst [vmem:[#allocation395_spill] sm:$0xff] %v10304_v17  ;;  %13254 = vst [vmem:[#allocation396_spill] sm:$0xff] %v10309_v50  ;;  %v10314_v48 = vld [vmem:[%s12464_s13 + $0x7d0] sm:$0xff]  ;;  %v10319_v49 = vld [vmem:[%s12464_s13 + $0x7d8] sm:$0xff] }
  0xc7   :  { %13255 = vst [vmem:[#allocation397_spill] sm:$0xff] %v10314_v48  ;;  %13256 = vst [vmem:[#allocation398_spill] sm:$0xff] %v10319_v49  ;;  %v10324_v16 = vld [vmem:[%s12464_s13 + $0x7e0] sm:$0xff]  ;;  %v10329_v17 = vld [vmem:[%s12464_s13 + $0x7e8] sm:$0xff] }
  0xc8   :  { %13257 = vst [vmem:[#allocation399_spill] sm:$0xff] %v10324_v16  ;;  %13258 = vst [vmem:[#allocation400_spill] sm:$0xff] %v10329_v17  ;;  %v10334_v50 = vld [vmem:[%s12464_s13 + $0x7f0] sm:$0xff]  ;;  %v10339_v48 = vld [vmem:[%s12464_s13 + $0x7f8] sm:$0xff] }
  0xc9   :  { %13259 = vst [vmem:[#allocation401_spill] sm:$0xff] %v10334_v50  ;;  %13260 = vst [vmem:[#allocation402_spill] sm:$0xff] %v10339_v48 }
  0xca   :  { %926 = vsyncadd [#allocation4 + $0x1], 32768  ;;  %vm1045_vm0 = vcmask 1043456   ;;  %v12810_v49 = vmov 0.0   ;;  %v8075_v16 = vld [vmem:[%s12452_s1] sm:$0x1f]   ;;  %v1261_v38 = vlaneseq }
  0xcb   :  { %7904 = vmatprep.subr.bf16.mxu0 %v12810_v49  ;;  %vm1046_vm1 = vcmask 1044480   ;;  %8068 = vmatprep.subr.bf16.mxu1 %v12810_v49  ;;  %v8262_v17 = vmov 65535   ;;  %vm8263_vm2 = vmmov 0   ;;  %v8076_v18 = vld [vmem:[%s12451_s0] sm:$0xff]   ;;  %vm1011_vm3 = vcmask 72704  }
  0xcc   :  { %v1047_v51 = vsel %vm1045_vm0, 4294967295, %v8262_v17  ;;  %7906 = vmatprep.mubr.msk.bf16.mxu0 %vm8263_vm2, %v12810_v49  ;;  %7930 = vmatprep.mubr.msk.bf16.mxu1 %vm8263_vm2, %v12810_v49  ;;  %v8079_v17 = vld [vmem:[%s12451_s0 + $0x30] sm:$0xff]   ;;  %vm1425_vm4 = vcmask 392192  }
  0xcd   :  { %v1048_v50 = vsel %vm1046_vm1, %v1047_v51, 0  ;;  %v8080_v51 = vld [vmem:[%s12451_s0 + $0x18] sm:$0xff]  }
  0xce   :  { %v1050_v48 = vand.u32 %v8075_v16, %v1048_v50  ;;  %v8077_v16 = vld [vmem:[%s12451_s0 + $0x8] sm:$0xff]   ;;  %v8083_v50 = vld [vmem:[%s12451_s0 + $0x40] sm:$0xff]  }
  0xd0   :  { %7905 = vmatpush3.bf16.msra.mxu0 %v1050_v48  ;;  %8069 = vmatpush3.bf16.msra.mxu1 %v1050_v48  ;;  %v8081_v48 = vld [vmem:[%s12451_s0 + $0x38] sm:$0xff]  }
  0xd3   :  { %7907 = vmatmul.mubr.msk.bf16.vlgmr.msra.gmra.mxu0 %vm1011_vm3, %v8076_v18  ;;  %7931 = vmatmul.mubr.msk.bf16.vlgmr.msra.gmra.mxu1 %vm1011_vm3, %v8079_v17  ;;  %v8078_v18 = vld [vmem:[%s12451_s0 + $0x10] sm:$0xff]   ;;  %v8085_v17 = vld [vmem:[%s12451_s0 + $0x48] sm:$0xff]  }
  0xd4   :  { %7910 = vmatprep.mubr.msk.bf16.mxu0 %vm8263_vm2, %v12810_v49  ;;  %7934 = vmatprep.mubr.msk.bf16.mxu1 %vm8263_vm2, %v12810_v49 }
  0xdb   :  { %7911 = vmatmul.mubr.msk.bf16.gmra.mxu0 %vm1011_vm3, %v8077_v16  ;;  %7935 = vmatmul.mubr.msk.bf16.gmra.mxu1 %vm1011_vm3, %v8081_v48  ;;  %v8082_v16 = vld [vmem:[%s12451_s0 + $0x20] sm:$0xff]   ;;  %v8086_v48 = vld [vmem:[%s12451_s0 + $0x50] sm:$0xff]  }
  0xdc   :  { %7914 = vmatprep.mubr.msk.bf16.mxu0 %vm8263_vm2, %v12810_v49  ;;  %7938 = vmatprep.mubr.msk.bf16.mxu1 %vm8263_vm2, %v12810_v49 }
  0xe3   :  { %7915 = vmatmul.mubr.msk.bf16.gmra.mxu0 %vm1011_vm3, %v8078_v18  ;;  %7939 = vmatmul.mubr.msk.bf16.gmra.mxu1 %vm1011_vm3, %v8083_v50  ;;  %v8084_v18 = vld [vmem:[%s12451_s0 + $0x28] sm:$0xff]   ;;  %v12818_v50 = vmov 0  }
  0xe4   :  { %7918 = vmatprep.mubr.msk.bf16.mxu0 %vm8263_vm2, %v12810_v49  ;;  %7942 = vmatprep.mubr.msk.bf16.mxu1 %vm8263_vm2, %v12810_v49 }
  0xe5   :  { %1435 = vmatprep.subr.bf16.mxu1 %v12818_v50  ;;  %1635 = vmatprep.subr.bf16.mxu0 %v12818_v50 }
  0xeb   :  { %7919 = vmatmul.mubr.msk.bf16.gmra.mxu0 %vm1011_vm3, %v8080_v51  ;;  %7943 = vmatmul.mubr.msk.bf16.gmra.mxu1 %vm1011_vm3, %v8085_v17 }
  0xec   :  { %7922 = vmatprep.mubr.msk.bf16.mxu0 %vm8263_vm2, %v12810_v49  ;;  %7946 = vmatprep.mubr.msk.bf16.mxu1 %vm8263_vm2, %v12810_v49 }
  0xf3   :  { %7923 = vmatmul.mubr.msk.bf16.gmra.mxu0 %vm1011_vm3, %v8082_v16  ;;  %7947 = vmatmul.mubr.msk.bf16.gmra.mxu1 %vm1011_vm3, %v8086_v48 }
  0xf4   :  { %7926 = vmatprep.mubr.msk.bf16.mxu0 %vm8263_vm2, %v12810_v49 }
  0xfb   :  { %7927 = vmatmul.mubr.msk.bf16.gmra.mxu0 %vm1011_vm3, %v8084_v18 }
 0x193   :  { %v10414_v51 = vpop.f32.mrf.mxu0  ;;  %v10416_v17 = vpop.f32.mrf.mxu1 }
 0x195   :  { %v7908_v16 = vpop.f32.mrf.mxu0  ;;  %v7932_v48 = vpop.f32.mrf.mxu1 }
 0x197   :  { %v10418_v19 = vpop.f32.mrf.mxu0  ;;  %v10420_v49 = vpop.f32.mrf.mxu1 }
 0x199   :  { %v7909_v52 = vpop.f32.mrf.mxu0  ;;  %v7933_v53 = vpop.f32.mrf.mxu1 }
 0x19b   :  { %v10422_v20 = vpop.f32.mrf.mxu0  ;;  %v10424_v18 = vpop.f32.mrf.mxu1 }
 0x19d   :  { %v7912_v21 = vpop.f32.mrf.mxu0  ;;  %v7936_v54 = vpop.f32.mrf.mxu1 }
 0x19e   :  { %v1202_v21 = vmul.f32 %v10418_v19, %v10418_v19 }
 0x19f   :  { %v10426_v55 = vpop.f32.mrf.mxu0  ;;  %v10428_v50 = vpop.f32.mrf.mxu1 }
 0x1a0   :  { %v1204_v26 = vmul.f32 %v10426_v55, %v10426_v55 }
 0x1a1   :  { %v7913_v22 = vpop.f32.mrf.mxu0  ;;  %v7937_v23 = vpop.f32.mrf.mxu1 }
 0x1a2   :  { %v1201_v22 = vmul.f32 %v10414_v51, %v10414_v51  ;;  %v1173_v23 = vadd.f32 %v10418_v19, %v10414_v51 }
 0x1a3   :  { %v10430_v16 = vpop.f32.mrf.mxu0  ;;  %v10432_v48 = vpop.f32.mrf.mxu1 }
 0x1a4   :  { %v1205_v29 = vmul.f32 %v10430_v16, %v10430_v16 }
 0x1a5   :  { %v7916_v56 = vpop.f32.mrf.mxu0  ;;  %v7940_v57 = vpop.f32.mrf.mxu1 }
 0x1a6   :  { %v1203_v56 = vmul.f32 %v10422_v20, %v10422_v20 }
 0x1a7   :  { %v10434_v52 = vpop.f32.mrf.mxu0  ;;  %v10436_v53 = vpop.f32.mrf.mxu1 }
 0x1a9   :  { %v7917_v24 = vpop.f32.mrf.mxu0  ;;  %v7941_v25 = vpop.f32.mrf.mxu1 }
 0x1aa   :  { %v1223_v24 = vadd.f32 %v1202_v21, %v1201_v22  ;;  %v1174_v25 = vadd.f32 %v1173_v23, %v10422_v20  ;;  %v1206_v21 = vmul.f32 %v10434_v52, %v10434_v52  ;;  %v8089_v22 = vld [vmem:[%s12455_s4 + $0x4] ss:$8 sps:$4 sm:$0xff]  }
 0x1ab   :  { %v10440_v54 = vpop.f32.mrf.mxu0  ;;  %v10442_v58 = vpop.f32.mrf.mxu1  ;;  %7071 = vmatprep.mubr.msk.bf16.mxu1 %vm1425_vm4, %v8089_v22 }
 0x1ac   :  { %v1224_v61 = vadd.f32 %v1223_v24, %v1203_v56  ;;  %v1175_v28 = vadd.f32 %v1174_v25, %v10426_v55 }
 0x1ad   :  { %v7920_v57 = vpop.f32.mrf.mxu0  ;;  %v7944_v59 = vpop.f32.mrf.mxu1 }
 0x1ae   :  { %v1225_v57 = vadd.f32 %v1224_v61, %v1204_v26  ;;  %v1176_v59 = vadd.f32 %v1175_v28, %v10430_v16  ;;  %v1207_v26 = vmul.f32 %v10440_v54, %v10440_v54 }
 0x1af   :  { %v10453_v27 = vpop.f32.mrf.mxu0  ;;  %v10455_v60 = vpop.f32.mrf.mxu1 }
 0x1b0   :  { %v1226_v24 = vadd.f32 %v1225_v57, %v1205_v29  ;;  %v1177_v25 = vadd.f32 %v1176_v59, %v10434_v52  ;;  %v1208_v31 = vmul.f32 %v10453_v27, %v10453_v27 }
 0x1b1   :  { %v7921_v62 = vpop.f32.mrf.mxu0  ;;  %v7945_v63 = vpop.f32.mrf.mxu1 }
 0x1b2   :  { %v8092_v62 = vld [vmem:[%s12455_s4 + $0x64] ss:$8 sps:$4 sm:$0xff]   ;;  %v1227_v63 = vadd.f32 %v1226_v24, %v1206_v21  ;;  %v1178_v30 = vadd.f32 %v1177_v25, %v10440_v54 }
 0x1b3   :  { %v10466_v23 = vpop.f32.mrf.mxu0  ;;  %v10468_v56 = vpop.f32.mrf.mxu1  ;;  %7101 = vmatprep.mubr.msk.bf16.mxu0 %vm1425_vm4, %v8092_v62 }
 0x1b4   :  { %v1228_v59 = vadd.f32 %v1227_v63, %v1207_v26  ;;  %v1179_v22 = vadd.f32 %v1178_v30, %v10453_v27 }
 0x1b5   :  { %v7924_v28 = vpop.f32.mrf.mxu0  ;;  %v7948_v61 = vpop.f32.mrf.mxu1 }
 0x1b6   :  { %v1209_v28 = vmul.f32 %v10466_v23, %v10466_v23  ;;  %v1229_v21 = vadd.f32 %v1228_v59, %v1208_v31  ;;  %v1180_v24 = vadd.f32 %v1179_v22, %v10466_v23 }
 0x1b7   :  { %v10480_v29 = vpop.f32.mrf.mxu0  ;;  %v10482_v57 = vpop.f32.mrf.mxu1 }
 0x1b8   :  { %v1210_v25 = vmul.f32 %v10480_v29, %v10480_v29  ;;  %v1230_v0 = vadd.f32 %v1229_v21, %v1209_v28  ;;  %v1181_v1 = vadd.f32 %v1180_v24, %v10480_v29  ;;  %v1213_v28 = vmul.f32 %v10416_v17, %v10416_v17 }
 0x1b9   :  { %v7925_v61 = vpop.f32.mrf.mxu0  ;;  %v7949_v32 = vpop.f32.mrf.mxu1 }
 0x1ba   :  { %v1231_v62 = vadd.f32 %v1230_v0, %v1210_v25  ;;  %v1214_v0 = vmul.f32 %v10420_v49, %v10420_v49 }
 0x1bb   :  { %v10491_v33 = vpop.f32.mrf.mxu0 }
 0x1bc   :  { %v1211_v26 = vmul.f32 %v10491_v33, %v10491_v33  ;;  %v1182_v63 = vadd.f32 %v1181_v1, %v10491_v33 }
 0x1bd   :  { %v7928_v30 = vpop.f32.mrf.mxu0 }
 0x1be   :  { %v1232_v31 = vadd.f32 %v1231_v62, %v1211_v26  ;;  %v1215_v26 = vmul.f32 %v10424_v18, %v10424_v18 }
 0x1bf   :  { %v10497_v61 = vpop.f32.mrf.mxu0 }
 0x1c0   :  { %v1183_v32 = vadd.f32 %v1182_v63, %v10497_v61  ;;  %v1212_v59 = vmul.f32 %v10497_v61, %v10497_v61  ;;  %v1216_v63 = vmul.f32 %v10428_v50, %v10428_v50 }
 0x1c1   :  { %v7929_v22 = vpop.f32.mrf.mxu0 }
 0x1c2   :  { %v1184_v21 = vadd.f32 %v1183_v32, %v10416_v17  ;;  %v1233_v24 = vadd.f32 %v1232_v31, %v1212_v59  ;;  %v1217_v31 = vmul.f32 %v10432_v48, %v10432_v48 }
 0x1c4   :  { %v1185_v1 = vadd.f32 %v1184_v21, %v10420_v49  ;;  %v1234_v25 = vadd.f32 %v1233_v24, %v1213_v28  ;;  %v1218_v28 = vmul.f32 %v10436_v53, %v10436_v53 }
 0x1c6   :  { %v1186_v30 = vadd.f32 %v1185_v1, %v10424_v18  ;;  %v1235_v62 = vadd.f32 %v1234_v25, %v1214_v0  ;;  %v1219_v1 = vmul.f32 %v10442_v58, %v10442_v58 }
 0x1c8   :  { %v1236_v22 = vadd.f32 %v1235_v62, %v1215_v26  ;;  %v1187_v34 = vadd.f32 %v1186_v30, %v10428_v50  ;;  %v1220_v62 = vmul.f32 %v10455_v60, %v10455_v60 }
 0x1ca   :  { %v1188_v32 = vadd.f32 %v1187_v34, %v10432_v48  ;;  %v1237_v59 = vadd.f32 %v1236_v22, %v1216_v63  ;;  %v1221_v22 = vmul.f32 %v10468_v56, %v10468_v56 }
 0x1cc   :  { %v1189_v21 = vadd.f32 %v1188_v32, %v10436_v53  ;;  %v1238_v24 = vadd.f32 %v1237_v59, %v1217_v31  ;;  %v1222_v59 = vmul.f32 %v10482_v57, %v10482_v57 }
 0x1ce   :  { %v1190_v0 = vadd.f32 %v1189_v21, %v10442_v58  ;;  %v1239_v25 = vadd.f32 %v1238_v24, %v1218_v28 }
 0x1d0   :  { %v1240_v26 = vadd.f32 %v1239_v25, %v1219_v1  ;;  %v1191_v30 = vadd.f32 %v1190_v0, %v10455_v60 }
 0x1d2   :  { %v1241_v34 = vadd.f32 %v1240_v26, %v1220_v62  ;;  %v1192_v63 = vadd.f32 %v1191_v30, %v10468_v56 }
 0x1d4   :  { %v1242_v32 = vadd.f32 %v1241_v34, %v1221_v22  ;;  %v1193_v31 = vadd.f32 %v1192_v63, %v10482_v57 }
 0x1d6   :  { %v1194_v21 = vrot.slane %v1193_v31, 4  ;;  %v1243_v28 = vadd.f32 %v1242_v32, %v1222_v59  ;;  %v10532_v32 = vshrl.u32 %v1261_v38, 7 }
 0x1d8   :  { %v1195_v24 = vadd.f32 %v1194_v21, %v1193_v31  ;;  %v1244_v1 = vrot.slane %v1243_v28, 4  ;;  %13261 = vst [vmem:[#allocation403_spill] sm:$0xff] %v10532_v32  ;;  %v1256_v31 = vld [vmem:[%s12453_s2] sm:$0x1]  ;;  %v10538_v59 = vsub.s32 0, %v10532_v32 }
 0x1da   :  { %v1196_v0 = vrot.slane %v1195_v24, 2  ;;  %v1245_v25 = vadd.f32 %v1244_v1, %v1243_v28 }
 0x1dc   :  { %v1197_v35 = vadd.f32 %v1196_v0, %v1195_v24  ;;  %v1246_v2 = vrot.slane %v1245_v25, 2 }
 0x1de   :  { %v1198_v26 = vrot.slane %v1197_v35, 1  ;;  %v1247_v62 = vadd.f32 %v1246_v2, %v1245_v25 }
 0x1e0   :  { %v1199_v30 = vadd.f32 %v1198_v26, %v1197_v35  ;;  %v1248_v3 = vrot.slane %v1247_v62, 1 }
 0x1e2   :  { %v1200_v36 = vmul.f32 0.0056818184, %v1199_v30  ;;  %v1249_v37 = vadd.f32 %v1248_v3, %v1247_v62  ;;  %v1258_v3 = vld [vmem:[%s12454_s3] sm:$0x1] }
 0x1e4   :  { %v1250_v34 = vmul.f32 0.0056818184, %v1249_v37  ;;  %v1251_v22 = vmul.f32 %v1200_v36, %v1200_v36 }
 0x1e6   :  { %v1252_v63 = vsub.f32 %v1250_v34, %v1251_v22 }
 0x1e8   :  { %v1253_v4 = vmax.f32 %v1252_v63, 0.0 }
 0x1ea   :  { %v1254_v5 = vadd.f32 1e-05, %v1253_v4 }
 0x1ec   :  { %8249 = vrsqrt.f32 %v1254_v5 }
 0x1f9   :  { %v8250_v2 = vpop.eup %8249 }
 0x1fa   :  { %v1257_v35 = vmul.f32 %v8250_v2, %v1256_v31 }
 0x1fc   :  { %v1259_v37 = vmul.f32 %v1257_v35, %v1200_v36  ;;  %v10544_v4 = vrot.slane %v1257_v35, %v10538_v59 }
 0x1fe   :  { %v1260_v5 = vsub.f32 %v1258_v3, %v1259_v37  ;;  %v1279_v21 = vmul.f32 %v10544_v4, %v10424_v18  ;;  %v1280_v28 = vmul.f32 %v10544_v4, %v10428_v50  ;;  %v1277_v24 = vmul.f32 %v10544_v4, %v10416_v17 }
 0x1ff   :  { %v1278_v1 = vmul.f32 %v10544_v4, %v10420_v49  ;;  %v1275_v25 = vmul.f32 %v10544_v4, %v10491_v33  ;;  %v1276_v26 = vmul.f32 %v10544_v4, %v10497_v61  ;;  %v1273_v34 = vmul.f32 %v10544_v4, %v10466_v23 }
 0x200   :  { %v10547_v38 = vrot.slane %v1260_v5, %v10538_v59  ;;  %v1274_v33 = vmul.f32 %v10544_v4, %v10480_v29  ;;  %v1271_v61 = vmul.f32 %v10544_v4, %v10440_v54 }
 0x202   :  { %v1307_v36 = vadd.f32 %v10547_v38, %v1279_v21  ;;  %v1308_v0 = vadd.f32 %v10547_v38, %v1280_v28  ;;  %v1305_v18 = vadd.f32 %v10547_v38, %v1277_v24  ;;  %v1306_v50 = vadd.f32 %v10547_v38, %v1278_v1 }
 0x203   :  { %v1303_v62 = vadd.f32 %v10547_v38, %v1275_v25  ;;  %v1304_v17 = vadd.f32 %v10547_v38, %v1276_v26  ;;  %v1301_v23 = vadd.f32 %v10547_v38, %v1273_v34  ;;  %v1302_v54 = vadd.f32 %v10547_v38, %v1274_v33 }
 0x204   :  { %vm1329_vm5 = vcmp.gt.f32.partialorder %v1307_v36, 0.0  ;;  %vm1330_vm6 = vcmp.gt.f32.partialorder %v1308_v0, 0.0  ;;  %v1351_v49 = vmul.f32 0.2, %v1307_v36  ;;  %v1352_v30 = vmul.f32 0.2, %v1308_v0 }
 0x205   :  { %vm1327_vm7 = vcmp.gt.f32.partialorder %v1305_v18, 0.0  ;;  %vm1328_vm8 = vcmp.gt.f32.partialorder %v1306_v50, 0.0  ;;  %v1349_v31 = vmul.f32 0.2, %v1305_v18  ;;  %v1350_v35 = vmul.f32 0.2, %v1306_v50 }
 0x206   :  { %v1373_v22 = vsel %vm1329_vm5, %v1307_v36, %v1351_v49  ;;  %v1374_v63 = vsel %vm1330_vm6, %v1308_v0, %v1352_v30  ;;  %vm1325_vm9 = vcmp.gt.f32.partialorder %v1303_v62, 0.0  ;;  %vm1326_vm10 = vcmp.gt.f32.partialorder %v1304_v17, 0.0 }
 0x207   :  { %v10573_v2 = vpack.c.bf16 %v1374_v63, %v1373_v22  ;;  %v1371_v3 = vsel %vm1327_vm7, %v1305_v18, %v1349_v31  ;;  %v1347_v37 = vmul.f32 0.2, %v1303_v62  ;;  %v1348_v5 = vmul.f32 0.2, %v1304_v17 }
 0x208   :  { %v1372_v29 = vsel %vm1328_vm8, %v1306_v50, %v1350_v35  ;;  %v13262_v21 = vmov 0   ;;  %v1272_v24 = vmul.f32 %v10544_v4, %v10453_v27  ;;  %v1299_v1 = vadd.f32 %v10547_v38, %v1271_v61 }
 0x209   :  { %1436 = vmatpush1.bf16.msra.mxu1 %v10573_v2  ;;  %1636 = vmatpush1.bf16.msra.mxu0 %v10573_v2  ;;  %v10581_v28 = vpack.c.bf16 %v1372_v29, %v1371_v3  ;;  %v1369_v36 = vsel %vm1325_vm9, %v1303_v62, %v1347_v37  ;;  %v1370_v0 = vsel %vm1326_vm10, %v1304_v17, %v1348_v5  ;;  %v1345_v25 = vmul.f32 0.2, %v1301_v23 }
 0x20a   :  { %1437 = vmatprep.subr.bf16.mxu1 %v13262_v21  ;;  %1637 = vmatprep.subr.bf16.mxu0 %v13262_v21  ;;  %v1346_v26 = vmul.f32 0.2, %v1302_v54  ;;  %vm1323_vm11 = vcmp.gt.f32.partialorder %v1301_v23, 0.0  ;;  %vm1324_vm12 = vcmp.gt.f32.partialorder %v1302_v54, 0.0  ;;  %v1300_v18 = vadd.f32 %v10547_v38, %v1272_v24 }
 0x20b   :  { %v1269_v50 = vmul.f32 %v10544_v4, %v10430_v16  ;;  %v1270_v27 = vmul.f32 %v10544_v4, %v10434_v52  ;;  %v10595_v62 = vpack.c.bf16 %v1370_v0, %v1369_v36  ;;  %v1343_v17 = vmul.f32 0.2, %v1299_v1 }
 0x20c   :  { %v1367_v49 = vsel %vm1323_vm11, %v1301_v23, %v1345_v25  ;;  %v1368_v30 = vsel %vm1324_vm12, %v1302_v54, %v1346_v26  ;;  %vm1321_vm13 = vcmp.gt.f32.partialorder %v1299_v1, 0.0  ;;  %v1344_v61 = vmul.f32 0.2, %v1300_v18 }
 0x20d   :  { %1438 = vmatpush1.bf16.msra.mxu1 %v10581_v28  ;;  %1638 = vmatpush1.bf16.msra.mxu0 %v10581_v28  ;;  %v1297_v34 = vadd.f32 %v10547_v38, %v1269_v50  ;;  %v1298_v33 = vadd.f32 %v10547_v38, %v1270_v27  ;;  %vm1322_vm14 = vcmp.gt.f32.partialorder %v1300_v18, 0.0  ;;  %v10603_v16 = vpack.c.bf16 %v1368_v30, %v1367_v49 }
 0x20e   :  { %1439 = vmatprep.subr.bf16.mxu1 %v13262_v21  ;;  %1639 = vmatprep.subr.bf16.mxu0 %v13262_v21  ;;  %v1267_v52 = vmul.f32 %v10544_v4, %v10422_v20  ;;  %v1268_v22 = vmul.f32 %v10544_v4, %v10426_v55  ;;  %v1365_v63 = vsel %vm1321_vm13, %v1299_v1, %v1343_v17 }
 0x20f   :  { %vm1319_vm15 = vcmp.gt.f32.partialorder %v1297_v34, 0.0  ;;  %v1341_v31 = vmul.f32 0.2, %v1297_v34  ;;  %v1342_v35 = vmul.f32 0.2, %v1298_v33  ;;  %v1366_v3 = vsel %vm1322_vm14, %v1300_v18, %v1344_v61 }
 0x210   :  { %vm1320_vm0 = vcmp.gt.f32.partialorder %v1298_v33, 0.0  ;;  %v1295_v37 = vadd.f32 %v10547_v38, %v1267_v52  ;;  %v1296_v5 = vadd.f32 %v10547_v38, %v1268_v22  ;;  %v1265_v20 = vmul.f32 %v10544_v4, %v10414_v51 }
 0x211   :  { %1440 = vmatpush1.bf16.msra.mxu1 %v10595_v62  ;;  %1640 = vmatpush1.bf16.msra.mxu0 %v10595_v62  ;;  %v1266_v55 = vmul.f32 %v10544_v4, %v10418_v19  ;;  %v1285_v23 = vmul.f32 %v10544_v4, %v10468_v56  ;;  %v10621_v29 = vpack.c.bf16 %v1366_v3, %v1365_v63 }
 0x212   :  { %1441 = vmatprep.subr.bf16.mxu1 %v13262_v21  ;;  %1641 = vmatprep.subr.bf16.mxu0 %v13262_v21  ;;  %v1363_v54 = vsel %vm1319_vm15, %v1297_v34, %v1341_v31  ;;  %v1364_v24 = vsel %vm1320_vm0, %v1298_v33, %v1342_v35  ;;  %v1339_v1 = vmul.f32 0.2, %v1295_v37  ;;  %v1340_v36 = vmul.f32 0.2, %v1296_v5 }
 0x213   :  { %v1293_v0 = vadd.f32 %v10547_v38, %v1265_v20  ;;  %v1294_v25 = vadd.f32 %v10547_v38, %v1266_v55  ;;  %v1286_v26 = vmul.f32 %v10544_v4, %v10482_v57  ;;  %vm1317_vm1 = vcmp.gt.f32.partialorder %v1295_v37, 0.0 }
 0x214   :  { %vm1318_vm3 = vcmp.gt.f32.partialorder %v1296_v5, 0.0  ;;  %v1313_v19 = vadd.f32 %v10547_v38, %v1285_v23  ;;  %v10633_v56 = vpack.c.bf16 %v1364_v24, %v1363_v54  ;;  %v1361_v18 = vsel %vm1317_vm1, %v1295_v37, %v1339_v1 }
 0x215   :  { %1442 = vmatpush1.bf16.msra.mxu1 %v10603_v16  ;;  %1642 = vmatpush1.bf16.msra.mxu0 %v10603_v16  ;;  %v1314_v51 = vadd.f32 %v10547_v38, %v1286_v26  ;;  %v1362_v50 = vsel %vm1318_vm3, %v1296_v5, %v1340_v36  ;;  %v1337_v27 = vmul.f32 0.2, %v1293_v0  ;;  %v1338_v57 = vmul.f32 0.2, %v1294_v25  ;;  %v8093_v26 = vld [vmem:[%s12455_s4 + $0x14] ss:$8 sps:$4 sm:$0xff]  }
 0x216   :  { %1443 = vmatprep.subr.bf16.mxu1 %v13262_v21  ;;  %1643 = vmatprep.subr.bf16.mxu0 %v13262_v21  ;;  %vm1315_vm5 = vcmp.gt.f32.partialorder %v1293_v0, 0.0  ;;  %vm1316_vm6 = vcmp.gt.f32.partialorder %v1294_v25, 0.0  ;;  %vm1335_vm7 = vcmp.gt.f32.partialorder %v1313_v19, 0.0  ;;  %v1283_v17 = vmul.f32 %v10544_v4, %v10442_v58 }
 0x217   :  { %v1284_v49 = vmul.f32 %v10544_v4, %v10455_v60  ;;  %vm1336_vm8 = vcmp.gt.f32.partialorder %v1314_v51, 0.0  ;;  %v1357_v30 = vmul.f32 0.2, %v1313_v19  ;;  %v1358_v34 = vmul.f32 0.2, %v1314_v51 }
 0x218   :  { %v10643_v33 = vpack.c.bf16 %v1362_v50, %v1361_v18  ;;  %v1359_v61 = vsel %vm1315_vm5, %v1293_v0, %v1337_v27  ;;  %v1360_v52 = vsel %vm1316_vm6, %v1294_v25, %v1338_v57  ;;  %v1311_v22 = vadd.f32 %v10547_v38, %v1283_v17  ;;  %v8087_v0 = vld [vmem:[%s12455_s4] ss:$8 sps:$4 sm:$0xff]   ;;  %v8098_v18 = vld [vmem:[%s12455_s4 + $0x70] ss:$8 sps:$4 sm:$0xff]   ;;  %v8099_v50 = vld [vmem:[%s12455_s4 + $0x24] ss:$8 sps:$4 sm:$0xff]  }
 0x219   :  { %1444 = vmatpush1.bf16.msra.mxu1 %v10621_v29  ;;  %1644 = vmatpush1.bf16.msra.mxu0 %v10621_v29  ;;  %v1312_v63 = vadd.f32 %v10547_v38, %v1284_v49  ;;  %v1281_v58 = vmul.f32 %v10544_v4, %v10432_v48  ;;  %v1282_v60 = vmul.f32 %v10544_v4, %v10436_v53  ;;  %v8090_v25 = vld [vmem:[%s12455_s4 + $0x60] ss:$8 sps:$4 sm:$0xff]   ;;  %v8102_v27 = vld [vmem:[%s12455_s4 + $0x84] ss:$8 sps:$4 sm:$0xff]   ;;  %v8107_v49 = vld [vmem:[%s12455_s4 + $0x34] ss:$8 sps:$4 sm:$0xff]  }
 0x21a   :  { %1445 = vmatprep.subr.bf16.mxu1 %v13262_v21  ;;  %1645 = vmatprep.subr.bf16.mxu0 %v13262_v21  ;;  %v1379_v31 = vsel %vm1335_vm7, %v1313_v19, %v1357_v30  ;;  %v1380_v35 = vsel %vm1336_vm8, %v1314_v51, %v1358_v34  ;;  %v10656_v3 = vpack.c.bf16 %v1360_v52, %v1359_v61  ;;  %v1355_v37 = vmul.f32 0.2, %v1311_v22  ;;  %v8096_v19 = vld [vmem:[%s12455_s4 + $0x74] ss:$8 sps:$4 sm:$0xff]   ;;  %v8095_v51 = vld [vmem:[%s12455_s4 + $0x10] ss:$8 sps:$4 sm:$0xff]  }
 0x21b   :  { %v1356_v5 = vmul.f32 0.2, %v1312_v63  ;;  %v1309_v20 = vadd.f32 %v10547_v38, %v1281_v58  ;;  %v1310_v55 = vadd.f32 %v10547_v38, %v1282_v60  ;;  %vm1333_vm9 = vcmp.gt.f32.partialorder %v1311_v22, 0.0  ;;  %v8101_v57 = vld [vmem:[%s12455_s4 + $0x20] ss:$8 sps:$4 sm:$0xff]  }
 0x21c   :  { %vm1334_vm10 = vcmp.gt.f32.partialorder %v1312_v63, 0.0  ;;  %v10664_v48 = vpack.c.bf16 %v1380_v35, %v1379_v31  ;;  %v1377_v53 = vsel %vm1333_vm9, %v1311_v22, %v1355_v37  ;;  %v8104_v17 = vld [vmem:[%s12455_s4 + $0x80] ss:$8 sps:$4 sm:$0xff]   ;;  %v8110_v30 = vld [vmem:[%s12455_s4 + $0xc4] ss:$8 sps:$4 sm:$0xff]  }
 0x21d   :  { %1446 = vmatpush1.bf16.msra.mxu1 %v10633_v56  ;;  %1646 = vmatpush1.bf16.msra.mxu0 %v10633_v56  ;;  %v1378_v4 = vsel %vm1334_vm10, %v1312_v63, %v1356_v5  ;;  %v1353_v23 = vmul.f32 0.2, %v1309_v20  ;;  %v1354_v54 = vmul.f32 0.2, %v1310_v55  ;;  %vm1331_vm11 = vcmp.gt.f32.partialorder %v1309_v20, 0.0 }
 0x21e   :  { %1447 = vmatprep.subr.bf16.mxu1 %v13262_v21  ;;  %1647 = vmatprep.subr.bf16.mxu0 %v13262_v21  ;;  %vm1332_vm12 = vcmp.gt.f32.partialorder %v1310_v55, 0.0  ;;  %v10670_v38 = vpack.c.bf16 %v1378_v4, %v1377_v53  ;;  %v8105_v34 = vld [vmem:[%s12455_s4 + $0x30] ss:$8 sps:$4 sm:$0xff]   ;;  %v8108_v61 = vld [vmem:[%s12455_s4 + $0xc0] ss:$8 sps:$4 sm:$0xff]  }
 0x21f   :  { %v1375_v24 = vsel %vm1331_vm11, %v1309_v20, %v1353_v23  ;;  %v1376_v1 = vsel %vm1332_vm12, %v1310_v55, %v1354_v54  ;;  %v8111_v52 = vld [vmem:[%s12455_s4 + $0x44] ss:$8 sps:$4 sm:$0xff]   ;;  %v8117_v22 = vld [vmem:[%s12455_s4 + $0xd4] ss:$8 sps:$4 sm:$0xff]   ;;  %v8113_v63 = vld [vmem:[%s12455_s4 + $0x40] ss:$8 sps:$4 sm:$0xff]  }
 0x220   :  { %v10676_v36 = vpack.c.bf16 %v1376_v1, %v1375_v24  ;;  %v8119_v58 = vld [vmem:[%s12455_s4 + $0xd0] ss:$8 sps:$4 sm:$0xff]   ;;  %v8114_v60 = vld [vmem:[%s12455_s4 + $0x54] ss:$8 sps:$4 sm:$0xff]   ;;  %v8120_v31 = vld [vmem:[%s12455_s4 + $0xe4] ss:$8 sps:$4 sm:$0xff]  }
 0x221   :  { %1448 = vmatpush1.bf16.msra.mxu1 %v10643_v33  ;;  %1648 = vmatpush1.bf16.msra.mxu0 %v10643_v33  ;;  %v8116_v35 = vld [vmem:[%s12455_s4 + $0x50] ss:$8 sps:$4 sm:$0xff]   ;;  %v8122_v37 = vld [vmem:[%s12455_s4 + $0xe0] ss:$8 sps:$4 sm:$0xff]   ;;  %v8125_v5 = vld [vmem:[%s12455_s4 + $0x94] ss:$8 sps:$4 sm:$0xff]  }
 0x222   :  { %1449 = vmatprep.subr.bf16.mxu1 %v13262_v21  ;;  %1649 = vmatprep.subr.bf16.mxu0 %v13262_v21  ;;  %v8128_v20 = vld [vmem:[%s12455_s4 + $0x124] ss:$8 sps:$4 sm:$0xff]   ;;  %v8123_v55 = vld [vmem:[%s12455_s4 + $0x90] ss:$8 sps:$4 sm:$0xff]   ;;  %v8126_v53 = vld [vmem:[%s12455_s4 + $0x120] ss:$8 sps:$4 sm:$0xff]  }
 0x223   :  { %v8129_v4 = vld [vmem:[%s12455_s4 + $0xa4] ss:$8 sps:$4 sm:$0xff]   ;;  %v8144_v23 = vld [vmem:[%s12455_s4 + $0x134] ss:$8 sps:$4 sm:$0xff]   ;;  %v8131_v54 = vld [vmem:[%s12455_s4 + $0xa0] ss:$8 sps:$4 sm:$0xff]  }
 0x224   :  { %v8146_v24 = vld [vmem:[%s12455_s4 + $0x130] ss:$8 sps:$4 sm:$0xff]   ;;  %v8132_v1 = vld [vmem:[%s12455_s4 + $0xb4] ss:$8 sps:$4 sm:$0xff]  }
 0x225   :  { %1450 = vmatpush1.bf16.msra.mxu1 %v10656_v3  ;;  %1650 = vmatpush1.bf16.msra.mxu0 %v10656_v3 }
 0x226   :  { %1461 = vmatprep.subr.bf16.mxu1 %v13262_v21  ;;  %1661 = vmatprep.subr.bf16.mxu0 %v13262_v21 }
 0x229   :  { %1462 = vmatpush2.bf16.msra.mxu1 %v10664_v48  ;;  %1662 = vmatpush2.bf16.msra.mxu0 %v10664_v48 }
 0x22a   :  { %1463 = vmatprep.subr.bf16.mxu1 %v13262_v21  ;;  %1663 = vmatprep.subr.bf16.mxu0 %v13262_v21 }
 0x22d   :  { %1464 = vmatpush2.bf16.msra.mxu1 %v10670_v38  ;;  %1664 = vmatpush2.bf16.msra.mxu0 %v10670_v38 }
 0x22e   :  { %1465 = vmatprep.subr.bf16.mxu1 %v13262_v21  ;;  %1665 = vmatprep.subr.bf16.mxu0 %v13262_v21 }
 0x231   :  { %1466 = vmatpush2.bf16.msra.mxu1 %v10676_v36  ;;  %1666 = vmatpush2.bf16.msra.mxu0 %v10676_v36 }
 0x232   :  { %1535 = vmatprep.subr.bf16.mxu1 %v13262_v21  ;;  %1835 = vmatprep.subr.bf16.mxu0 %v13262_v21 }
 0x234   :  { %1468 = vmatmul.mubr.bf16.vlgmr.msra.gmra.mxu1 %v8087_v0  ;;  %1668 = vmatmul.mubr.bf16.vlgmr.msra.gmra.mxu0 %v8090_v25  ;;  %v8147_v0 = vld [vmem:[%s12455_s4 + $0x144] ss:$8 sps:$4 sm:$0xff]   ;;  %v8134_v25 = vld [vmem:[%s12455_s4 + $0xb0] ss:$8 sps:$4 sm:$0xff]  }
 0x235   :  { %1536 = vmatpush1.bf16.msra.mxu1 %v10573_v2  ;;  %1836 = vmatpush1.bf16.msra.mxu0 %v10573_v2 }
 0x236   :  { %1537 = vmatprep.subr.bf16.mxu1 %v13262_v21  ;;  %1837 = vmatprep.subr.bf16.mxu0 %v13262_v21 }
 0x237   :  { %7072 = vmatprep.mubr.msk.bf16.mxu1 %vm1425_vm4, %v8093_v26  ;;  %7102 = vmatprep.mubr.msk.bf16.mxu0 %vm1425_vm4, %v8096_v19  ;;  %v8149_v26 = vld [vmem:[%s12455_s4 + $0x140] ss:$8 sps:$4 sm:$0xff]   ;;  %v8137_v19 = vld [vmem:[%s12455_s4 + $0xf4] ss:$8 sps:$4 sm:$0xff]  }
 0x239   :  { %1538 = vmatpush1.bf16.msra.mxu1 %v10581_v28  ;;  %1838 = vmatpush1.bf16.msra.mxu0 %v10581_v28 }
 0x23a   :  { %1539 = vmatprep.subr.bf16.mxu1 %v13262_v21  ;;  %1839 = vmatprep.subr.bf16.mxu0 %v13262_v21 }
 0x23c   :  { %1476 = vmatmul.mubr.bf16.gmra.mxu1 %v8095_v51  ;;  %1676 = vmatmul.mubr.bf16.gmra.mxu0 %v8098_v18  ;;  %v8152_v51 = vld [vmem:[%s12455_s4 + $0x184] ss:$8 sps:$4 sm:$0xff]   ;;  %v8135_v18 = vld [vmem:[%s12455_s4 + $0xf0] ss:$8 sps:$4 sm:$0xff]  }
 0x23d   :  { %1540 = vmatpush1.bf16.msra.mxu1 %v10595_v62  ;;  %1840 = vmatpush1.bf16.msra.mxu0 %v10595_v62 }
 0x23e   :  { %1541 = vmatprep.subr.bf16.mxu1 %v13262_v21  ;;  %1841 = vmatprep.subr.bf16.mxu0 %v13262_v21 }
 0x23f   :  { %7073 = vmatprep.mubr.msk.bf16.mxu1 %vm1425_vm4, %v8099_v50  ;;  %7103 = vmatprep.mubr.msk.bf16.mxu0 %vm1425_vm4, %v8102_v27  ;;  %v8150_v50 = vld [vmem:[%s12455_s4 + $0x180] ss:$8 sps:$4 sm:$0xff]   ;;  %v8138_v27 = vld [vmem:[%s12455_s4 + $0x104] ss:$8 sps:$4 sm:$0xff]  }
 0x241   :  { %1542 = vmatpush1.bf16.msra.mxu1 %v10603_v16  ;;  %1842 = vmatpush1.bf16.msra.mxu0 %v10603_v16 }
 0x242   :  { %1543 = vmatprep.subr.bf16.mxu1 %v13262_v21  ;;  %1843 = vmatprep.subr.bf16.mxu0 %v13262_v21 }
 0x244   :  { %1484 = vmatmul.mubr.bf16.gmra.mxu1 %v8101_v57  ;;  %1684 = vmatmul.mubr.bf16.gmra.mxu0 %v8104_v17  ;;  %v8184_v57 = vld [vmem:[%s12456_s5 + $0xf8] sm:$0xff]  }
 0x245   :  { %1544 = vmatpush1.bf16.msra.mxu1 %v10621_v29  ;;  %1844 = vmatpush1.bf16.msra.mxu0 %v10621_v29  ;;  %v8156_v17 = vld [vmem:[%s12455_s4 + $0x194] ss:$8 sps:$4 sm:$0xff]  }
 0x246   :  { %1545 = vmatprep.subr.bf16.mxu1 %v13262_v21  ;;  %1845 = vmatprep.subr.bf16.mxu0 %v13262_v21 }
 0x247   :  { %7086 = vmatprep.mubr.msk.bf16.mxu1 %vm1425_vm4, %v8107_v49  ;;  %7131 = vmatprep.mubr.msk.bf16.mxu0 %vm1425_vm4, %v8110_v30  ;;  %v8185_v49 = vld [vmem:[%s12456_s5 + $0xb8] sm:$0xff]   ;;  %v8186_v30 = vld [vmem:[%s12456_s5 + $0xf0] sm:$0xff]  }
 0x249   :  { %1546 = vmatpush1.bf16.msra.mxu1 %v10633_v56  ;;  %1846 = vmatpush1.bf16.msra.mxu0 %v10633_v56 }
 0x24a   :  { %1547 = vmatprep.subr.bf16.mxu1 %v13262_v21  ;;  %1847 = vmatprep.subr.bf16.mxu0 %v13262_v21 }
 0x24d   :  { %1548 = vmatpush1.bf16.msra.mxu1 %v10643_v33  ;;  %1848 = vmatpush1.bf16.msra.mxu0 %v10643_v33 }
 0x24e   :  { %1549 = vmatprep.subr.bf16.mxu1 %v13262_v21  ;;  %1849 = vmatprep.subr.bf16.mxu0 %v13262_v21 }
 0x251   :  { %1550 = vmatpush1.bf16.msra.mxu1 %v10656_v3  ;;  %1850 = vmatpush1.bf16.msra.mxu0 %v10656_v3 }
 0x252   :  { %1561 = vmatprep.subr.bf16.mxu1 %v13262_v21  ;;  %1861 = vmatprep.subr.bf16.mxu0 %v13262_v21 }
 0x255   :  { %1562 = vmatpush2.bf16.msra.mxu1 %v10664_v48  ;;  %1862 = vmatpush2.bf16.msra.mxu0 %v10664_v48 }
 0x256   :  { %1563 = vmatprep.subr.bf16.mxu1 %v13262_v21  ;;  %1863 = vmatprep.subr.bf16.mxu0 %v13262_v21 }
 0x259   :  { %1564 = vmatpush2.bf16.msra.mxu1 %v10670_v38  ;;  %1864 = vmatpush2.bf16.msra.mxu0 %v10670_v38 }
 0x25a   :  { %1565 = vmatprep.subr.bf16.mxu1 %v13262_v21  ;;  %1865 = vmatprep.subr.bf16.mxu0 %v13262_v21 }
 0x25d   :  { %1566 = vmatpush2.bf16.msra.mxu1 %v10676_v36  ;;  %1866 = vmatpush2.bf16.msra.mxu0 %v10676_v36 }
 0x25e   :  { %1735 = vmatprep.subr.bf16.mxu1 %v13262_v21  ;;  %2035 = vmatprep.subr.bf16.mxu0 %v13262_v21 }
 0x260   :  { %1568 = vmatmul.mubr.bf16.vlgmr.msra.gmra.mxu1 %v8105_v34  ;;  %1868 = vmatmul.mubr.bf16.vlgmr.msra.gmra.mxu0 %v8108_v61  ;;  %v8187_v34 = vld [vmem:[%s12456_s5 + $0xb0] sm:$0xff]   ;;  %v8140_v61 = vld [vmem:[%s12455_s4 + $0x100] ss:$8 sps:$4 sm:$0xff]  }
 0x261   :  { %1736 = vmatpush1.bf16.msra.mxu1 %v10573_v2  ;;  %2036 = vmatpush1.bf16.msra.mxu0 %v10573_v2 }
 0x262   :  { %1737 = vmatprep.subr.bf16.mxu1 %v13262_v21  ;;  %2037 = vmatprep.subr.bf16.mxu0 %v13262_v21 }
 0x263   :  { %7087 = vmatprep.mubr.msk.bf16.mxu1 %vm1425_vm4, %v8111_v52  ;;  %7132 = vmatprep.mubr.msk.bf16.mxu0 %vm1425_vm4, %v8117_v22  ;;  %v8158_v52 = vld [vmem:[%s12455_s4 + $0x190] ss:$8 sps:$4 sm:$0xff]   ;;  %v8162_v22 = vld [vmem:[%s12455_s4 + $0x1a4] ss:$8 sps:$4 sm:$0xff]  }
 0x265   :  { %1738 = vmatpush1.bf16.msra.mxu1 %v10581_v28  ;;  %2038 = vmatpush1.bf16.msra.mxu0 %v10581_v28 }
 0x266   :  { %1739 = vmatprep.subr.bf16.mxu1 %v13262_v21  ;;  %2039 = vmatprep.subr.bf16.mxu0 %v13262_v21 }
 0x268   :  { %1576 = vmatmul.mubr.bf16.gmra.mxu1 %v8113_v63  ;;  %1876 = vmatmul.mubr.bf16.gmra.mxu0 %v8119_v58  ;;  %v8188_v63 = vld [vmem:[%s12456_s5 + $0xe8] sm:$0xff]   ;;  %v8190_v58 = vld [vmem:[%s12456_s5 + $0xe0] sm:$0xff]  }
 0x269   :  { %1740 = vmatpush1.bf16.msra.mxu1 %v10595_v62  ;;  %2040 = vmatpush1.bf16.msra.mxu0 %v10595_v62 }
 0x26a   :  { %1741 = vmatprep.subr.bf16.mxu1 %v13262_v21  ;;  %2041 = vmatprep.subr.bf16.mxu0 %v13262_v21 }
 0x26b   :  { %7088 = vmatprep.mubr.msk.bf16.mxu1 %vm1425_vm4, %v8114_v60  ;;  %7133 = vmatprep.mubr.msk.bf16.mxu0 %vm1425_vm4, %v8120_v31  ;;  %v8143_v60 = vld [vmem:[%s12455_s4 + $0x110] ss:$8 sps:$4 sm:$0xff]   ;;  %v8164_v31 = vld [vmem:[%s12455_s4 + $0x1a0] ss:$8 sps:$4 sm:$0xff]  }
 0x26d   :  { %1742 = vmatpush1.bf16.msra.mxu1 %v10603_v16  ;;  %2042 = vmatpush1.bf16.msra.mxu0 %v10603_v16 }
 0x26e   :  { %1743 = vmatprep.subr.bf16.mxu1 %v13262_v21  ;;  %2043 = vmatprep.subr.bf16.mxu0 %v13262_v21 }
 0x270   :  { %1584 = vmatmul.mubr.bf16.gmra.mxu1 %v8116_v35  ;;  %1884 = vmatmul.mubr.bf16.gmra.mxu0 %v8122_v37  ;;  %v8191_v35 = vld [vmem:[%s12456_s5 + $0xa0] sm:$0xff]   ;;  %v8192_v37 = vld [vmem:[%s12456_s5 + $0xd8] sm:$0xff]  }
 0x271   :  { %1744 = vmatpush1.bf16.msra.mxu1 %v10621_v29  ;;  %2044 = vmatpush1.bf16.msra.mxu0 %v10621_v29 }
 0x272   :  { %1745 = vmatprep.subr.bf16.mxu1 %v13262_v21  ;;  %2045 = vmatprep.subr.bf16.mxu0 %v13262_v21 }
 0x273   :  { %7116 = vmatprep.mubr.msk.bf16.mxu1 %vm1425_vm4, %v8125_v5  ;;  %7161 = vmatprep.mubr.msk.bf16.mxu0 %vm1425_vm4, %v8128_v20  ;;  %v8194_v5 = vld [vmem:[%s12456_s5 + $0xd0] sm:$0xff]   ;;  %v8196_v20 = vld [vmem:[%s12456_s5 + $0xc8] sm:$0xff]  }
 0x275   :  { %1746 = vmatpush1.bf16.msra.mxu1 %v10633_v56  ;;  %2046 = vmatpush1.bf16.msra.mxu0 %v10633_v56 }
 0x276   :  { %1747 = vmatprep.subr.bf16.mxu1 %v13262_v21  ;;  %2047 = vmatprep.subr.bf16.mxu0 %v13262_v21 }
 0x279   :  { %1748 = vmatpush1.bf16.msra.mxu1 %v10643_v33  ;;  %2048 = vmatpush1.bf16.msra.mxu0 %v10643_v33 }
 0x27a   :  { %1749 = vmatprep.subr.bf16.mxu1 %v13262_v21  ;;  %2049 = vmatprep.subr.bf16.mxu0 %v13262_v21 }
 0x27d   :  { %1750 = vmatpush1.bf16.msra.mxu1 %v10656_v3  ;;  %2050 = vmatpush1.bf16.msra.mxu0 %v10656_v3 }
 0x27e   :  { %1761 = vmatprep.subr.bf16.mxu1 %v13262_v21  ;;  %2061 = vmatprep.subr.bf16.mxu0 %v13262_v21 }
 0x281   :  { %1762 = vmatpush2.bf16.msra.mxu1 %v10664_v48  ;;  %2062 = vmatpush2.bf16.msra.mxu0 %v10664_v48 }
 0x282   :  { %1763 = vmatprep.subr.bf16.mxu1 %v13262_v21  ;;  %2063 = vmatprep.subr.bf16.mxu0 %v13262_v21 }
 0x285   :  { %1764 = vmatpush2.bf16.msra.mxu1 %v10670_v38  ;;  %2064 = vmatpush2.bf16.msra.mxu0 %v10670_v38 }
 0x286   :  { %1765 = vmatprep.subr.bf16.mxu1 %v13262_v21  ;;  %2065 = vmatprep.subr.bf16.mxu0 %v13262_v21 }
 0x289   :  { %1766 = vmatpush2.bf16.msra.mxu1 %v10676_v36  ;;  %2066 = vmatpush2.bf16.msra.mxu0 %v10676_v36 }
 0x28a   :  { %1935 = vmatprep.subr.bf16.mxu1 %v13262_v21  ;;  %2235 = vmatprep.subr.bf16.mxu0 %v13262_v21 }
 0x28c   :  { %1768 = vmatmul.mubr.bf16.vlgmr.msra.gmra.mxu1 %v8123_v55  ;;  %2068 = vmatmul.mubr.bf16.vlgmr.msra.gmra.mxu0 %v8126_v53  ;;  %v8198_v55 = vld [vmem:[%s12456_s5 + $0xc0] sm:$0xff]   ;;  %v8153_v53 = vld [vmem:[%s12455_s4 + $0x150] ss:$8 sps:$4 sm:$0xff]  }
 0x28d   :  { %1936 = vmatpush1.bf16.msra.mxu1 %v10573_v2  ;;  %2236 = vmatpush1.bf16.msra.mxu0 %v10573_v2 }
 0x28e   :  { %1937 = vmatprep.subr.bf16.mxu1 %v13262_v21  ;;  %2237 = vmatprep.subr.bf16.mxu0 %v13262_v21 }
 0x28f   :  { %7117 = vmatprep.mubr.msk.bf16.mxu1 %vm1425_vm4, %v8129_v4  ;;  %7162 = vmatprep.mubr.msk.bf16.mxu0 %vm1425_vm4, %v8144_v23  ;;  %v8170_v4 = vld [vmem:[%s12456_s5 + $0x70] sm:$0xff]   ;;  %v8172_v23 = vld [vmem:[%s12456_s5 + $0x68] sm:$0xff]  }
 0x291   :  { %1938 = vmatpush1.bf16.msra.mxu1 %v10581_v28  ;;  %2238 = vmatpush1.bf16.msra.mxu0 %v10581_v28 }
 0x292   :  { %1939 = vmatprep.subr.bf16.mxu1 %v13262_v21  ;;  %2239 = vmatprep.subr.bf16.mxu0 %v13262_v21 }
 0x294   :  { %1776 = vmatmul.mubr.bf16.gmra.mxu1 %v8131_v54  ;;  %2076 = vmatmul.mubr.bf16.gmra.mxu0 %v8146_v24  ;;  %v8161_v54 = vld [vmem:[%s12455_s4 + $0x160] ss:$8 sps:$4 sm:$0xff]   ;;  %v8165_v24 = vld [vmem:[%s12455_s4 + $0x174] ss:$8 sps:$4 sm:$0xff]  }
 0x295   :  { %1940 = vmatpush1.bf16.msra.mxu1 %v10595_v62  ;;  %2240 = vmatpush1.bf16.msra.mxu0 %v10595_v62 }
 0x296   :  { %1941 = vmatprep.subr.bf16.mxu1 %v13262_v21  ;;  %2241 = vmatprep.subr.bf16.mxu0 %v13262_v21 }
 0x297   :  { %7118 = vmatprep.mubr.msk.bf16.mxu1 %vm1425_vm4, %v8132_v1  ;;  %7163 = vmatprep.mubr.msk.bf16.mxu0 %vm1425_vm4, %v8147_v0  ;;  %v8173_v1 = vld [vmem:[%s12456_s5 + $0x28] sm:$0xff]   ;;  %v8174_v0 = vld [vmem:[%s12456_s5 + $0x60] sm:$0xff]  }
 0x299   :  { %1942 = vmatpush1.bf16.msra.mxu1 %v10603_v16  ;;  %2242 = vmatpush1.bf16.msra.mxu0 %v10603_v16 }
 0x29a   :  { %1943 = vmatprep.subr.bf16.mxu1 %v13262_v21  ;;  %2243 = vmatprep.subr.bf16.mxu0 %v13262_v21 }
 0x29c   :  { %1784 = vmatmul.mubr.bf16.gmra.mxu1 %v8134_v25  ;;  %2084 = vmatmul.mubr.bf16.gmra.mxu0 %v8149_v26  ;;  %v8175_v25 = vld [vmem:[%s12456_s5 + $0x20] sm:$0xff]   ;;  %v8176_v26 = vld [vmem:[%s12456_s5 + $0x58] sm:$0xff]  }
 0x29d   :  { %1944 = vmatpush1.bf16.msra.mxu1 %v10621_v29  ;;  %2244 = vmatpush1.bf16.msra.mxu0 %v10621_v29 }
 0x29e   :  { %1945 = vmatprep.subr.bf16.mxu1 %v13262_v21  ;;  %2245 = vmatprep.subr.bf16.mxu0 %v13262_v21 }
 0x29f   :  { %7146 = vmatprep.mubr.msk.bf16.mxu1 %vm1425_vm4, %v8137_v19  ;;  %7191 = vmatprep.mubr.msk.bf16.mxu0 %vm1425_vm4, %v8152_v51  ;;  %v8167_v19 = vld [vmem:[%s12455_s4 + $0x170] ss:$8 sps:$4 sm:$0xff]  }
 0x2a0   :  { %v8177_v51 = vld [vmem:[%s12456_s5 + $0x18] sm:$0xff]  }
 0x2a1   :  { %1946 = vmatpush1.bf16.msra.mxu1 %v10633_v56  ;;  %2246 = vmatpush1.bf16.msra.mxu0 %v10633_v56 }
 0x2a2   :  { %1947 = vmatprep.subr.bf16.mxu1 %v13262_v21  ;;  %2247 = vmatprep.subr.bf16.mxu0 %v13262_v21 }
 0x2a5   :  { %1948 = vmatpush1.bf16.msra.mxu1 %v10643_v33  ;;  %2248 = vmatpush1.bf16.msra.mxu0 %v10643_v33 }
 0x2a6   :  { %1949 = vmatprep.subr.bf16.mxu1 %v13262_v21  ;;  %2249 = vmatprep.subr.bf16.mxu0 %v13262_v21 }
 0x2a9   :  { %1950 = vmatpush1.bf16.msra.mxu1 %v10656_v3  ;;  %2250 = vmatpush1.bf16.msra.mxu0 %v10656_v3 }
 0x2aa   :  { %1961 = vmatprep.subr.bf16.mxu1 %v13262_v21  ;;  %2261 = vmatprep.subr.bf16.mxu0 %v13262_v21 }
 0x2ad   :  { %1962 = vmatpush2.bf16.msra.mxu1 %v10664_v48  ;;  %2262 = vmatpush2.bf16.msra.mxu0 %v10664_v48 }
 0x2ae   :  { %1963 = vmatprep.subr.bf16.mxu1 %v13262_v21  ;;  %2263 = vmatprep.subr.bf16.mxu0 %v13262_v21 }
 0x2b1   :  { %1964 = vmatpush2.bf16.msra.mxu1 %v10670_v38  ;;  %2264 = vmatpush2.bf16.msra.mxu0 %v10670_v38 }
 0x2b2   :  { %1965 = vmatprep.subr.bf16.mxu1 %v13262_v21  ;;  %2265 = vmatprep.subr.bf16.mxu0 %v13262_v21 }
 0x2b5   :  { %1966 = vmatpush2.bf16.msra.mxu1 %v10676_v36  ;;  %2266 = vmatpush2.bf16.msra.mxu0 %v10676_v36 }
 0x2b6   :  { %2135 = vmatprep.subr.bf16.mxu1 %v13262_v21  ;;  %7755 = vmatprep.subr.bf16.mxu0 %v8184_v57  ;;  %v8179_v57 = vld [vmem:[%s12456_s5 + $0x10] sm:$0xff]  }
 0x2b8   :  { %1968 = vmatmul.mubr.bf16.vlgmr.msra.gmra.mxu1 %v8135_v18  ;;  %2268 = vmatmul.mubr.bf16.vlgmr.msra.gmra.mxu0 %v8150_v50  ;;  %v8178_v18 = vld [vmem:[%s12456_s5 + $0x50] sm:$0xff]  }
 0x2b9   :  { %2136 = vmatpush1.bf16.msra.mxu1 %v10573_v2  ;;  %7147 = vmatprep.mubr.msk.bf16.mxu1 %vm1425_vm4, %v8138_v27  ;;  %v8141_v2 = vld [vmem:[%s12455_s4 + $0x114] ss:$8 sps:$4 sm:$0xff]  }
 0x2ba   :  { %2137 = vmatprep.subr.bf16.mxu1 %v13262_v21  ;;  %7192 = vmatprep.mubr.msk.bf16.mxu0 %vm1425_vm4, %v8156_v17 }
 0x2bb   :  { %7756 = vmatpush3.bf16.msra.mxu0 %v8185_v49  ;;  %v8180_v49 = vld [vmem:[%s12456_s5 + $0x48] sm:$0xff]  }
 0x2bc   :  { %7757 = vmatprep.subr.bf16.mxu0 %v8186_v30 }
 0x2bd   :  { %2138 = vmatpush1.bf16.msra.mxu1 %v10581_v28  ;;  %v8189_v28 = vld [vmem:[%s12456_s5 + $0xa8] sm:$0xff]  }
 0x2be   :  { %2139 = vmatprep.subr.bf16.mxu1 %v13262_v21 }
 0x2bf   :  { %7758 = vmatpush3.bf16.msra.mxu0 %v8187_v34 }
 0x2c0   :  { %1976 = vmatmul.mubr.bf16.gmra.mxu1 %v8140_v61  ;;  %2276 = vmatmul.mubr.bf16.gmra.mxu0 %v8158_v52  ;;  %v8181_v52 = vld [vmem:[%s12456_s5 + $0x8] sm:$0xff]  }
 0x2c1   :  { %2140 = vmatpush1.bf16.msra.mxu1 %v10595_v62  ;;  %7148 = vmatprep.mubr.msk.bf16.mxu1 %vm1425_vm4, %v8141_v2  ;;  %v8155_v62 = vld [vmem:[%s12455_s4 + $0x154] ss:$8 sps:$4 sm:$0xff]  }
 0x2c2   :  { %2141 = vmatprep.subr.bf16.mxu1 %v13262_v21  ;;  %7193 = vmatprep.mubr.msk.bf16.mxu0 %vm1425_vm4, %v8162_v22 }
 0x2c3   :  { %7759 = vmatprep.subr.bf16.mxu0 %v8188_v63  ;;  %v8182_v63 = vld [vmem:[%s12456_s5 + $0x40] sm:$0xff]  }
 0x2c4   :  { %7760 = vmatpush3.bf16.msra.mxu0 %v8189_v28 }
 0x2c5   :  { %2142 = vmatpush1.bf16.msra.mxu1 %v10603_v16  ;;  %7761 = vmatprep.subr.bf16.mxu0 %v8190_v58  ;;  %v8193_v16 = vld [vmem:[%s12456_s5 + $0x98] sm:$0xff]  }
 0x2c6   :  { %2143 = vmatprep.subr.bf16.mxu1 %v13262_v21 }
 0x2c8   :  { %1984 = vmatmul.mubr.bf16.gmra.mxu1 %v8143_v60  ;;  %2284 = vmatmul.mubr.bf16.gmra.mxu0 %v8164_v31  ;;  %v8183_v31 = vld [vmem:[%s12456_s5] sm:$0xff]  }
 0x2c9   :  { %2144 = vmatpush1.bf16.msra.mxu1 %v10621_v29  ;;  %7176 = vmatprep.mubr.msk.bf16.mxu1 %vm1425_vm4, %v8155_v62  ;;  %v8195_v29 = vld [vmem:[%s12456_s5 + $0x90] sm:$0xff]  }
 0x2ca   :  { %2145 = vmatprep.subr.bf16.mxu1 %v13262_v21  ;;  %7762 = vmatpush3.bf16.msra.mxu0 %v8191_v35 }
 0x2cb   :  { %7763 = vmatprep.subr.bf16.mxu0 %v8192_v37  ;;  %v8200_v37 = vld [vmem:[%s12456_s5 + $0x178] sm:$0xff]  }
 0x2cd   :  { %2146 = vmatpush1.bf16.msra.mxu1 %v10633_v56  ;;  %v8197_v56 = vld [vmem:[%s12456_s5 + $0x88] sm:$0xff]  }
 0x2ce   :  { %2147 = vmatprep.subr.bf16.mxu1 %v13262_v21  ;;  %7764 = vmatpush3.bf16.msra.mxu0 %v8193_v16 }
 0x2cf   :  { %7765 = vmatprep.subr.bf16.mxu0 %v8194_v5 }
 0x2d1   :  { %2148 = vmatpush1.bf16.msra.mxu1 %v10643_v33  ;;  %v8199_v33 = vld [vmem:[%s12456_s5 + $0x80] sm:$0xff]  }
 0x2d2   :  { %2149 = vmatprep.subr.bf16.mxu1 %v13262_v21  ;;  %7766 = vmatpush3.bf16.msra.mxu0 %v8195_v29 }
 0x2d3   :  { %7767 = vmatprep.subr.bf16.mxu0 %v8196_v20 }
 0x2d5   :  { %2150 = vmatpush1.bf16.msra.mxu1 %v10656_v3  ;;  %v8168_v3 = vld [vmem:[%s12456_s5 + $0x78] sm:$0xff]  }
 0x2d6   :  { %2161 = vmatprep.subr.bf16.mxu1 %v13262_v21  ;;  %7768 = vmatpush3.bf16.msra.mxu0 %v8197_v56 }
 0x2d7   :  { %7769 = vmatprep.subr.bf16.mxu0 %v8198_v55 }
 0x2d9   :  { %2162 = vmatpush2.bf16.msra.mxu1 %v10664_v48  ;;  %v8159_v48 = vld [vmem:[%s12455_s4 + $0x164] ss:$8 sps:$4 sm:$0xff]  }
 0x2da   :  { %2163 = vmatprep.subr.bf16.mxu1 %v13262_v21  ;;  %7770 = vmatpush3.bf16.msra.mxu0 %v8199_v33 }
 0x2dd   :  { %2164 = vmatpush2.bf16.msra.mxu1 %v10670_v38  ;;  %v8169_v38 = vld [vmem:[%s12456_s5 + $0x38] sm:$0xff]  }
 0x2de   :  { %2165 = vmatprep.subr.bf16.mxu1 %v13262_v21 }
 0x2e1   :  { %2166 = vmatpush2.bf16.msra.mxu1 %v10676_v36  ;;  %v8171_v36 = vld [vmem:[%s12456_s5 + $0x30] sm:$0xff]  }
 0x2e2   :  { %7721 = vmatprep.subr.bf16.mxu1 %v8168_v3 }
 0x2e4   :  { %2168 = vmatmul.mubr.bf16.vlgmr.msra.gmra.mxu1 %v8153_v53 }
 0x2e5   :  { %7177 = vmatprep.mubr.msk.bf16.mxu1 %vm1425_vm4, %v8159_v48  ;;  %7722 = vmatpush3.bf16.msra.mxu1 %v8169_v38 }
 0x2e6   :  { %7723 = vmatprep.subr.bf16.mxu1 %v8170_v4 }
 0x2e9   :  { %7724 = vmatpush3.bf16.msra.mxu1 %v8171_v36 }
 0x2ea   :  { %7725 = vmatprep.subr.bf16.mxu1 %v8172_v23 }
 0x2ec   :  { %2176 = vmatmul.mubr.bf16.gmra.mxu1 %v8161_v54  ;;  %v8217_v54 = vld [vmem:[%s12456_s5 + $0x1f8] sm:$0xff]  }
 0x2ed   :  { %7178 = vmatprep.mubr.msk.bf16.mxu1 %vm1425_vm4, %v8165_v24  ;;  %7726 = vmatpush3.bf16.msra.mxu1 %v8173_v1 }
 0x2ee   :  { %7727 = vmatprep.subr.bf16.mxu1 %v8174_v0  ;;  %7823 = vmatprep.subr.bf16.mxu0 %v8217_v54 }
 0x2f1   :  { %7728 = vmatpush3.bf16.msra.mxu1 %v8175_v25 }
 0x2f2   :  { %7729 = vmatprep.subr.bf16.mxu1 %v8176_v26 }
 0x2f4   :  { %v1469_v50 = vpop.f32.mrf.mxu1  ;;  %2184 = vmatmul.mubr.bf16.gmra.mxu1 %v8167_v19  ;;  %v11096_v27 = vpop.f32.mrf.mxu0 }
 0x2f5   :  { %7730 = vmatpush3.bf16.msra.mxu1 %v8177_v51 }
 0x2f6   :  { %v1471_v17 = vpop.f32.mrf.mxu1  ;;  %7731 = vmatprep.subr.bf16.mxu1 %v8178_v18  ;;  %v1671_v30 = vpop.f32.mrf.mxu0 }
 0x2f8   :  { %v1472_v34 = vpop.f32.mrf.mxu1  ;;  %v11104_v61 = vpop.f32.mrf.mxu0 }
 0x2f9   :  { %7732 = vmatpush3.bf16.msra.mxu1 %v8179_v57  ;;  %v2294_v2 = vpack.c.bf16 %v11104_v61, %v11096_v27  ;;  %v8201_v57 = vld [vmem:[%s12456_s5 + $0x138] sm:$0xff]   ;;  %v2292_v17 = vpack.c.bf16 %v1472_v34, %v1469_v50  ;;  %v8204_v50 = vld [vmem:[%s12456_s5 + $0x168] sm:$0xff]  }
 0x2fa   :  { %v1474_v22 = vpop.f32.mrf.mxu1  ;;  %7733 = vmatprep.subr.bf16.mxu1 %v8180_v49  ;;  %v1674_v28 = vpop.f32.mrf.mxu0  ;;  %v8224_v61 = vld [vmem:[%s12456_s5 + $0x1a8] sm:$0xff]  }
 0x2fb   :  { %v8203_v28 = vld [vmem:[%s12456_s5 + $0x130] sm:$0xff]  }
 0x2fc   :  { %v1477_v58 = vpop.f32.mrf.mxu1  ;;  %v11114_v60 = vpop.f32.mrf.mxu0 }
 0x2fd   :  { %7734 = vmatpush3.bf16.msra.mxu1 %v8181_v52  ;;  %v8202_v52 = vld [vmem:[%s12456_s5 + $0x170] sm:$0xff]  }
 0x2fe   :  { %v1479_v62 = vpop.f32.mrf.mxu1  ;;  %7735 = vmatprep.subr.bf16.mxu1 %v8182_v63  ;;  %v1679_v35 = vpop.f32.mrf.mxu0 }
 0x300   :  { %v1480_v16 = vpop.f32.mrf.mxu1  ;;  %v11122_v5 = vpop.f32.mrf.mxu0 }
 0x301   :  { %7736 = vmatpush3.bf16.msra.mxu1 %v8183_v31  ;;  %v2303_v29 = vpack.c.bf16 %v11122_v5, %v11114_v60  ;;  %v8230_v5 = vld [vmem:[%s12456_s5 + $0x198] sm:$0xff]  }
 0x302   :  { %v1482_v20 = vpop.f32.mrf.mxu1  ;;  %v1682_v56 = vpop.f32.mrf.mxu0  ;;  %7789 = vmatprep.subr.bf16.mxu1 %v8200_v37 }
 0x303   :  { %v8205_v20 = vld [vmem:[%s12456_s5 + $0x128] sm:$0xff]  }
 0x304   :  { %v11126_v55 = vpop.f32.mrf.mxu1  ;;  %v11128_v33 = vpop.f32.mrf.mxu0 }
 0x306   :  { %v1487_v3 = vpop.f32.mrf.mxu1  ;;  %v1687_v53 = vpop.f32.mrf.mxu0 }
 0x307   :  { %v2301_v3 = vpack.c.bf16 %v1480_v16, %v1477_v58  ;;  %v8208_v58 = vld [vmem:[%s12456_s5 + $0x158] sm:$0xff]  }
 0x308   :  { %v11130_v48 = vpop.f32.mrf.mxu1  ;;  %v11132_v38 = vpop.f32.mrf.mxu0 }
 0x309   :  { %v2312_v4 = vpack.c.bf16 %v11132_v38, %v11128_v33  ;;  %v8238_v33 = vld [vmem:[%s12456_s5 + $0x1c0] sm:$0xff]  }
 0x30a   :  { %v1490_v36 = vpop.f32.mrf.mxu1  ;;  %v1690_v23 = vpop.f32.mrf.mxu0  ;;  %v8239_v38 = vld [vmem:[%s12456_s5 + $0x180] sm:$0xff]  }
 0x30b   :  { %v8206_v36 = vld [vmem:[%s12456_s5 + $0x160] sm:$0xff]  }
 0x320   :  { %v1569_v24 = vpop.f32.mrf.mxu1  ;;  %v11139_v1 = vpop.f32.mrf.mxu0 }
 0x322   :  { %v1571_v0 = vpop.f32.mrf.mxu1  ;;  %v1871_v25 = vpop.f32.mrf.mxu0 }
 0x323   :  { %v8207_v0 = vld [vmem:[%s12456_s5 + $0x120] sm:$0xff]  }
 0x324   :  { %v1572_v26 = vpop.f32.mrf.mxu1  ;;  %v11141_v19 = vpop.f32.mrf.mxu0 }
 0x325   :  { %v2293_v51 = vpack.c.bf16 %v1572_v26, %v1569_v24  ;;  %v2296_v18 = vpack.c.bf16 %v11141_v19, %v11139_v1 }
 0x326   :  { %v1574_v49 = vpop.f32.mrf.mxu1  ;;  %v1874_v30 = vpop.f32.mrf.mxu0 }
 0x327   :  { %2927 = vmatprep.mubr.bf16.mxu1 %v2293_v51  ;;  %v2310_v30 = vpack.c.bf16 %v11130_v48, %v11126_v55  ;;  %v8213_v55 = vld [vmem:[%s12456_s5 + $0x108] sm:$0xff]   ;;  %v8214_v48 = vld [vmem:[%s12456_s5 + $0x140] sm:$0xff]  }
 0x328   :  { %v1577_v22 = vpop.f32.mrf.mxu1  ;;  %2928 = vmatmul.mubr.bf16.vlgmr.msra.gmra.mxu1 %v2292_v17  ;;  %v11151_v63 = vpop.f32.mrf.mxu0  ;;  %v8209_v17 = vld [vmem:[%s12456_s5 + $0x118] sm:$0xff]  }
 0x329   :  { %7790 = vmatpush3.bf16.msra.mxu1 %v8201_v57 }
 0x32a   :  { %v1579_v31 = vpop.f32.mrf.mxu1  ;;  %7791 = vmatprep.subr.bf16.mxu1 %v8202_v52  ;;  %v1879_v34 = vpop.f32.mrf.mxu0 }
 0x32b   :  { %v8211_v31 = vld [vmem:[%s12456_s5 + $0x110] sm:$0xff]   ;;  %v8215_v34 = vld [vmem:[%s12456_s5 + $0x100] sm:$0xff]  }
 0x32c   :  { %v1580_v62 = vpop.f32.mrf.mxu1  ;;  %v11159_v35 = vpop.f32.mrf.mxu0 }
 0x32d   :  { %v2302_v37 = vpack.c.bf16 %v1580_v62, %v1577_v22  ;;  %7792 = vmatpush3.bf16.msra.mxu1 %v8203_v28  ;;  %v2305_v56 = vpack.c.bf16 %v11159_v35, %v11151_v63  ;;  %v8210_v22 = vld [vmem:[%s12456_s5 + $0x150] sm:$0xff]   ;;  %v13263_v62 = vmov 0.0  }
 0x32e   :  { %v1582_v53 = vpop.f32.mrf.mxu1  ;;  %7793 = vmatprep.subr.bf16.mxu1 %v8204_v50  ;;  %v1882_v23 = vpop.f32.mrf.mxu0  ;;  %v8212_v50 = vld [vmem:[%s12456_s5 + $0x148] sm:$0xff]  }
 0x32f   :  { %2935 = vmatprep.mubr.bf16.mxu1 %v2302_v37 }
 0x330   :  { %v1585_v54 = vpop.f32.mrf.mxu1  ;;  %2936 = vmatmul.mubr.bf16.gmra.mxu1 %v2301_v3  ;;  %v11169_v24 = vpop.f32.mrf.mxu0 }
 0x331   :  { %7794 = vmatpush3.bf16.msra.mxu1 %v8205_v20 }
 0x332   :  { %v1587_v25 = vpop.f32.mrf.mxu1  ;;  %7795 = vmatprep.subr.bf16.mxu1 %v8206_v36  ;;  %v1887_v16 = vpop.f32.mrf.mxu0 }
 0x333   :  { %v8218_v25 = vld [vmem:[%s12456_s5 + $0x1b8] sm:$0xff]  }
 0x334   :  { %v1588_v26 = vpop.f32.mrf.mxu1  ;;  %v11177_v51 = vpop.f32.mrf.mxu0 }
 0x335   :  { %v2311_v57 = vpack.c.bf16 %v1588_v26, %v1585_v54  ;;  %7796 = vmatpush3.bf16.msra.mxu1 %v8207_v0  ;;  %v2314_v49 = vpack.c.bf16 %v11177_v51, %v11169_v24  ;;  %v8220_v26 = vld [vmem:[%s12456_s5 + $0x1f0] sm:$0xff]   ;;  %v8237_v24 = vld [vmem:[%s12456_s5 + $0x200] sm:$0xff]  }
 0x336   :  { %v1590_v52 = vpop.f32.mrf.mxu1  ;;  %7797 = vmatprep.subr.bf16.mxu1 %v8208_v58  ;;  %v1890_v28 = vpop.f32.mrf.mxu0 }
 0x337   :  { %2943 = vmatprep.mubr.bf16.mxu1 %v2311_v57  ;;  %v8223_v28 = vld [vmem:[%s12456_s5 + $0x1e8] sm:$0xff]  }
 0x338   :  { %2944 = vmatmul.mubr.bf16.gmra.mxu1 %v2310_v30  ;;  %v8221_v30 = vld [vmem:[%s12456_s5 + $0x1b0] sm:$0xff]  }
 0x339   :  { %7798 = vmatpush3.bf16.msra.mxu1 %v8209_v17 }
 0x33a   :  { %7799 = vmatprep.subr.bf16.mxu1 %v8210_v22 }
 0x33d   :  { %7800 = vmatpush3.bf16.msra.mxu1 %v8211_v31 }
 0x33e   :  { %7801 = vmatprep.subr.bf16.mxu1 %v8212_v50 }
 0x341   :  { %7802 = vmatpush3.bf16.msra.mxu1 %v8213_v55 }
 0x342   :  { %7803 = vmatprep.subr.bf16.mxu1 %v8214_v48 }
 0x345   :  { %7804 = vmatpush3.bf16.msra.mxu1 %v8215_v34  ;;  %v8226_v34 = vld [vmem:[%s12456_s5 + $0x1e0] sm:$0xff]  }
 0x346   :  { %7950 = vmatprep.subr.bf16.mxu1 %v13263_v62 }
 0x34c   :  { %v1769_v37 = vpop.f32.mrf.mxu1  ;;  %v11205_v20 = vpop.f32.mrf.mxu0 }
 0x34e   :  { %v1771_v3 = vpop.f32.mrf.mxu1  ;;  %v2071_v53 = vpop.f32.mrf.mxu0 }
 0x34f   :  { %v8227_v53 = vld [vmem:[%s12456_s5 + $0x1a0] sm:$0xff]  }
 0x350   :  { %v1772_v36 = vpop.f32.mrf.mxu1  ;;  %v11207_v23 = vpop.f32.mrf.mxu0 }
 0x351   :  { %v2295_v54 = vpack.c.bf16 %v1772_v36, %v1769_v37  ;;  %v2298_v0 = vpack.c.bf16 %v11207_v23, %v11205_v20 }
 0x352   :  { %v1774_v58 = vpop.f32.mrf.mxu1  ;;  %v2074_v16 = vpop.f32.mrf.mxu0 }
 0x353   :  { %2984 = vmatprep.mubr.bf16.mxu0 %v2295_v54 }
 0x354   :  { %v1777_v57 = vpop.f32.mrf.mxu1  ;;  %2985 = vmatmul.mubr.bf16.vlgmr.msra.gmra.mxu0 %v2294_v2  ;;  %v11220_v17 = vpop.f32.mrf.mxu0 }
 0x355   :  { %7824 = vmatpush3.bf16.msra.mxu0 %v8218_v25  ;;  %v8229_v25 = vld [vmem:[%s12456_s5 + $0x1d8] sm:$0xff]  }
 0x356   :  { %v1779_v52 = vpop.f32.mrf.mxu1  ;;  %7825 = vmatprep.subr.bf16.mxu0 %v8220_v26  ;;  %v2079_v22 = vpop.f32.mrf.mxu0 }
 0x357   :  { %v8233_v52 = vld [vmem:[%s12456_s5 + $0x190] sm:$0xff]   ;;  %v8235_v22 = vld [vmem:[%s12456_s5 + $0x1c8] sm:$0xff]  }
 0x358   :  { %v1780_v31 = vpop.f32.mrf.mxu1  ;;  %v11228_v50 = vpop.f32.mrf.mxu0 }
 0x359   :  { %v2304_v55 = vpack.c.bf16 %v1780_v31, %v1777_v57  ;;  %7826 = vmatpush3.bf16.msra.mxu0 %v8221_v30  ;;  %v2307_v27 = vpack.c.bf16 %v11228_v50, %v11220_v17  ;;  %v8232_v30 = vld [vmem:[%s12456_s5 + $0x1d0] sm:$0xff]  }
 0x35a   :  { %v1782_v2 = vpop.f32.mrf.mxu1  ;;  %7827 = vmatprep.subr.bf16.mxu0 %v8223_v28  ;;  %v2082_v48 = vpop.f32.mrf.mxu0  ;;  %v8236_v28 = vld [vmem:[%s12456_s5 + $0x188] sm:$0xff]  }
 0x35b   :  { %2992 = vmatprep.mubr.bf16.mxu0 %v2304_v55 }
 0x35c   :  { %v1785_v37 = vpop.f32.mrf.mxu1  ;;  %2993 = vmatmul.mubr.bf16.gmra.mxu0 %v2303_v29  ;;  %v11241_v3 = vpop.f32.mrf.mxu0 }
 0x35d   :  { %7828 = vmatpush3.bf16.msra.mxu0 %v8224_v61 }
 0x35e   :  { %v1787_v36 = vpop.f32.mrf.mxu1  ;;  %7829 = vmatprep.subr.bf16.mxu0 %v8226_v34  ;;  %v2087_v54 = vpop.f32.mrf.mxu0 }
 0x360   :  { %v1788_v58 = vpop.f32.mrf.mxu1  ;;  %v11249_v16 = vpop.f32.mrf.mxu0 }
 0x361   :  { %v2313_v26 = vpack.c.bf16 %v1788_v58, %v1785_v37  ;;  %7830 = vmatpush3.bf16.msra.mxu0 %v8227_v53  ;;  %v2316_v60 = vpack.c.bf16 %v11249_v16, %v11241_v3  ;;  %v8216_v37 = vld [vmem:[%s12456_s5 + $0x238] sm:$0xff]   ;;  %v8219_v58 = vld [vmem:[%s12456_s5 + $0x230] sm:$0xff]  }
 0x362   :  { %v1790_v29 = vpop.f32.mrf.mxu1  ;;  %7831 = vmatprep.subr.bf16.mxu0 %v8229_v25  ;;  %v2090_v57 = vpop.f32.mrf.mxu0 }
 0x363   :  { %3000 = vmatprep.mubr.bf16.mxu0 %v2313_v26 }
 0x364   :  { %3001 = vmatmul.mubr.bf16.gmra.mxu0 %v2312_v4 }
 0x365   :  { %7832 = vmatpush3.bf16.msra.mxu0 %v8230_v5 }
 0x366   :  { %7833 = vmatprep.subr.bf16.mxu0 %v8232_v30 }
 0x369   :  { %7834 = vmatpush3.bf16.msra.mxu0 %v8233_v52  ;;  %v8222_v52 = vld [vmem:[%s12456_s5 + $0x228] sm:$0xff]  }
 0x36a   :  { %7835 = vmatprep.subr.bf16.mxu0 %v8235_v22 }
 0x36d   :  { %7836 = vmatpush3.bf16.msra.mxu0 %v8236_v28  ;;  %v8225_v28 = vld [vmem:[%s12456_s5 + $0x220] sm:$0xff]  }
 0x36e   :  { %7837 = vmatprep.subr.bf16.mxu0 %v8238_v33 }
 0x371   :  { %7838 = vmatpush3.bf16.msra.mxu0 %v8239_v38 }
 0x372   :  { %7978 = vmatprep.subr.bf16.mxu0 %v13263_v62 }
 0x378   :  { %v1969_v4 = vpop.f32.mrf.mxu1  ;;  %v2269_v31 = vpop.f32.mrf.mxu0 }
 0x37a   :  { %v1971_v55 = vpop.f32.mrf.mxu1  ;;  %v2271_v61 = vpop.f32.mrf.mxu0 }
 0x37c   :  { %v1972_v2 = vpop.f32.mrf.mxu1  ;;  %v2272_v48 = vpop.f32.mrf.mxu0 }
 0x37d   :  { %v2297_v34 = vpack.c.bf16 %v1972_v2, %v1969_v4  ;;  %v8228_v2 = vld [vmem:[%s12456_s5 + $0x218] sm:$0xff]   ;;  %v2300_v51 = vpack.c.bf16 %v2272_v48, %v2269_v31 }
 0x37e   :  { %v1974_v53 = vpop.f32.mrf.mxu1  ;;  %v2274_v36 = vpop.f32.mrf.mxu0 }
 0x37f   :  { %3041 = vmatprep.mubr.bf16.mxu1 %v2297_v34  ;;  %v8234_v34 = vld [vmem:[%s12456_s5 + $0x208] sm:$0xff]  }
 0x380   :  { %v1977_v54 = vpop.f32.mrf.mxu1  ;;  %3042 = vmatmul.mubr.bf16.vlgmr.msra.gmra.mxu1 %v2296_v18  ;;  %v2277_v25 = vpop.f32.mrf.mxu0 }
 0x381   :  { %7951 = vmatpush3.bf16.msra.mxu1 %v8216_v37 }
 0x382   :  { %v1979_v26 = vpop.f32.mrf.mxu1  ;;  %7952 = vmatprep.subr.bf16.mxu1 %v13263_v62  ;;  %v2279_v5 = vpop.f32.mrf.mxu0 }
 0x384   :  { %v1980_v29 = vpop.f32.mrf.mxu1  ;;  %v2280_v57 = vpop.f32.mrf.mxu0 }
 0x385   :  { %v2306_v30 = vpack.c.bf16 %v1980_v29, %v1977_v54  ;;  %7953 = vmatpush3.bf16.msra.mxu1 %v8219_v58  ;;  %v2309_v37 = vpack.c.bf16 %v2280_v57, %v2277_v25 }
 0x386   :  { %v1982_v1 = vpop.f32.mrf.mxu1  ;;  %7954 = vmatprep.subr.bf16.mxu1 %v13263_v62  ;;  %v2282_v19 = vpop.f32.mrf.mxu0 }
 0x387   :  { %3049 = vmatprep.mubr.bf16.mxu1 %v2306_v30 }
 0x388   :  { %v1985_v18 = vpop.f32.mrf.mxu1  ;;  %3050 = vmatmul.mubr.bf16.gmra.mxu1 %v2305_v56  ;;  %v2285_v22 = vpop.f32.mrf.mxu0  ;;  %v8231_v56 = vld [vmem:[%s12456_s5 + $0x210] sm:$0xff]  }
 0x389   :  { %7955 = vmatpush3.bf16.msra.mxu1 %v8222_v52 }
 0x38a   :  { %v1987_v33 = vpop.f32.mrf.mxu1  ;;  %7956 = vmatprep.subr.bf16.mxu1 %v13263_v62  ;;  %v2287_v38 = vpop.f32.mrf.mxu0 }
 0x38c   :  { %v1988_v4 = vpop.f32.mrf.mxu1  ;;  %v2288_v55 = vpop.f32.mrf.mxu0 }
 0x38d   :  { %v2315_v61 = vpack.c.bf16 %v1988_v4, %v1985_v18  ;;  %7957 = vmatpush3.bf16.msra.mxu1 %v8225_v28  ;;  %v2318_v31 = vpack.c.bf16 %v2288_v55, %v2285_v22 }
 0x38e   :  { %7958 = vmatprep.subr.bf16.mxu1 %v13263_v62  ;;  %v1990_v63 = vpop.f32.mrf.mxu1  ;;  %v2290_v35 = vpop.f32.mrf.mxu0 }
 0x38f   :  { %3057 = vmatprep.mubr.bf16.mxu1 %v2315_v61 }
 0x390   :  { %3058 = vmatmul.mubr.bf16.gmra.mxu1 %v2314_v49 }
 0x391   :  { %7959 = vmatpush3.bf16.msra.mxu1 %v8228_v2  ;;  %7966 = vmatprep.mubr.msk.bf16.mxu1 %vm8263_vm2, %v13263_v62 }
 0x392   :  { %7960 = vmatprep.subr.bf16.mxu1 %v13263_v62 }
 0x395   :  { %7961 = vmatpush3.bf16.msra.mxu1 %v8231_v56 }
 0x396   :  { %7962 = vmatprep.subr.bf16.mxu1 %v13263_v62 }
 0x399   :  { %7963 = vmatpush3.bf16.msra.mxu1 %v8234_v34 }
 0x39a   :  { %7964 = vmatprep.subr.bf16.mxu1 %v13263_v62 }
 0x39d   :  { %7965 = vmatpush3.bf16.msra.mxu1 %v8237_v24 }
 0x39e   :  { %8028 = vmatprep.subr.bf16.mxu1 %v13263_v62 }
 0x3a0   :  { %7967 = vmatmul.mubr.bf16.vlgmr.msra.gmra.mxu1 %v2300_v51 }
 0x3a1   :  { %7970 = vmatprep.mubr.msk.bf16.mxu1 %vm8263_vm2, %v13263_v62 }
 0x3a4   :  { %v2169_v49 = vpop.f32.mrf.mxu1 }
 0x3a6   :  { %v2171_v53 = vpop.f32.mrf.mxu1 }
 0x3a8   :  { %v2172_v36 = vpop.f32.mrf.mxu1  ;;  %7971 = vmatmul.mubr.bf16.gmra.mxu1 %v2309_v37 }
 0x3a9   :  { %v2299_v54 = vpack.c.bf16 %v2172_v36, %v2169_v49  ;;  %7974 = vmatprep.mubr.msk.bf16.mxu1 %vm8263_vm2, %v13263_v62 }
 0x3aa   :  { %v2174_v58 = vpop.f32.mrf.mxu1 }
 0x3ab   :  { %3098 = vmatprep.mubr.bf16.mxu0 %v2299_v54 }
 0x3ac   :  { %v2177_v26 = vpop.f32.mrf.mxu1  ;;  %3099 = vmatmul.mubr.bf16.vlgmr.msra.gmra.mxu0 %v2298_v0 }
 0x3ae   :  { %v2179_v48 = vpop.f32.mrf.mxu1 }
 0x3b0   :  { %v2180_v5 = vpop.f32.mrf.mxu1  ;;  %7975 = vmatmul.mubr.bf16.gmra.mxu1 %v2318_v31 }
 0x3b1   :  { %v2308_v29 = vpack.c.bf16 %v2180_v5, %v2177_v26  ;;  %8034 = vmatprep.mubr.msk.bf16.mxu1 %vm8263_vm2, %v13263_v62 }
 0x3b2   :  { %v2182_v25 = vpop.f32.mrf.mxu1 }
 0x3b3   :  { %3106 = vmatprep.mubr.bf16.mxu0 %v2308_v29 }
 0x3b4   :  { %v2185_v57 = vpop.f32.mrf.mxu1  ;;  %3107 = vmatmul.mubr.bf16.gmra.mxu0 %v2307_v27 }
 0x3b6   :  { %v2187_v30 = vpop.f32.mrf.mxu1 }
 0x3b8   :  { %v2188_v52 = vpop.f32.mrf.mxu1 }
 0x3b9   :  { %v2317_v1 = vpack.c.bf16 %v2188_v52, %v2185_v57 }
 0x3ba   :  { %v2190_v20 = vpop.f32.mrf.mxu1 }
 0x3bb   :  { %3114 = vmatprep.mubr.bf16.mxu0 %v2317_v1 }
 0x3bc   :  { %3115 = vmatmul.mubr.bf16.gmra.mxu0 %v2316_v60 }
 0x3bd   :  { %7984 = vmatprep.mubr.msk.bf16.mxu0 %vm8263_vm2, %v13263_v62 }
 0x3e8   :  { %v7737_v23 = vpop.f32.mrf.mxu1 }
 0x3ea   :  { %v7738_v0 = vpop.f32.mrf.mxu1 }
 0x3eb   :  { %v7739_v19 = vadd.f32 %v7738_v0, %v7737_v23 }
 0x3ec   :  { %v7740_v18 = vpop.f32.mrf.mxu1 }
 0x3ee   :  { %v7741_v22 = vpop.f32.mrf.mxu1 }
 0x3ef   :  { %v7742_v28 = vadd.f32 %v7741_v22, %v7740_v18 }
 0x3f0   :  { %v7743_v17 = vpop.f32.mrf.mxu1 }
 0x3f2   :  { %v7744_v50 = vpop.f32.mrf.mxu1 }
 0x3f3   :  { %v7745_v27 = vadd.f32 %v7744_v50, %v7743_v17 }
 0x3f4   :  { %v11338_v33 = vpop.f32.mrf.mxu1 }
 0x3f6   :  { %v7747_v38 = vpop.f32.mrf.mxu1 }
 0x3f8   :  { %v11340_v4 = vpop.f32.mrf.mxu1 }
 0x3fa   :  { %v11342_v55 = vpop.f32.mrf.mxu1 }
 0x3fc   :  { %v11344_v3 = vpop.f32.mrf.mxu1 }
 0x3fe   :  { %v11346_v16 = vpop.f32.mrf.mxu1 }
 0x414   :  { %v7771_v60 = vpop.f32.mrf.mxu0 }
 0x416   :  { %v7772_v2 = vpop.f32.mrf.mxu0 }
 0x417   :  { %v7773_v18 = vadd.f32 %v7772_v2, %v7771_v60 }
 0x418   :  { %v7774_v56 = vpop.f32.mrf.mxu0 }
 0x419   :  { %v2987_v39 = vadd.f32 %v7773_v18, %v7739_v19 }
 0x41a   :  { %v7775_v51 = vpop.f32.mrf.mxu0 }
 0x41b   :  { %v7776_v6 = vadd.f32 %v7775_v51, %v7774_v56 }
 0x41c   :  { %v7777_v53 = vpop.f32.mrf.mxu0 }
 0x41e   :  { %v7778_v54 = vpop.f32.mrf.mxu0 }
 0x41f   :  { %v7779_v10 = vadd.f32 %v7778_v54, %v7777_v53 }
 0x420   :  { %v7780_v26 = vpop.f32.mrf.mxu0 }
 0x421   :  { %v2995_v19 = vadd.f32 %v7779_v10, %v7745_v27 }
 0x422   :  { %v7781_v48 = vpop.f32.mrf.mxu0 }
 0x424   :  { %v7783_v29 = vpop.f32.mrf.mxu0 }
 0x426   :  { %v7784_v30 = vpop.f32.mrf.mxu0 }
 0x428   :  { %v7786_v20 = vpop.f32.mrf.mxu0 }
 0x42a   :  { %v7787_v22 = vpop.f32.mrf.mxu0 }
 0x42b   :  { %v7788_v54 = vadd.f32 %v7787_v22, %v7786_v20 }
 0x440   :  { %v7805_v61 = vpop.f32.mrf.mxu1 }
 0x442   :  { %v7806_v63 = vpop.f32.mrf.mxu1 }
 0x443   :  { %v7807_v50 = vadd.f32 %v7806_v63, %v7805_v61  ;;  %v7782_v61 = vadd.f32 %v7781_v48, %v7780_v26 }
 0x444   :  { %v7808_v35 = vpop.f32.mrf.mxu1 }
 0x445   :  { %v3044_v41 = vadd.f32 %v7807_v50, %v2987_v39  ;;  %v7748_v39 = vadd.f32 %v7747_v38, %v11338_v33  ;;  %v7751_v33 = vadd.f32 %v11342_v55, %v11340_v4 }
 0x446   :  { %v7809_v34 = vpop.f32.mrf.mxu1 }
 0x447   :  { %v7810_v8 = vadd.f32 %v7809_v34, %v7808_v35 }
 0x448   :  { %v7811_v24 = vpop.f32.mrf.mxu1 }
 0x44a   :  { %v7812_v49 = vpop.f32.mrf.mxu1 }
 0x44b   :  { %v7813_v2 = vadd.f32 %v7812_v49, %v7811_v24 }
 0x44c   :  { %v7814_v37 = vpop.f32.mrf.mxu1 }
 0x44d   :  { %v3052_v35 = vadd.f32 %v7813_v2, %v2995_v19 }
 0x44e   :  { %v7815_v36 = vpop.f32.mrf.mxu1 }
 0x450   :  { %v7817_v58 = vpop.f32.mrf.mxu1 }
 0x452   :  { %v7818_v31 = vpop.f32.mrf.mxu1 }
 0x453   :  { %v7819_v38 = vadd.f32 %v7818_v31, %v7817_v58 }
 0x454   :  { %v11348_v5 = vpop.f32.mrf.mxu1 }
 0x456   :  { %v11350_v25 = vpop.f32.mrf.mxu1 }
 0x457   :  { %v7822_v4 = vadd.f32 %v11350_v25, %v11348_v5 }
 0x460   :  { %v3157_v57 = vpop.f32.mrf.mxu1 }
 0x462   :  { %v7968_v52 = vpop.f32.mrf.mxu1 }
 0x463   :  { %v2990_v52 = vadd.f32 %v7776_v6, %v7742_v28  ;;  %v7816_v6 = vadd.f32 %v7815_v36, %v7814_v37 }
 0x464   :  { %v3160_v1 = vpop.f32.mrf.mxu1 }
 0x465   :  { %v3047_v60 = vadd.f32 %v7810_v8, %v2990_v52  ;;  %v7785_v8 = vadd.f32 %v7784_v30, %v7783_v29 }
 0x466   :  { %v7969_v23 = vpop.f32.mrf.mxu1 }
 0x467   :  { %v3003_v53 = vadd.f32 %v7785_v8, %v7751_v33 }
 0x468   :  { %v3165_v0 = vpop.f32.mrf.mxu1 }
 0x469   :  { %v3060_v30 = vadd.f32 %v7819_v38, %v3003_v53 }
 0x46a   :  { %v7972_v17 = vpop.f32.mrf.mxu1 }
 0x46c   :  { %v7839_v32 = vpop.f32.mrf.mxu0  ;;  %v3168_v21 = vpop.f32.mrf.mxu1 }
 0x46e   :  { %v7840_v7 = vpop.f32.mrf.mxu0  ;;  %v7973_v40 = vpop.f32.mrf.mxu1 }
 0x46f   :  { %v7841_v9 = vadd.f32 %v7840_v7, %v7839_v32 }
 0x470   :  { %v7842_v42 = vpop.f32.mrf.mxu0  ;;  %v3173_v43 = vpop.f32.mrf.mxu1 }
 0x471   :  { %v3101_v11 = vadd.f32 %v7841_v9, %v3044_v41  ;;  %v2998_v41 = vadd.f32 %v7782_v61, %v7748_v39 }
 0x472   :  { %v7843_v23 = vpop.f32.mrf.mxu0  ;;  %v7976_v44 = vpop.f32.mrf.mxu1 }
 0x473   :  { %v7844_v17 = vadd.f32 %v7843_v23, %v7842_v42  ;;  %v11352_v56 = vadd.f32 %v3157_v57, %v3101_v11  ;;  %v3055_v24 = vadd.f32 %v7816_v6, %v2998_v41  ;;  %v7754_v57 = vadd.f32 %v11346_v16, %v11344_v3 }
 0x474   :  { %v7845_v63 = vpop.f32.mrf.mxu0  ;;  %v3176_v45 = vpop.f32.mrf.mxu1 }
 0x475   :  { %v3104_v40 = vadd.f32 %v7844_v17, %v3047_v60  ;;  %v3192_v42 = vmul.f32 %v11352_v56, %v11352_v56 }
 0x476   :  { %v7846_v7 = vpop.f32.mrf.mxu0  ;;  %v7977_v32 = vpop.f32.mrf.mxu1 }
 0x477   :  { %v11355_v28 = vadd.f32 %v3160_v1, %v3104_v40  ;;  %v7847_v9 = vadd.f32 %v7846_v7, %v7845_v63 }
 0x478   :  { %v7848_v44 = vpop.f32.mrf.mxu0 }
 0x479   :  { %v3180_v10 = vadd.f32 %v11355_v28, %v11352_v56  ;;  %v3193_v11 = vmul.f32 %v11355_v28, %v11355_v28  ;;  %v3109_v27 = vadd.f32 %v7847_v9, %v3052_v35 }
 0x47a   :  { %v7849_v34 = vpop.f32.mrf.mxu0 }
 0x47b   :  { %v3198_v51 = vadd.f32 %v3193_v11, %v3192_v42  ;;  %v3166_v49 = vadd.f32 %v3165_v0, %v3109_v27  ;;  %v7850_v37 = vadd.f32 %v7849_v34, %v7848_v44  ;;  %v3006_v0 = vadd.f32 %v7788_v54, %v7754_v57  ;;  %v3215_v34 = vld [vmem:[%s12457_s6] sm:$0x1] }
 0x47c   :  { %v7851_v36 = vpop.f32.mrf.mxu0 }
 0x47d   :  { %v3181_v26 = vadd.f32 %v3180_v10, %v3166_v49  ;;  %v3194_v48 = vmul.f32 %v3166_v49, %v3166_v49  ;;  %v3112_v29 = vadd.f32 %v7850_v37, %v3055_v24  ;;  %v3063_v22 = vadd.f32 %v7822_v4, %v3006_v0  ;;  %v3217_v37 = vld [vmem:[%s12458_s7] sm:$0x1] }
 0x47e   :  { %v7852_v1 = vpop.f32.mrf.mxu0 }
 0x47f   :  { %v3199_v55 = vadd.f32 %v3198_v51, %v3194_v48  ;;  %v3169_v58 = vadd.f32 %v3168_v21, %v3112_v29  ;;  %v7853_v31 = vadd.f32 %v7852_v1, %v7851_v36 }
 0x480   :  { %v7854_v18 = vpop.f32.mrf.mxu0 }
 0x481   :  { %v3182_v50 = vadd.f32 %v3181_v26, %v3169_v58  ;;  %v3195_v52 = vmul.f32 %v3169_v58, %v3169_v58  ;;  %v3117_v23 = vadd.f32 %v7853_v31, %v3060_v30 }
 0x482   :  { %v7855_v20 = vpop.f32.mrf.mxu0 }
 0x483   :  { %v3200_v60 = vadd.f32 %v3199_v55, %v3195_v52  ;;  %v3174_v2 = vadd.f32 %v3173_v43, %v3117_v23  ;;  %v7856_v17 = vadd.f32 %v7855_v20, %v7854_v18 }
 0x485   :  { %v3196_v61 = vmul.f32 %v3174_v2, %v3174_v2  ;;  %v3120_v3 = vadd.f32 %v7856_v17, %v3063_v22  ;;  %v3183_v16 = vadd.f32 %v3182_v50, %v3174_v2 }
 0x487   :  { %v3177_v63 = vadd.f32 %v3176_v45, %v3120_v3  ;;  %v3201_v19 = vadd.f32 %v3200_v60, %v3196_v61 }
 0x489   :  { %v3184_v40 = vadd.f32 %v3183_v16, %v3177_v63  ;;  %v3197_v5 = vmul.f32 %v3177_v63, %v3177_v63 }
 0x48b   :  { %v3185_v25 = vrot.slane %v3184_v40, 4  ;;  %v3202_v21 = vadd.f32 %v3201_v19, %v3197_v5  ;;  %v8241_v5 = vld [vmem:[%s12459_s8 + $0x28] sm:$0xff]  }
 0x48d   :  { %v3186_v39 = vadd.f32 %v3185_v25, %v3184_v40  ;;  %v3203_v7 = vrot.slane %v3202_v21, 4  ;;  %v8240_v40 = vld [vmem:[%s12459_s8] sm:$0xff]   ;;  %v8242_v25 = vld [vmem:[%s12459_s8 + $0x8] sm:$0xff]  }
 0x48f   :  { %v3187_v32 = vrot.slane %v3186_v39, 2  ;;  %v3204_v35 = vadd.f32 %v3203_v7, %v3202_v21  ;;  %v8247_v21 = vld [vmem:[%s12459_s8 + $0x38] sm:$0xff]  }
 0x490   :  { %v8244_v7 = vld [vmem:[%s12459_s8 + $0x18] sm:$0xff]  }
 0x491   :  { %v3188_v6 = vadd.f32 %v3187_v32, %v3186_v39  ;;  %v3205_v9 = vrot.slane %v3204_v35, 2  ;;  %v8243_v39 = vld [vmem:[%s12459_s8 + $0x10] sm:$0xff]   ;;  %v8245_v32 = vld [vmem:[%s12459_s8 + $0x20] sm:$0xff]  }
 0x493   :  { %v3189_v41 = vrot.slane %v3188_v6, 1  ;;  %v3206_v8 = vadd.f32 %v3205_v9, %v3204_v35  ;;  %v8246_v35 = vld [vmem:[%s12459_s8 + $0x30] sm:$0xff]  }
 0x495   :  { %v3190_v44 = vadd.f32 %v3189_v41, %v3188_v6  ;;  %v3207_v43 = vrot.slane %v3206_v8, 1  ;;  %v8248_v6 = vld [vmem:[%s12459_s8 + $0x40] sm:$0xff]  }
 0x497   :  { %v3191_v42 = vmul.f32 0.020833334, %v3190_v44  ;;  %v3208_v10 = vadd.f32 %v3207_v43, %v3206_v8 }
 0x499   :  { %v3209_v11 = vmul.f32 0.020833334, %v3208_v10  ;;  %v3210_v27 = vmul.f32 %v3191_v42, %v3191_v42 }
 0x49b   :  { %v3211_v45 = vsub.f32 %v3209_v11, %v3210_v27 }
 0x49d   :  { %v3212_v33 = vmax.f32 %v3211_v45, 0.0 }
 0x49f   :  { %v3213_v38 = vadd.f32 1e-05, %v3212_v33 }
 0x4a1   :  { %8251 = vrsqrt.f32 %v3213_v38 }
 0x4ae   :  { %v8252_v24 = vpop.eup %8251 }
 0x4af   :  { %v3216_v51 = vmul.f32 %v8252_v24, %v3215_v34 }
 0x4b1   :  { %v3218_v53 = vmul.f32 %v3216_v51, %v3191_v42  ;;  %v3223_v36 = vrot.slane %v3216_v51, %v10538_v59 }
 0x4b3   :  { %v3219_v54 = vsub.f32 %v3217_v37, %v3218_v53  ;;  %v3224_v26 = vmul.f32 %v3223_v36, %v11352_v56  ;;  %v3225_v48 = vmul.f32 %v3223_v36, %v11355_v28  ;;  %v3226_v29 = vmul.f32 %v3223_v36, %v3166_v49 }
 0x4b4   :  { %v3227_v57 = vmul.f32 %v3223_v36, %v3169_v58  ;;  %v3228_v1 = vmul.f32 %v3223_v36, %v3174_v2  ;;  %v3229_v4 = vmul.f32 %v3223_v36, %v3177_v63 }
 0x4b5   :  { %v3234_v30 = vrot.slane %v3219_v54, %v10538_v59 }
 0x4b7   :  { %v3236_v55 = vadd.f32 %v3234_v30, %v3224_v26  ;;  %v3237_v31 = vadd.f32 %v3234_v30, %v3225_v48  ;;  %v3238_v18 = vadd.f32 %v3234_v30, %v3226_v29  ;;  %v3239_v0 = vadd.f32 %v3234_v30, %v3227_v57 }
 0x4b8   :  { %v3240_v50 = vadd.f32 %v3234_v30, %v3228_v1  ;;  %v3241_v52 = vadd.f32 %v3234_v30, %v3229_v4 }
 0x4b9   :  { %v3248_v23 = vmul.f32 0.2, %v3236_v55  ;;  %v3249_v20 = vmul.f32 0.2, %v3237_v31  ;;  %v3250_v22 = vmul.f32 0.2, %v3238_v18 }
 0x4ba   :  { %vm3246_vm13 = vcmp.gt.f32.partialorder %v3240_v50, 0.0  ;;  %vm3247_vm14 = vcmp.gt.f32.partialorder %v3241_v52, 0.0  ;;  %v3251_v56 = vmul.f32 0.2, %v3239_v0  ;;  %v3252_v60 = vmul.f32 0.2, %v3240_v50 }
 0x4bb   :  { %v3253_v28 = vmul.f32 0.2, %v3241_v52  ;;  %vm3244_vm15 = vcmp.gt.f32.partialorder %v3238_v18, 0.0  ;;  %vm3245_vm0 = vcmp.gt.f32.partialorder %v3239_v0, 0.0  ;;  %vm3242_vm1 = vcmp.gt.f32.partialorder %v3236_v55, 0.0 }
 0x4bc   :  { %v3258_v49 = vsel %vm3246_vm13, %v3240_v50, %v3252_v60  ;;  %v3256_v58 = vsel %vm3244_vm15, %v3238_v18, %v3250_v22  ;;  %v3257_v2 = vsel %vm3245_vm0, %v3239_v0, %v3251_v56  ;;  %vm3243_vm3 = vcmp.gt.f32.partialorder %v3237_v31, 0.0 }
 0x4bd   :  { %v3259_v17 = vsel %vm3247_vm14, %v3241_v52, %v3253_v28  ;;  %v11379_v61 = vpack.c.bf16 %v3257_v2, %v3256_v58  ;;  %v3254_v3 = vsel %vm3242_vm1, %v3236_v55, %v3248_v23  ;;  %v3255_v16 = vsel %vm3243_vm3, %v3237_v31, %v3249_v20 }
 0x4be   :  { %v11381_v63 = vpack.c.bf16 %v3259_v17, %v3258_v49  ;;  %v11383_v19 = vpack.c.bf16 %v3255_v16, %v3254_v3  ;;  %v7315_v16 = vcombine.high %v8414_v14, %v8419_v15 }
 0x4c0   :  { %7979 = vmatpush3.bf16.msra.mxu0 %v11381_v63  ;;  %8029 = vmatpush3.bf16.msra.mxu1 %v11381_v63 }
 0x4c1   :  { %7980 = vmatprep.subr.bf16.mxu0 %v13263_v62  ;;  %8030 = vmatprep.subr.bf16.mxu1 %v13263_v62 }
 0x4c4   :  { %7981 = vmatpush3.bf16.msra.mxu0 %v11379_v61  ;;  %8031 = vmatpush3.bf16.msra.mxu1 %v11379_v61 }
 0x4c5   :  { %7982 = vmatprep.subr.bf16.mxu0 %v13263_v62  ;;  %8032 = vmatprep.subr.bf16.mxu1 %v13263_v62 }
 0x4c8   :  { %7983 = vmatpush3.bf16.msra.mxu0 %v11383_v19  ;;  %8033 = vmatpush3.bf16.msra.mxu1 %v11383_v19 }
 0x4c9   :  { %7988 = vmatprep.subr.bf16.mxu0 %v13263_v62  ;;  %8048 = vmatprep.subr.bf16.mxu1 %v13263_v62 }
 0x4cb   :  { %7985 = vmatmul.mubr.msk.bf16.vlgmr.msra.gmra.mxu0 %vm1425_vm4, %v8240_v40  ;;  %8035 = vmatmul.mubr.msk.bf16.vlgmr.msra.gmra.mxu1 %vm1425_vm4, %v8241_v5  ;;  %v7346_v40 = vcombine.low %v8574_v46, %v8579_v47 }
 0x4cc   :  { %7989 = vmatpush3.bf16.msra.mxu0 %v11381_v63  ;;  %8049 = vmatpush3.bf16.msra.mxu1 %v11381_v63 }
 0x4cd   :  { %7990 = vmatprep.subr.bf16.mxu0 %v13263_v62  ;;  %8050 = vmatprep.subr.bf16.mxu1 %v13263_v62 }
 0x4ce   :  { %7994 = vmatprep.mubr.msk.bf16.mxu0 %vm8263_vm2, %v13263_v62  ;;  %8054 = vmatprep.mubr.msk.bf16.mxu1 %vm8263_vm2, %v13263_v62 }
 0x4d0   :  { %7991 = vmatpush3.bf16.msra.mxu0 %v11379_v61  ;;  %8051 = vmatpush3.bf16.msra.mxu1 %v11379_v61 }
 0x4d1   :  { %7992 = vmatprep.subr.bf16.mxu0 %v13263_v62  ;;  %8052 = vmatprep.subr.bf16.mxu1 %v13263_v62 }
 0x4d4   :  { %7993 = vmatpush3.bf16.msra.mxu0 %v11383_v19  ;;  %8053 = vmatpush3.bf16.msra.mxu1 %v11383_v19 }
 0x4d5   :  { %7998 = vmatprep.subr.bf16.mxu0 %v13263_v62 }
 0x4d7   :  { %7995 = vmatmul.mubr.msk.bf16.vlgmr.msra.gmra.mxu0 %vm1425_vm4, %v8242_v25  ;;  %8055 = vmatmul.mubr.msk.bf16.vlgmr.msra.gmra.mxu1 %vm1425_vm4, %v8247_v21 }
 0x4d8   :  { %7999 = vmatpush3.bf16.msra.mxu0 %v11381_v63  ;;  %8004 = vmatprep.mubr.msk.bf16.mxu0 %vm8263_vm2, %v13263_v62 }
 0x4d9   :  { %8000 = vmatprep.subr.bf16.mxu0 %v13263_v62 }
 0x4dc   :  { %8001 = vmatpush3.bf16.msra.mxu0 %v11379_v61 }
 0x4dd   :  { %8002 = vmatprep.subr.bf16.mxu0 %v13263_v62 }
 0x4e0   :  { %8003 = vmatpush3.bf16.msra.mxu0 %v11383_v19 }
 0x4e1   :  { %8008 = vmatprep.subr.bf16.mxu0 %v13263_v62 }
 0x4e3   :  { %8005 = vmatmul.mubr.msk.bf16.vlgmr.msra.gmra.mxu0 %vm1425_vm4, %v8243_v39 }
 0x4e4   :  { %8009 = vmatpush3.bf16.msra.mxu0 %v11381_v63  ;;  %8014 = vmatprep.mubr.msk.bf16.mxu0 %vm8263_vm2, %v13263_v62 }
 0x4e5   :  { %8010 = vmatprep.subr.bf16.mxu0 %v13263_v62 }
 0x4e8   :  { %8011 = vmatpush3.bf16.msra.mxu0 %v11379_v61 }
 0x4e9   :  { %8012 = vmatprep.subr.bf16.mxu0 %v13263_v62 }
 0x4ec   :  { %8013 = vmatpush3.bf16.msra.mxu0 %v11383_v19 }
 0x4ed   :  { %8018 = vmatprep.subr.bf16.mxu0 %v13263_v62 }
 0x4ef   :  { %8015 = vmatmul.mubr.msk.bf16.vlgmr.msra.gmra.mxu0 %vm1425_vm4, %v8244_v7 }
 0x4f0   :  { %8019 = vmatpush3.bf16.msra.mxu0 %v11381_v63  ;;  %8024 = vmatprep.mubr.msk.bf16.mxu0 %vm8263_vm2, %v13263_v62 }
 0x4f1   :  { %8020 = vmatprep.subr.bf16.mxu0 %v13263_v62 }
 0x4f4   :  { %8021 = vmatpush3.bf16.msra.mxu0 %v11379_v61 }
 0x4f5   :  { %8022 = vmatprep.subr.bf16.mxu0 %v13263_v62 }
 0x4f8   :  { %8023 = vmatpush3.bf16.msra.mxu0 %v11383_v19 }
 0x4f9   :  { %8038 = vmatprep.subr.bf16.mxu0 %v13263_v62 }
 0x4fb   :  { %8025 = vmatmul.mubr.msk.bf16.vlgmr.msra.gmra.mxu0 %vm1425_vm4, %v8245_v32 }
 0x4fc   :  { %8039 = vmatpush3.bf16.msra.mxu0 %v11381_v63  ;;  %8044 = vmatprep.mubr.msk.bf16.mxu0 %vm8263_vm2, %v13263_v62 }
 0x4fd   :  { %8040 = vmatprep.subr.bf16.mxu0 %v13263_v62 }
 0x500   :  { %8041 = vmatpush3.bf16.msra.mxu0 %v11379_v61 }
 0x501   :  { %8042 = vmatprep.subr.bf16.mxu0 %v13263_v62 }
 0x504   :  { %8043 = vmatpush3.bf16.msra.mxu0 %v11383_v19 }
 0x505   :  { %8058 = vmatprep.subr.bf16.mxu0 %v13263_v62 }
 0x507   :  { %8045 = vmatmul.mubr.msk.bf16.vlgmr.msra.gmra.mxu0 %vm1425_vm4, %v8246_v35 }
 0x508   :  { %8059 = vmatpush3.bf16.msra.mxu0 %v11381_v63  ;;  %8064 = vmatprep.mubr.msk.bf16.mxu0 %vm8263_vm2, %v13263_v62  ;;  %v7347_v63 = vcombine.high %v8574_v46, %v8579_v47 }
 0x509   :  { %8060 = vmatprep.subr.bf16.mxu0 %v13263_v62 }
 0x50c   :  { %8061 = vmatpush3.bf16.msra.mxu0 %v11379_v61 }
 0x50d   :  { %8062 = vmatprep.subr.bf16.mxu0 %v13263_v62 }
 0x510   :  { %8063 = vmatpush3.bf16.msra.mxu0 %v11383_v19  ;;  %v7314_v19 = vcombine.low %v8414_v14, %v8419_v15 }
 0x513   :  { %8065 = vmatmul.mubr.msk.bf16.vlgmr.msra.gmra.mxu0 %vm1425_vm4, %v8248_v6 }
 0x58b   :  { %v11487_v9 = vpop.f32.mrf.mxu0  ;;  %v11489_v41 = vpop.f32.mrf.mxu1 }
 0x58d   :  { %v7986_v8 = vpop.f32.mrf.mxu0  ;;  %v8036_v44 = vpop.f32.mrf.mxu1 }
 0x58f   :  { %v11491_v43 = vpop.f32.mrf.mxu0  ;;  %v11493_v42 = vpop.f32.mrf.mxu1 }
 0x590   :  { %v3730_v62 = vpack.c.bf16 %v11491_v43, %v11487_v9  ;;  %v3735_v10 = vpack.c.bf16 %v11493_v42, %v11489_v41 }
 0x591   :  { %v7987_v11 = vpop.f32.mrf.mxu0  ;;  %v8037_v27 = vpop.f32.mrf.mxu1 }
 0x597   :  { %v3359_v45 = vpop.f32.mrf.mxu0  ;;  %v11499_v33 = vpop.f32.mrf.mxu1 }
 0x599   :  { %v7996_v38 = vpop.f32.mrf.mxu0  ;;  %v8056_v34 = vpop.f32.mrf.mxu1 }
 0x59b   :  { %v3362_v24 = vpop.f32.mrf.mxu0  ;;  %v11501_v51 = vpop.f32.mrf.mxu1 }
 0x59c   :  { %v3731_v37 = vpack.c.bf16 %v3362_v24, %v3359_v45  ;;  %v3737_v53 = vpack.c.bf16 %v11501_v51, %v11499_v33 }
 0x59d   :  { %v7997_v36 = vpop.f32.mrf.mxu0  ;;  %v8057_v54 = vpop.f32.mrf.mxu1 }
 0x59e   :  { %4639 = vmatprep.mubr.bf16.mxu1 %v3731_v37 }
 0x5a3   :  { %v11505_v26 = vpop.f32.mrf.mxu0 }
 0x5a5   :  { %v8006_v48 = vpop.f32.mrf.mxu0 }
 0x5a7   :  { %v11507_v29 = vpop.f32.mrf.mxu0 }
 0x5a8   :  { %v3732_v57 = vpack.c.bf16 %v11507_v29, %v11505_v26 }
 0x5a9   :  { %v8007_v30 = vpop.f32.mrf.mxu0 }
 0x5af   :  { %v3463_v1 = vpop.f32.mrf.mxu0 }
 0x5b1   :  { %v8016_v4 = vpop.f32.mrf.mxu0 }
 0x5b3   :  { %v3466_v55 = vpop.f32.mrf.mxu0 }
 0x5b4   :  { %v3733_v31 = vpack.c.bf16 %v3466_v55, %v3463_v1 }
 0x5b5   :  { %v8017_v18 = vpop.f32.mrf.mxu0 }
 0x5bb   :  { %v11511_v0 = vpop.f32.mrf.mxu0 }
 0x5bd   :  { %v8026_v50 = vpop.f32.mrf.mxu0 }
 0x5bf   :  { %v11513_v52 = vpop.f32.mrf.mxu0 }
 0x5c0   :  { %v3734_v23 = vpack.c.bf16 %v11513_v52, %v11511_v0 }
 0x5c1   :  { %v8027_v20 = vpop.f32.mrf.mxu0 }
 0x5c7   :  { %v11517_v22 = vpop.f32.mrf.mxu0 }
 0x5c9   :  { %v8046_v56 = vpop.f32.mrf.mxu0 }
 0x5cb   :  { %v11519_v60 = vpop.f32.mrf.mxu0 }
 0x5cc   :  { %v3736_v28 = vpack.c.bf16 %v11519_v60, %v11517_v22 }
 0x5cd   :  { %v8047_v49 = vpop.f32.mrf.mxu0 }
 0x5d3   :  { %v11523_v58 = vpop.f32.mrf.mxu0 }
 0x5d5   :  { %v8066_v2 = vpop.f32.mrf.mxu0 }
 0x5d7   :  { %v11525_v17 = vpop.f32.mrf.mxu0 }
 0x5d8   :  { %v3738_v61 = vpack.c.bf16 %v11525_v17, %v11523_v58 }
 0x5d9   :  { %v8067_v3 = vpop.f32.mrf.mxu0 }
 0x5da   :  { %8257 = dma.done.wait [#allocation4], 18432 }
 0x5db   :  { %8258 = vsyncadd [#allocation4], 4294948864  ;;  %v7313_v5 = vcombine.high %v8404_v12, %v8409_v13  ;;  %v13264_v25 = vld [vmem:[#allocation50_spill] sm:$0xff]  ;;  %v13265_v21 = vld [vmem:[#allocation49_spill] sm:$0xff]  ;;  %4682 = vmatprep.mubr.bf16.mxu0 %v3733_v31  ;;  %4607 = vmatprep.subr.bf16.mxu1 %v7315_v16  ;;  %v7312_v14 = vcombine.low %v8404_v12, %v8409_v13  ;;  %vm4946_vm7 = vcmask 130048  }
 0x5dc   :  { %v7345_v39 = vcombine.high %v13265_v21, %v13264_v25  ;;  %4650 = vmatprep.subr.bf16.mxu0 %v7347_v63  ;;  %4608 = vmatpush1.bf16.msra.mxu1 %v7314_v19  ;;  %v7344_v15 = vcombine.low %v13265_v21, %v13264_v25  ;;  %v13266_v46 = vld [vmem:[#allocation20_spill] sm:$0xff]  ;;  %v13267_v47 = vld [vmem:[#allocation19_spill] sm:$0xff]  ;;  %v13270_v12 = vld [vmem:[#allocation18_spill] sm:$0xff] }
 0x5dd   :  { %4651 = vmatpush1.bf16.msra.mxu0 %v7346_v40  ;;  %4609 = vmatprep.subr.bf16.mxu1 %v7313_v5  ;;  %v7311_v7 = vcombine.high %v13267_v47, %v13266_v46  ;;  %v13268_v32 = vld [vmem:[#allocation48_spill] sm:$0xff]  ;;  %v13269_v35 = vld [vmem:[#allocation47_spill] sm:$0xff]  ;;  %v7310_v8 = vcombine.low %v13267_v47, %v13266_v46  ;;  %v13271_v13 = vld [vmem:[#allocation17_spill] sm:$0xff] }
 0x5de   :  { %4652 = vmatprep.subr.bf16.mxu0 %v7345_v39  ;;  %v7343_v6 = vcombine.high %v13269_v35, %v13268_v32  ;;  %v7342_v44 = vcombine.low %v13269_v35, %v13268_v32  ;;  %v7309_v11 = vcombine.high %v13271_v13, %v13270_v12  ;;  %v13272_v27 = vld [vmem:[#allocation46_spill] sm:$0xff]  ;;  %v13273_v45 = vld [vmem:[#allocation45_spill] sm:$0xff]  ;;  %v7308_v34 = vcombine.low %v13271_v13, %v13270_v12  ;;  %v13274_v37 = vld [vmem:[#allocation16_spill] sm:$0xff] }
 0x5df   :  { %v7341_v38 = vcombine.high %v13273_v45, %v13272_v27  ;;  %v7340_v24 = vcombine.low %v13273_v45, %v13272_v27  ;;  %v13275_v36 = vld [vmem:[#allocation15_spill] sm:$0xff]  ;;  %v13276_v48 = vld [vmem:[#allocation44_spill] sm:$0xff]  ;;  %v13278_v31 = vld [vmem:[#allocation14_spill] sm:$0xff] }
 0x5e0   :  { %4610 = vmatpush1.bf16.msra.mxu1 %v7312_v14  ;;  %v7307_v54 = vcombine.high %v13275_v36, %v13274_v37  ;;  %v13277_v30 = vld [vmem:[#allocation43_spill] sm:$0xff]  ;;  %v7306_v4 = vcombine.low %v13275_v36, %v13274_v37  ;;  %v13279_v18 = vld [vmem:[#allocation13_spill] sm:$0xff]  ;;  %v13280_v20 = vld [vmem:[#allocation42_spill] sm:$0xff] }
 0x5e1   :  { %4653 = vmatpush1.bf16.msra.mxu0 %v7344_v15  ;;  %4611 = vmatprep.subr.bf16.mxu1 %v7311_v7  ;;  %v7339_v1 = vcombine.high %v13277_v30, %v13276_v48  ;;  %v7338_v55 = vcombine.low %v13277_v30, %v13276_v48  ;;  %v7305_v50 = vcombine.high %v13279_v18, %v13278_v31  ;;  %v13281_v56 = vld [vmem:[#allocation41_spill] sm:$0xff]  ;;  %v13282_v16 = vld [vmem:[#allocation12_spill] sm:$0xff]  ;;  %v13283_v63 = vld [vmem:[#allocation11_spill] sm:$0xff] }
 0x5e2   :  { %4654 = vmatprep.subr.bf16.mxu0 %v7343_v6  ;;  %v7337_v49 = vcombine.high %v13281_v56, %v13280_v20  ;;  %v7304_v2 = vcombine.low %v13279_v18, %v13278_v31  ;;  %v7336_v3 = vcombine.low %v13281_v56, %v13280_v20  ;;  %v7303_v19 = vcombine.high %v13283_v63, %v13282_v16  ;;  %v13284_v40 = vld [vmem:[#allocation40_spill] sm:$0xff]  ;;  %v13285_v5 = vld [vmem:[#allocation39_spill] sm:$0xff]  ;;  %v13286_v14 = vld [vmem:[#allocation10_spill] sm:$0xff] }
 0x5e3   :  { %v7335_v25 = vcombine.high %v13285_v5, %v13284_v40  ;;  %v7302_v21 = vcombine.low %v13283_v63, %v13282_v16  ;;  %v7334_v39 = vcombine.low %v13285_v5, %v13284_v40  ;;  %v13287_v15 = vld [vmem:[#allocation9_spill] sm:$0xff]  ;;  %v13288_v47 = vld [vmem:[#allocation38_spill] sm:$0xff]  ;;  %v13296_v36 = vld [vmem:[#allocation64_spill] sm:$0xff] }
 0x5e4   :  { %4612 = vmatpush1.bf16.msra.mxu1 %v7310_v8  ;;  %v7301_v46 = vcombine.high %v13287_v15, %v13286_v14  ;;  %v13289_v7 = vld [vmem:[#allocation37_spill] sm:$0xff]  ;;  %v7300_v35 = vcombine.low %v13287_v15, %v13286_v14  ;;  %v13290_v8 = vld [vmem:[#allocation36_spill] sm:$0xff]  ;;  %v13292_v13 = vld [vmem:[#allocation66_spill] sm:$0xff] }
 0x5e5   :  { %4655 = vmatpush1.bf16.msra.mxu0 %v7342_v44  ;;  %4613 = vmatprep.subr.bf16.mxu1 %v7309_v11  ;;  %v7333_v32 = vcombine.high %v13289_v7, %v13288_v47  ;;  %v7332_v6 = vcombine.low %v13289_v7, %v13288_v47  ;;  %v13291_v44 = vld [vmem:[#allocation35_spill] sm:$0xff]  ;;  %v13293_v11 = vld [vmem:[#allocation65_spill] sm:$0xff]  ;;  %v13300_v18 = vld [vmem:[#allocation62_spill] sm:$0xff] }
 0x5e6   :  { %4656 = vmatprep.subr.bf16.mxu0 %v7341_v38  ;;  %v7331_v12 = vcombine.high %v13291_v44, %v13290_v8  ;;  %v7363_v27 = vcombine.high %v13293_v11, %v13292_v13  ;;  %v7330_v45 = vcombine.low %v13291_v44, %v13290_v8  ;;  %v7362_v38 = vcombine.low %v13293_v11, %v13292_v13  ;;  %v13304_v63 = vld [vmem:[#allocation60_spill] sm:$0xff]  ;;  %v13308_v15 = vld [vmem:[#allocation58_spill] sm:$0xff]  ;;  %v13333_v9 = vld [vmem:[#allocation109_spill] sm:$0xff] }
 0x5e7   :  { %v13312_v44 = vld [vmem:[#allocation56_spill] sm:$0xff]  ;;  %v13337_v41 = vld [vmem:[#allocation107_spill] sm:$0xff]  ;;  %v13338_v51 = vld [vmem:[#allocation74_spill] sm:$0xff] }
 0x5e8   :  { %4614 = vmatpush1.bf16.msra.mxu1 %v7308_v34  ;;  %v13294_v34 = vld [vmem:[#allocation34_spill] sm:$0xff]  ;;  %v13334_v29 = vld [vmem:[#allocation76_spill] sm:$0xff] }
 0x5e9   :  { %4657 = vmatpush1.bf16.msra.mxu0 %v7340_v24  ;;  %4615 = vmatprep.subr.bf16.mxu1 %v7307_v54  ;;  %v13295_v24 = vld [vmem:[#allocation33_spill] sm:$0xff]  ;;  %v13297_v54 = vld [vmem:[#allocation63_spill] sm:$0xff]  ;;  %v13393_v52 = vld [vmem:[#allocation140_spill] sm:$0xff] }
 0x5ea   :  { %4658 = vmatprep.subr.bf16.mxu0 %v7339_v1  ;;  %v7329_v37 = vcombine.high %v13295_v24, %v13294_v34  ;;  %v7361_v48 = vcombine.high %v13297_v54, %v13296_v36  ;;  %v7328_v30 = vcombine.low %v13295_v24, %v13294_v34  ;;  %v7360_v1 = vcombine.low %v13297_v54, %v13296_v36  ;;  %v13316_v24 = vld [vmem:[#allocation54_spill] sm:$0xff] }
 0x5ec   :  { %4616 = vmatpush1.bf16.msra.mxu1 %v7306_v4  ;;  %v13298_v4 = vld [vmem:[#allocation32_spill] sm:$0xff] }
 0x5ed   :  { %4659 = vmatpush1.bf16.msra.mxu0 %v7338_v55  ;;  %4617 = vmatprep.subr.bf16.mxu1 %v7305_v50  ;;  %v13299_v55 = vld [vmem:[#allocation31_spill] sm:$0xff]  ;;  %v13301_v50 = vld [vmem:[#allocation61_spill] sm:$0xff] }
 0x5ee   :  { %4660 = vmatprep.subr.bf16.mxu0 %v7337_v49  ;;  %v7327_v31 = vcombine.high %v13299_v55, %v13298_v4  ;;  %v7359_v20 = vcombine.high %v13301_v50, %v13300_v18  ;;  %v7326_v56 = vcombine.low %v13299_v55, %v13298_v4  ;;  %v7358_v49 = vcombine.low %v13301_v50, %v13300_v18  ;;  %v13320_v55 = vld [vmem:[#allocation52_spill] sm:$0xff] }
 0x5f0   :  { %4618 = vmatpush1.bf16.msra.mxu1 %v7304_v2  ;;  %v13302_v2 = vld [vmem:[#allocation30_spill] sm:$0xff] }
 0x5f1   :  { %4661 = vmatpush1.bf16.msra.mxu0 %v7336_v3  ;;  %4619 = vmatprep.subr.bf16.mxu1 %v7303_v19  ;;  %v13303_v3 = vld [vmem:[#allocation29_spill] sm:$0xff]  ;;  %v13305_v19 = vld [vmem:[#allocation59_spill] sm:$0xff] }
 0x5f2   :  { %4662 = vmatprep.subr.bf16.mxu0 %v7335_v25  ;;  %v7325_v16 = vcombine.high %v13303_v3, %v13302_v2  ;;  %v7357_v40 = vcombine.high %v13305_v19, %v13304_v63  ;;  %v7324_v5 = vcombine.low %v13303_v3, %v13302_v2  ;;  %v7356_v25 = vcombine.low %v13305_v19, %v13304_v63  ;;  %v13324_v3 = vld [vmem:[#allocation114_spill] sm:$0xff] }
 0x5f4   :  { %4620 = vmatpush1.bf16.msra.mxu1 %v7302_v21  ;;  %v13306_v21 = vld [vmem:[#allocation28_spill] sm:$0xff] }
 0x5f5   :  { %4663 = vmatpush1.bf16.msra.mxu0 %v7334_v39  ;;  %4621 = vmatprep.subr.bf16.mxu1 %v7301_v46  ;;  %v13307_v39 = vld [vmem:[#allocation27_spill] sm:$0xff]  ;;  %v13309_v46 = vld [vmem:[#allocation57_spill] sm:$0xff] }
 0x5f6   :  { %4664 = vmatprep.subr.bf16.mxu0 %v7333_v32  ;;  %v7323_v14 = vcombine.high %v13307_v39, %v13306_v21  ;;  %v7355_v47 = vcombine.high %v13309_v46, %v13308_v15  ;;  %v7322_v7 = vcombine.low %v13307_v39, %v13306_v21  ;;  %v7354_v32 = vcombine.low %v13309_v46, %v13308_v15  ;;  %v13328_v39 = vld [vmem:[#allocation112_spill] sm:$0xff] }
 0x5f8   :  { %4622 = vmatpush1.bf16.msra.mxu1 %v7300_v35  ;;  %v13310_v35 = vld [vmem:[#allocation26_spill] sm:$0xff] }
 0x5f9   :  { %4665 = vmatpush1.bf16.msra.mxu0 %v7332_v6  ;;  %4623 = vmatprep.subr.bf16.mxu1 %v7331_v12  ;;  %v13311_v6 = vld [vmem:[#allocation25_spill] sm:$0xff]  ;;  %v13313_v12 = vld [vmem:[#allocation55_spill] sm:$0xff] }
 0x5fa   :  { %4666 = vmatprep.subr.bf16.mxu0 %v7363_v27  ;;  %v7321_v8 = vcombine.high %v13311_v6, %v13310_v35  ;;  %v7353_v13 = vcombine.high %v13313_v12, %v13312_v44  ;;  %v7320_v11 = vcombine.low %v13311_v6, %v13310_v35  ;;  %v7352_v27 = vcombine.low %v13313_v12, %v13312_v44  ;;  %v13332_v6 = vld [vmem:[#allocation110_spill] sm:$0xff]  ;;  %v13336_v44 = vld [vmem:[#allocation108_spill] sm:$0xff] }
 0x5fb   :  { %v7407_v43 = vcombine.high %v13333_v9, %v13332_v6  ;;  %v7406_v26 = vcombine.low %v13333_v9, %v13332_v6  ;;  %v7405_v42 = vcombine.high %v13337_v41, %v13336_v44  ;;  %v7404_v33 = vcombine.low %v13337_v41, %v13336_v44  ;;  %v13359_v6 = vld [vmem:[#allocation95_spill] sm:$0xff]  ;;  %v13363_v44 = vld [vmem:[#allocation93_spill] sm:$0xff] }
 0x5fc   :  { %4624 = vmatpush2.bf16.msra.mxu1 %v7330_v45  ;;  %v13314_v45 = vld [vmem:[#allocation24_spill] sm:$0xff] }
 0x5fd   :  { %4667 = vmatpush2.bf16.msra.mxu0 %v7362_v38  ;;  %4625 = vmatprep.subr.bf16.mxu1 %v7329_v37  ;;  %v13315_v38 = vld [vmem:[#allocation23_spill] sm:$0xff]  ;;  %v13317_v37 = vld [vmem:[#allocation53_spill] sm:$0xff] }
 0x5fe   :  { %4668 = vmatprep.subr.bf16.mxu0 %v7361_v48  ;;  %v7319_v34 = vcombine.high %v13315_v38, %v13314_v45  ;;  %v7351_v36 = vcombine.high %v13317_v37, %v13316_v24  ;;  %v7318_v54 = vcombine.low %v13315_v38, %v13314_v45  ;;  %v7350_v48 = vcombine.low %v13317_v37, %v13316_v24  ;;  %v13343_v24 = vld [vmem:[#allocation71_spill] sm:$0xff] }
 0x600   :  { %4626 = vmatpush2.bf16.msra.mxu1 %v7328_v30  ;;  %v13318_v30 = vld [vmem:[#allocation22_spill] sm:$0xff] }
 0x601   :  { %4669 = vmatpush2.bf16.msra.mxu0 %v7360_v1  ;;  %4627 = vmatprep.subr.bf16.mxu1 %v7327_v31  ;;  %v13319_v1 = vld [vmem:[#allocation21_spill] sm:$0xff]  ;;  %v13321_v31 = vld [vmem:[#allocation51_spill] sm:$0xff] }
 0x602   :  { %4670 = vmatprep.subr.bf16.mxu0 %v7359_v20  ;;  %v7317_v4 = vcombine.high %v13319_v1, %v13318_v30  ;;  %v7349_v18 = vcombine.high %v13321_v31, %v13320_v55  ;;  %v7316_v50 = vcombine.low %v13319_v1, %v13318_v30  ;;  %v7348_v20 = vcombine.low %v13321_v31, %v13320_v55  ;;  %v13347_v55 = vld [vmem:[#allocation69_spill] sm:$0xff] }
 0x604   :  { %4628 = vmatpush2.bf16.msra.mxu1 %v7326_v56  ;;  %v13322_v56 = vld [vmem:[#allocation82_spill] sm:$0xff] }
 0x605   :  { %4671 = vmatpush2.bf16.msra.mxu0 %v7358_v49  ;;  %4629 = vmatprep.subr.bf16.mxu1 %v7325_v16  ;;  %v13323_v49 = vld [vmem:[#allocation81_spill] sm:$0xff] }
 0x606   :  { %4672 = vmatprep.subr.bf16.mxu0 %v7357_v40  ;;  %v7379_v2 = vcombine.high %v13323_v49, %v13322_v56  ;;  %v13325_v16 = vld [vmem:[#allocation113_spill] sm:$0xff]  ;;  %v7378_v19 = vcombine.low %v13323_v49, %v13322_v56 }
 0x607   :  { %v7411_v63 = vcombine.high %v13325_v16, %v13324_v3  ;;  %v7410_v40 = vcombine.low %v13325_v16, %v13324_v3  ;;  %v13351_v3 = vld [vmem:[#allocation67_spill] sm:$0xff] }
 0x608   :  { %4630 = vmatpush2.bf16.msra.mxu1 %v7324_v5  ;;  %v13326_v5 = vld [vmem:[#allocation80_spill] sm:$0xff] }
 0x609   :  { %4673 = vmatpush2.bf16.msra.mxu0 %v7356_v25  ;;  %4631 = vmatprep.subr.bf16.mxu1 %v7323_v14  ;;  %v13327_v25 = vld [vmem:[#allocation79_spill] sm:$0xff] }
 0x60a   :  { %4674 = vmatprep.subr.bf16.mxu0 %v7355_v47  ;;  %v7377_v21 = vcombine.high %v13327_v25, %v13326_v5  ;;  %v13329_v14 = vld [vmem:[#allocation111_spill] sm:$0xff]  ;;  %v7376_v46 = vcombine.low %v13327_v25, %v13326_v5 }
 0x60b   :  { %v7409_v15 = vcombine.high %v13329_v14, %v13328_v39  ;;  %v7408_v47 = vcombine.low %v13329_v14, %v13328_v39  ;;  %v13355_v39 = vld [vmem:[#allocation97_spill] sm:$0xff] }
 0x60c   :  { %4632 = vmatpush2.bf16.msra.mxu1 %v7322_v7  ;;  %v13330_v7 = vld [vmem:[#allocation78_spill] sm:$0xff] }
 0x60d   :  { %4675 = vmatpush2.bf16.msra.mxu0 %v7354_v32  ;;  %4633 = vmatprep.subr.bf16.mxu1 %v7321_v8  ;;  %v13331_v32 = vld [vmem:[#allocation77_spill] sm:$0xff] }
 0x60e   :  { %4676 = vmatprep.subr.bf16.mxu0 %v7353_v13  ;;  %v7375_v35 = vcombine.high %v13331_v32, %v13330_v7  ;;  %v13340_v13 = vld [vmem:[#allocation106_spill] sm:$0xff] }
 0x610   :  { %4634 = vmatpush2.bf16.msra.mxu1 %v7320_v11  ;;  %v13341_v11 = vld [vmem:[#allocation105_spill] sm:$0xff] }
 0x611   :  { %4677 = vmatpush2.bf16.msra.mxu0 %v7352_v27  ;;  %4635 = vmatprep.subr.bf16.mxu1 %v7319_v34  ;;  %v7403_v27 = vcombine.high %v13341_v11, %v13340_v13  ;;  %v7402_v38 = vcombine.low %v13341_v11, %v13340_v13  ;;  %v13342_v34 = vld [vmem:[#allocation72_spill] sm:$0xff]  ;;  %v13367_v13 = vld [vmem:[#allocation91_spill] sm:$0xff] }
 0x612   :  { %4678 = vmatprep.subr.bf16.mxu0 %v7351_v36  ;;  %v7369_v37 = vcombine.high %v13343_v24, %v13342_v34  ;;  %v13344_v36 = vld [vmem:[#allocation104_spill] sm:$0xff]  ;;  %v7368_v30 = vcombine.low %v13343_v24, %v13342_v34 }
 0x614   :  { %4636 = vmatpush2.bf16.msra.mxu1 %v7318_v54  ;;  %v13345_v54 = vld [vmem:[#allocation103_spill] sm:$0xff] }
 0x615   :  { %4679 = vmatpush2.bf16.msra.mxu0 %v7350_v48  ;;  %4637 = vmatprep.subr.bf16.mxu1 %v7317_v4  ;;  %v7401_v48 = vcombine.high %v13345_v54, %v13344_v36  ;;  %v7400_v1 = vcombine.low %v13345_v54, %v13344_v36  ;;  %v13346_v4 = vld [vmem:[#allocation70_spill] sm:$0xff]  ;;  %v13371_v36 = vld [vmem:[#allocation89_spill] sm:$0xff] }
 0x616   :  { %4680 = vmatprep.subr.bf16.mxu0 %v7349_v18  ;;  %v7367_v31 = vcombine.high %v13347_v55, %v13346_v4  ;;  %v13348_v18 = vld [vmem:[#allocation102_spill] sm:$0xff]  ;;  %v7366_v56 = vcombine.low %v13347_v55, %v13346_v4 }
 0x618   :  { %4638 = vmatpush2.bf16.msra.mxu1 %v7316_v50  ;;  %v13349_v50 = vld [vmem:[#allocation101_spill] sm:$0xff] }
 0x619   :  { %4681 = vmatpush2.bf16.msra.mxu0 %v7348_v20  ;;  %4693 = vmatprep.subr.bf16.mxu1 %v7379_v2  ;;  %v7399_v20 = vcombine.high %v13349_v50, %v13348_v18  ;;  %v7398_v49 = vcombine.low %v13349_v50, %v13348_v18  ;;  %v13350_v2 = vld [vmem:[#allocation68_spill] sm:$0xff]  ;;  %v13375_v18 = vld [vmem:[#allocation87_spill] sm:$0xff] }
 0x61a   :  { %4736 = vmatprep.subr.bf16.mxu0 %v7411_v63  ;;  %v7365_v16 = vcombine.high %v13351_v3, %v13350_v2  ;;  %v13352_v63 = vld [vmem:[#allocation100_spill] sm:$0xff]  ;;  %v7364_v5 = vcombine.low %v13351_v3, %v13350_v2 }
 0x61b   :  { %4640 = vmatmul.mubr.bf16.vlgmr.msra.gmra.mxu1 %v3730_v62  ;;  %v7374_v62 = vcombine.low %v13331_v32, %v13330_v7 }
 0x61c   :  { %4683 = vmatmul.mubr.bf16.vlgmr.msra.gmra.mxu0 %v3732_v57  ;;  %4694 = vmatpush1.bf16.msra.mxu1 %v7378_v19  ;;  %v13335_v57 = vld [vmem:[#allocation75_spill] sm:$0xff] }
 0x61d   :  { %4737 = vmatpush1.bf16.msra.mxu0 %v7410_v40  ;;  %4695 = vmatprep.subr.bf16.mxu1 %v7377_v21  ;;  %v7373_v8 = vcombine.high %v13335_v57, %v13334_v29  ;;  %v13353_v19 = vld [vmem:[#allocation99_spill] sm:$0xff]  ;;  %v13354_v21 = vld [vmem:[#allocation98_spill] sm:$0xff] }
 0x61e   :  { %4738 = vmatprep.subr.bf16.mxu0 %v7409_v15  ;;  %4725 = vmatprep.mubr.bf16.mxu1 %v3735_v10  ;;  %v7372_v10 = vcombine.low %v13335_v57, %v13334_v29  ;;  %v7397_v40 = vcombine.high %v13353_v19, %v13352_v63  ;;  %v7396_v25 = vcombine.low %v13353_v19, %v13352_v63  ;;  %v13356_v15 = vld [vmem:[#allocation130_spill] sm:$0xff]  ;;  %v13379_v63 = vld [vmem:[#allocation85_spill] sm:$0xff] }
 0x61f   :  { %4768 = vmatprep.mubr.bf16.mxu0 %v3737_v53  ;;  %v13339_v53 = vld [vmem:[#allocation73_spill] sm:$0xff]  ;;  %v7395_v14 = vcombine.high %v13355_v39, %v13354_v21  ;;  %v7394_v7 = vcombine.low %v13355_v39, %v13354_v21 }
 0x620   :  { %4696 = vmatpush1.bf16.msra.mxu1 %v7376_v46  ;;  %v7371_v12 = vcombine.high %v13339_v53, %v13338_v51  ;;  %v7370_v45 = vcombine.low %v13339_v53, %v13338_v51  ;;  %v13357_v46 = vld [vmem:[#allocation129_spill] sm:$0xff] }
 0x621   :  { %4739 = vmatpush1.bf16.msra.mxu0 %v7408_v47  ;;  %4697 = vmatprep.subr.bf16.mxu1 %v7375_v35  ;;  %v7427_v47 = vcombine.high %v13357_v46, %v13356_v15  ;;  %v7426_v32 = vcombine.low %v13357_v46, %v13356_v15  ;;  %v13358_v35 = vld [vmem:[#allocation96_spill] sm:$0xff]  ;;  %v13383_v15 = vld [vmem:[#allocation83_spill] sm:$0xff] }
 0x622   :  { %4740 = vmatprep.subr.bf16.mxu0 %v7407_v43  ;;  %v7393_v9 = vcombine.high %v13359_v6, %v13358_v35  ;;  %v13360_v43 = vld [vmem:[#allocation128_spill] sm:$0xff]  ;;  %v7392_v29 = vcombine.low %v13359_v6, %v13358_v35 }
 0x624   :  { %4698 = vmatpush1.bf16.msra.mxu1 %v7374_v62  ;;  %v13361_v62 = vld [vmem:[#allocation127_spill] sm:$0xff] }
 0x625   :  { %4741 = vmatpush1.bf16.msra.mxu0 %v7406_v26  ;;  %4699 = vmatprep.subr.bf16.mxu1 %v7373_v8  ;;  %v7425_v26 = vcombine.high %v13361_v62, %v13360_v43  ;;  %v7424_v57 = vcombine.low %v13361_v62, %v13360_v43  ;;  %v13362_v8 = vld [vmem:[#allocation94_spill] sm:$0xff]  ;;  %v13387_v43 = vld [vmem:[#allocation145_spill] sm:$0xff] }
 0x626   :  { %4742 = vmatprep.subr.bf16.mxu0 %v7405_v42  ;;  %v7391_v41 = vcombine.high %v13363_v44, %v13362_v8  ;;  %v13364_v42 = vld [vmem:[#allocation126_spill] sm:$0xff]  ;;  %v7390_v51 = vcombine.low %v13363_v44, %v13362_v8 }
 0x628   :  { %4700 = vmatpush1.bf16.msra.mxu1 %v7372_v10  ;;  %v13365_v10 = vld [vmem:[#allocation125_spill] sm:$0xff] }
 0x629   :  { %4743 = vmatpush1.bf16.msra.mxu0 %v7404_v33  ;;  %4701 = vmatprep.subr.bf16.mxu1 %v7371_v12  ;;  %v7423_v33 = vcombine.high %v13365_v10, %v13364_v42  ;;  %v7422_v53 = vcombine.low %v13365_v10, %v13364_v42  ;;  %v13366_v12 = vld [vmem:[#allocation92_spill] sm:$0xff]  ;;  %v13391_v42 = vld [vmem:[#allocation142_spill] sm:$0xff]  ;;  %v13392_v10 = vld [vmem:[#allocation141_spill] sm:$0xff] }
 0x62a   :  { %4744 = vmatprep.subr.bf16.mxu0 %v7403_v27  ;;  %v7389_v11 = vcombine.high %v13367_v13, %v13366_v12  ;;  %v13368_v27 = vld [vmem:[#allocation124_spill] sm:$0xff]  ;;  %v7388_v34 = vcombine.low %v13367_v13, %v13366_v12  ;;  %v7438_v0 = vcombine.low %v13392_v10, %v13391_v42 }
 0x62b   :  { %v13397_v13 = vld [vmem:[#allocation136_spill] sm:$0xff] }
 0x62c   :  { %4702 = vmatpush1.bf16.msra.mxu1 %v7370_v45  ;;  %v13369_v45 = vld [vmem:[#allocation123_spill] sm:$0xff] }
 0x62d   :  { %4745 = vmatpush1.bf16.msra.mxu0 %v7402_v38  ;;  %4703 = vmatprep.subr.bf16.mxu1 %v7369_v37  ;;  %v7421_v38 = vcombine.high %v13369_v45, %v13368_v27  ;;  %v7420_v24 = vcombine.low %v13369_v45, %v13368_v27  ;;  %v13370_v37 = vld [vmem:[#allocation90_spill] sm:$0xff] }
 0x62e   :  { %4746 = vmatprep.subr.bf16.mxu0 %v7401_v48  ;;  %v7387_v54 = vcombine.high %v13371_v36, %v13370_v37  ;;  %v13372_v48 = vld [vmem:[#allocation122_spill] sm:$0xff]  ;;  %v7386_v4 = vcombine.low %v13371_v36, %v13370_v37  ;;  %v13401_v36 = vld [vmem:[#allocation132_spill] sm:$0xff] }
 0x630   :  { %4704 = vmatpush1.bf16.msra.mxu1 %v7368_v30  ;;  %v13373_v30 = vld [vmem:[#allocation121_spill] sm:$0xff] }
 0x631   :  { %4747 = vmatpush1.bf16.msra.mxu0 %v7400_v1  ;;  %4705 = vmatprep.subr.bf16.mxu1 %v7367_v31  ;;  %v7419_v1 = vcombine.high %v13373_v30, %v13372_v48  ;;  %v7418_v55 = vcombine.low %v13373_v30, %v13372_v48  ;;  %v13374_v31 = vld [vmem:[#allocation88_spill] sm:$0xff] }
 0x632   :  { %4748 = vmatprep.subr.bf16.mxu0 %v7399_v20  ;;  %v7385_v50 = vcombine.high %v13375_v18, %v13374_v31  ;;  %v13376_v20 = vld [vmem:[#allocation120_spill] sm:$0xff]  ;;  %v7384_v2 = vcombine.low %v13375_v18, %v13374_v31 }
 0x634   :  { %4706 = vmatpush1.bf16.msra.mxu1 %v7366_v56  ;;  %v13377_v56 = vld [vmem:[#allocation119_spill] sm:$0xff] }
 0x635   :  { %4749 = vmatpush1.bf16.msra.mxu0 %v7398_v49  ;;  %4707 = vmatprep.subr.bf16.mxu1 %v7365_v16  ;;  %v7417_v49 = vcombine.high %v13377_v56, %v13376_v20  ;;  %v7416_v3 = vcombine.low %v13377_v56, %v13376_v20  ;;  %v13378_v16 = vld [vmem:[#allocation86_spill] sm:$0xff] }
 0x636   :  { %4750 = vmatprep.subr.bf16.mxu0 %v7397_v40  ;;  %v7383_v19 = vcombine.high %v13379_v63, %v13378_v16  ;;  %v13380_v40 = vld [vmem:[#allocation118_spill] sm:$0xff]  ;;  %v7382_v21 = vcombine.low %v13379_v63, %v13378_v16 }
 0x638   :  { %4708 = vmatpush1.bf16.msra.mxu1 %v7364_v5  ;;  %v13381_v5 = vld [vmem:[#allocation117_spill] sm:$0xff] }
 0x639   :  { %4751 = vmatpush1.bf16.msra.mxu0 %v7396_v25  ;;  %4709 = vmatprep.subr.bf16.mxu1 %v7395_v14  ;;  %v7415_v25 = vcombine.high %v13381_v5, %v13380_v40  ;;  %v7414_v39 = vcombine.low %v13381_v5, %v13380_v40  ;;  %v13382_v14 = vld [vmem:[#allocation84_spill] sm:$0xff] }
 0x63a   :  { %4752 = vmatprep.subr.bf16.mxu0 %v7427_v47  ;;  %v7381_v46 = vcombine.high %v13383_v15, %v13382_v14  ;;  %v13384_v47 = vld [vmem:[#allocation116_spill] sm:$0xff]  ;;  %v7380_v35 = vcombine.low %v13383_v15, %v13382_v14 }
 0x63c   :  { %4710 = vmatpush2.bf16.msra.mxu1 %v7394_v7  ;;  %v13385_v7 = vld [vmem:[#allocation115_spill] sm:$0xff] }
 0x63d   :  { %4753 = vmatpush2.bf16.msra.mxu0 %v7426_v32  ;;  %4711 = vmatprep.subr.bf16.mxu1 %v7393_v9  ;;  %v7413_v32 = vcombine.high %v13385_v7, %v13384_v47  ;;  %v7412_v6 = vcombine.low %v13385_v7, %v13384_v47  ;;  %v13386_v9 = vld [vmem:[#allocation146_spill] sm:$0xff] }
 0x63e   :  { %4754 = vmatprep.subr.bf16.mxu0 %v7425_v26  ;;  %v7443_v62 = vcombine.high %v13387_v43, %v13386_v9  ;;  %v7442_v26 = vcombine.low %v13387_v43, %v13386_v9 }
 0x640   :  { %4712 = vmatpush2.bf16.msra.mxu1 %v7392_v29  ;;  %v13388_v29 = vld [vmem:[#allocation144_spill] sm:$0xff] }
 0x641   :  { %4755 = vmatpush2.bf16.msra.mxu0 %v7424_v57  ;;  %4713 = vmatprep.subr.bf16.mxu1 %v7391_v41  ;;  %v13389_v57 = vld [vmem:[#allocation143_spill] sm:$0xff]  ;;  %v13390_v41 = vmov 0  }
 0x642   :  { %4756 = vmatprep.subr.bf16.mxu0 %v7423_v33  ;;  %v7441_v8 = vcombine.high %v13389_v57, %v13388_v29  ;;  %v7440_v44 = vcombine.low %v13389_v57, %v13388_v29  ;;  %v7439_v33 = vcombine.high %v13392_v10, %v13391_v42 }
 0x644   :  { %4714 = vmatpush2.bf16.msra.mxu1 %v7390_v51  ;;  %v13396_v51 = vld [vmem:[#allocation137_spill] sm:$0xff] }
 0x645   :  { %4757 = vmatpush2.bf16.msra.mxu0 %v7422_v53  ;;  %4715 = vmatprep.subr.bf16.mxu1 %v7389_v11  ;;  %v13398_v11 = vld [vmem:[#allocation135_spill] sm:$0xff] }
 0x646   :  { %4758 = vmatprep.subr.bf16.mxu0 %v7421_v38  ;;  %v7433_v27 = vcombine.high %v13398_v11, %v13397_v13  ;;  %v7432_v45 = vcombine.low %v13398_v11, %v13397_v13  ;;  %v13399_v38 = vld [vmem:[#allocation134_spill] sm:$0xff] }
 0x648   :  { %4716 = vmatpush2.bf16.msra.mxu1 %v7388_v34  ;;  %v13400_v34 = vld [vmem:[#allocation133_spill] sm:$0xff] }
 0x649   :  { %4759 = vmatpush2.bf16.msra.mxu0 %v7420_v24  ;;  %4717 = vmatprep.subr.bf16.mxu1 %v7387_v54  ;;  %v7431_v24 = vcombine.high %v13400_v34, %v13399_v38  ;;  %v7430_v37 = vcombine.low %v13400_v34, %v13399_v38  ;;  %v13402_v54 = vld [vmem:[#allocation131_spill] sm:$0xff] }
 0x64a   :  { %4760 = vmatprep.subr.bf16.mxu0 %v7419_v1  ;;  %v7429_v48 = vcombine.high %v13402_v54, %v13401_v36  ;;  %v7428_v30 = vcombine.low %v13402_v54, %v13401_v36 }
 0x64c   :  { %4718 = vmatpush2.bf16.msra.mxu1 %v7386_v4 }
 0x64d   :  { %4761 = vmatpush2.bf16.msra.mxu0 %v7418_v55  ;;  %4719 = vmatprep.subr.bf16.mxu1 %v7385_v50 }
 0x64e   :  { %4762 = vmatprep.subr.bf16.mxu0 %v7417_v49 }
 0x650   :  { %4720 = vmatpush2.bf16.msra.mxu1 %v7384_v2 }
 0x651   :  { %4763 = vmatpush2.bf16.msra.mxu0 %v7416_v3  ;;  %4721 = vmatprep.subr.bf16.mxu1 %v7383_v19 }
 0x652   :  { %4764 = vmatprep.subr.bf16.mxu0 %v7415_v25 }
 0x654   :  { %4722 = vmatpush2.bf16.msra.mxu1 %v7382_v21 }
 0x655   :  { %4765 = vmatpush2.bf16.msra.mxu0 %v7414_v39  ;;  %4723 = vmatprep.subr.bf16.mxu1 %v7381_v46 }
 0x656   :  { %4766 = vmatprep.subr.bf16.mxu0 %v7413_v32 }
 0x658   :  { %4724 = vmatpush2.bf16.msra.mxu1 %v7380_v35 }
 0x659   :  { %4767 = vmatpush2.bf16.msra.mxu0 %v7412_v6  ;;  %4779 = vmatprep.subr.bf16.mxu1 %v7443_v62 }
 0x65b   :  { %4726 = vmatmul.mubr.bf16.vlgmr.msra.gmra.mxu1 %v3734_v23  ;;  %v13394_v23 = vld [vmem:[#allocation139_spill] sm:$0xff] }
 0x65c   :  { %4769 = vmatmul.mubr.bf16.vlgmr.msra.gmra.mxu0 %v3736_v28  ;;  %4780 = vmatpush1.bf16.msra.mxu1 %v7442_v26  ;;  %v7437_v22 = vcombine.high %v13394_v23, %v13393_v52  ;;  %v7436_v60 = vcombine.low %v13394_v23, %v13393_v52  ;;  %v13395_v28 = vld [vmem:[#allocation138_spill] sm:$0xff] }
 0x65d   :  { %4811 = vmatprep.mubr.bf16.mxu1 %v13390_v41  ;;  %4781 = vmatprep.subr.bf16.mxu1 %v7441_v8  ;;  %v7435_v53 = vcombine.high %v13396_v51, %v13395_v28  ;;  %v7434_v12 = vcombine.low %v13396_v51, %v13395_v28 }
 0x65e   :  { %4982 = vmatprep.mubr.bf16.mxu0 %v13390_v41 }
 0x660   :  { %4782 = vmatpush1.bf16.msra.mxu1 %v7440_v44 }
 0x661   :  { %4783 = vmatprep.subr.bf16.mxu1 %v7439_v33 }
 0x664   :  { %4784 = vmatpush1.bf16.msra.mxu1 %v7438_v0 }
 0x665   :  { %4785 = vmatprep.subr.bf16.mxu1 %v7437_v22 }
 0x668   :  { %4786 = vmatpush1.bf16.msra.mxu1 %v7436_v60 }
 0x669   :  { %4787 = vmatprep.subr.bf16.mxu1 %v7435_v53 }
 0x66c   :  { %4788 = vmatpush1.bf16.msra.mxu1 %v7434_v12 }
 0x66d   :  { %4789 = vmatprep.subr.bf16.mxu1 %v7433_v27 }
 0x670   :  { %4790 = vmatpush1.bf16.msra.mxu1 %v7432_v45 }
 0x671   :  { %4791 = vmatprep.subr.bf16.mxu1 %v7431_v24 }
 0x674   :  { %4792 = vmatpush1.bf16.msra.mxu1 %v7430_v37 }
 0x675   :  { %4793 = vmatprep.subr.bf16.mxu1 %v7429_v48 }
 0x678   :  { %4794 = vmatpush1.bf16.msra.mxu1 %v7428_v30 }
 0x67b   :  { %4812 = vmatmul.mubr.bf16.vlgmr.msra.gmra.mxu1 %v3738_v61 }
 0x6db   :  { %v4641_v1 = vpop.f32.mrf.mxu1 }
 0x6dc   :  { %v4684_v4 = vpop.f32.mrf.mxu0 }
 0x6dd   :  { %v4643_v55 = vpop.f32.mrf.mxu1  ;;  %v4685_v19 = vadd.f32 %v4684_v4, %v4641_v1 }
 0x6de   :  { %v4686_v31 = vpop.f32.mrf.mxu0 }
 0x6df   :  { %v4645_v18 = vpop.f32.mrf.mxu1  ;;  %v4687_v40 = vadd.f32 %v4686_v31, %v4643_v55 }
 0x6e0   :  { %v4688_v50 = vpop.f32.mrf.mxu0 }
 0x6e1   :  { %v4647_v20 = vpop.f32.mrf.mxu1  ;;  %v4689_v5 = vadd.f32 %v4688_v50, %v4645_v18 }
 0x6e2   :  { %v4690_v49 = vpop.f32.mrf.mxu0 }
 0x6e3   :  { %v4691_v61 = vadd.f32 %v4690_v49, %v4647_v20 }
 0x71b   :  { %v4727_v56 = vpop.f32.mrf.mxu1 }
 0x71c   :  { %v4770_v3 = vpop.f32.mrf.mxu0  ;;  %v4728_v25 = vadd.f32 %v4727_v56, %v4685_v19 }
 0x71d   :  { %v4729_v2 = vpop.f32.mrf.mxu1 }
 0x71e   :  { %v4772_v63 = vpop.f32.mrf.mxu0  ;;  %v4730_v21 = vadd.f32 %v4729_v2, %v4687_v40  ;;  %v4771_v15 = vadd.f32 %v4770_v3, %v4728_v25 }
 0x71f   :  { %v4731_v16 = vpop.f32.mrf.mxu1 }
 0x720   :  { %v4774_v17 = vpop.f32.mrf.mxu0  ;;  %v4732_v39 = vadd.f32 %v4731_v16, %v4689_v5  ;;  %v4773_v47 = vadd.f32 %v4772_v63, %v4730_v21 }
 0x721   :  { %v4733_v58 = vpop.f32.mrf.mxu1 }
 0x722   :  { %v4734_v46 = vadd.f32 %v4733_v58, %v4691_v61  ;;  %v4776_v7 = vpop.f32.mrf.mxu0  ;;  %v4775_v35 = vadd.f32 %v4774_v17, %v4732_v39  ;;  %v4868_v58 = vld [vmem:[%s12460_s9] sm:$0x3]  ;;  %v13403_v17 = vld [vmem:[#allocation403_spill] sm:$0xff] }
 0x723   :  { %v4876_v61 = vsub.s32 1, %v13403_v17  ;;  %v4873_v39 = vrot.slane %v4868_v58, %v10538_v59 }
 0x724   :  { %v4777_v62 = vadd.f32 %v4776_v7, %v4734_v46 }
 0x725   :  { %v4877_v46 = vrot.slane %v4868_v58, %v4876_v61 }
 0x73b   :  { %v4813_v14 = vpop.f32.mrf.mxu1 }
 0x73c   :  { %v11840_v6 = vadd.f32 %v4813_v14, %v4771_v15  ;;  %v8265_v14 = vmov 1966171168  }
 0x73d   :  { %v4815_v32 = vpop.f32.mrf.mxu1  ;;  %v4889_v15 = vunpack.c.l.s4 %v8265_v14 }
 0x73e   :  { %v11842_v9 = vadd.f32 %v4815_v32, %v4773_v47  ;;  %v4838_v57 = vmul.f32 %v11840_v6, %v11840_v6 }
 0x73f   :  { %v4817_v43 = vpop.f32.mrf.mxu1  ;;  %v4890_v32 = vunpack.c.0.s8 %v4889_v15 }
 0x740   :  { %v11844_v26 = vadd.f32 %v4817_v43, %v4775_v35  ;;  %v4839_v10 = vmul.f32 %v11842_v9, %v11842_v9 }
 0x741   :  { %v4819_v29 = vpop.f32.mrf.mxu1 }
 0x742   :  { %v4822_v8 = vadd.f32 %v11844_v26, %v11840_v6  ;;  %v4840_v44 = vmul.f32 %v11844_v26, %v11844_v26  ;;  %v11852_v42 = vadd.f32 %v4819_v29, %v4777_v62 }
 0x744   :  { %v4823_v33 = vrot.slane %v4822_v8, 4  ;;  %v4842_v0 = vadd.f32 %v4840_v44, %v4838_v57  ;;  %v4829_v52 = vadd.f32 %v11852_v42, %v11842_v9  ;;  %v4841_v23 = vmul.f32 %v11852_v42, %v11852_v42 }
 0x745   :  { %v4893_v57 = vsub.s32 %v4890_v32, %v13403_v17  ;;  %v13406_v32 = vld [vmem:[#allocation241_spill] sm:$0xff] }
 0x746   :  { %v4824_v22 = vadd.f32 %v4823_v33, %v4822_v8  ;;  %v4843_v60 = vrot.slane %v4842_v0, 4  ;;  %v4830_v28 = vrot.slane %v4829_v52, 4  ;;  %v4849_v51 = vadd.f32 %v4841_v23, %v4839_v10  ;;  %v4882_v10 = vld [vmem:[%s12461_s10] sm:$0x3] }
 0x748   :  { %v4825_v53 = vrot.slane %v4824_v22, 2  ;;  %v4844_v12 = vadd.f32 %v4843_v60, %v4842_v0  ;;  %v4831_v13 = vadd.f32 %v4830_v28, %v4829_v52  ;;  %v4850_v11 = vrot.slane %v4849_v51, 4 }
 0x74a   :  { %v4826_v27 = vadd.f32 %v4825_v53, %v4824_v22  ;;  %v4845_v45 = vrot.slane %v4844_v12, 2  ;;  %v4832_v38 = vrot.slane %v4831_v13, 2  ;;  %v4851_v34 = vadd.f32 %v4850_v11, %v4849_v51 }
 0x74c   :  { %v4827_v24 = vrot.slane %v4826_v27, 1  ;;  %v4846_v37 = vadd.f32 %v4845_v45, %v4844_v12  ;;  %v4833_v36 = vadd.f32 %v4832_v38, %v4831_v13  ;;  %v4852_v54 = vrot.slane %v4851_v34, 2 }
 0x74e   :  { %v4828_v48 = vadd.f32 %v4827_v24, %v4826_v27  ;;  %v4847_v30 = vrot.slane %v4846_v37, 1  ;;  %v4834_v1 = vrot.slane %v4833_v36, 1  ;;  %v4853_v4 = vadd.f32 %v4852_v54, %v4851_v34 }
 0x750   :  { %v4836_v55 = vmul.f32 0.0625, %v4828_v48  ;;  %v4848_v31 = vadd.f32 %v4847_v30, %v4846_v37  ;;  %v4835_v18 = vadd.f32 %v4834_v1, %v4833_v36  ;;  %v4854_v50 = vrot.slane %v4853_v4, 1  ;;  %v7445_v48 = vld [vmem:[%s12462_s11 + $0x4] sm:$0xf]  ;;  %v7447_v30 = vld [vmem:[%s12462_s11 + $0x8] sm:$0xf] }
 0x751   :  { %v7449_v1 = vld [vmem:[%s12462_s11 + $0xc] sm:$0xf] }
 0x752   :  { %v4856_v20 = vmul.f32 0.0625, %v4848_v31  ;;  %v4858_v56 = vmul.f32 %v4836_v55, %v4836_v55  ;;  %v4837_v49 = vmul.f32 0.0625, %v4835_v18  ;;  %v4855_v2 = vadd.f32 %v4854_v50, %v4853_v4 }
 0x754   :  { %v4860_v3 = vsub.f32 %v4856_v20, %v4858_v56  ;;  %v4857_v16 = vmul.f32 0.0625, %v4855_v2  ;;  %v4859_v63 = vmul.f32 %v4837_v49, %v4837_v49 }
 0x756   :  { %v4862_v19 = vmax.f32 %v4860_v3, 0.0  ;;  %v4861_v40 = vsub.f32 %v4857_v16, %v4859_v63 }
 0x758   :  { %v4864_v5 = vadd.f32 1e-05, %v4862_v19  ;;  %v4863_v25 = vmax.f32 %v4861_v40, 0.0 }
 0x75a   :  { %8253 = vrsqrt.f32 %v4864_v5  ;;  %v4865_v21 = vadd.f32 1e-05, %v4863_v25 }
 0x75c   :  { %8255 = vrsqrt.f32 %v4865_v21 }
 0x767   :  { %v8254_v47 = vpop.eup %8253 }
 0x768   :  { %v4880_v7 = vmul.f32 %v8254_v47, %v4873_v39  ;;  %v13405_v47 = vld [vmem:[#allocation175_spill] sm:$0xff] }
 0x769   :  { %v8256_v35 = vpop.eup %8255 }
 0x76a   :  { %v4881_v43 = vmul.f32 %v8256_v35, %v4877_v46  ;;  %v4883_v62 = vmul.f32 %v4880_v7, %v4836_v55  ;;  %v4907_v33 = vrot.slane %v4880_v7, %v10538_v59  ;;  %v13404_v46 = vld [vmem:[#allocation177_spill] sm:$0xff]  ;;  %v13407_v35 = vld [vmem:[#allocation239_spill] sm:$0xff] }
 0x76b   :  { %v7480_v7 = vcombine.high %v13405_v47, %v13404_v46 }
 0x76c   :  { %v4884_v29 = vmul.f32 %v4881_v43, %v4837_v49  ;;  %v4911_v52 = vrot.slane %v4881_v43, %v10538_v59  ;;  %v4912_v22 = vmul.f32 %v4907_v33, %v11840_v6  ;;  %v4914_v60 = vmul.f32 %v4907_v33, %v11844_v26 }
 0x76d   :  { %v7544_v43 = vcombine.high %v13407_v35, %v13406_v32 }
 0x76e   :  { %v4887_v8 = vcombine.low %v4883_v62, %v4884_v29  ;;  %v4913_v28 = vmul.f32 %v4911_v52, %v11842_v9  ;;  %v4915_v51 = vmul.f32 %v4911_v52, %v11852_v42  ;;  %v7479_v62 = vcombine.low %v13405_v47, %v13404_v46 }
 0x76f   :  { %v7543_v29 = vcombine.low %v13407_v35, %v13406_v32 }
 0x770   :  { %v4894_v44 = vrot.slane %v4887_v8, %v4893_v57 }
 0x772   :  { %v4901_v0 = vrot.slane %v4894_v44, %v4893_v57 }
 0x774   :  { %v4903_v23 = vsub.f32 %v4882_v10, %v4901_v0 }
 0x776   :  { %v4924_v53 = vrot.slane %v4903_v23, %v4876_v61  ;;  %v4920_v12 = vrot.slane %v4903_v23, %v10538_v59  ;;  %v4945_v59 = vld [vmem:[%s12462_s11] sm:$0xf] }
 0x778   :  { %v4928_v13 = vadd.f32 %v4924_v53, %v4913_v28  ;;  %v4930_v11 = vadd.f32 %v4924_v53, %v4915_v51  ;;  %v4927_v27 = vadd.f32 %v4920_v12, %v4912_v22  ;;  %v4929_v45 = vadd.f32 %v4920_v12, %v4914_v60 }
 0x77a   :  { %vm4932_vm2 = vcmp.gt.f32.partialorder %v4928_v13, 0.0  ;;  %vm4934_vm4 = vcmp.gt.f32.partialorder %v4930_v11, 0.0  ;;  %v4936_v38 = vmul.f32 0.2, %v4928_v13  ;;  %v4938_v34 = vmul.f32 0.2, %v4930_v11 }
 0x77b   :  { %vm4931_vm5 = vcmp.gt.f32.partialorder %v4927_v27, 0.0  ;;  %vm4933_vm6 = vcmp.gt.f32.partialorder %v4929_v45, 0.0  ;;  %v4935_v6 = vmul.f32 0.2, %v4927_v27  ;;  %v4937_v24 = vmul.f32 0.2, %v4929_v45 }
 0x77c   :  { %v4940_v26 = vsel %vm4932_vm2, %v4928_v13, %v4936_v38  ;;  %v4942_v37 = vsel %vm4934_vm4, %v4930_v11, %v4938_v34 }
 0x77d   :  { %v4944_v9 = vpack.c.bf16 %v4942_v37, %v4940_v26  ;;  %v4939_v36 = vsel %vm4931_vm5, %v4927_v27, %v4935_v6  ;;  %v4941_v42 = vsel %vm4933_vm6, %v4929_v45, %v4937_v24 }
 0x77e   :  { %v4943_v54 = vpack.c.bf16 %v4941_v42, %v4939_v36 }
 0x77f   :  { %4964 = vmatprep.subr.bf16.mxu0 %v4944_v9 }
 0x780   :  { %4965 = vmatpush1.bf16.msra.mxu0 %v4943_v54 }
 0x781   :  { %5010 = vmatprep.subr.bf16.mxu0 %v4944_v9 }
 0x783   :  { %7444 = vmatmul.mubr.msk.bf16.vlgmr.msra.gmra.mxu0 %vm4946_vm7, %v4945_v59 }
 0x784   :  { %5011 = vmatpush1.bf16.msra.mxu0 %v4943_v54  ;;  %5028 = vmatprep.mubr.bf16.mxu0 %v13390_v41 }
 0x785   :  { %5056 = vmatprep.subr.bf16.mxu0 %v4944_v9 }
 0x78b   :  { %7446 = vmatmul.mubr.msk.bf16.vlgmr.msra.gmra.mxu0 %vm4946_vm7, %v7445_v48 }
 0x78c   :  { %5057 = vmatpush1.bf16.msra.mxu0 %v4943_v54  ;;  %5074 = vmatprep.mubr.bf16.mxu0 %v13390_v41 }
 0x78d   :  { %5102 = vmatprep.subr.bf16.mxu0 %v4944_v9 }
 0x793   :  { %7448 = vmatmul.mubr.msk.bf16.vlgmr.msra.gmra.mxu0 %vm4946_vm7, %v7447_v30 }
 0x794   :  { %5103 = vmatpush1.bf16.msra.mxu0 %v4943_v54  ;;  %5120 = vmatprep.mubr.bf16.mxu0 %v13390_v41 }
 0x79b   :  { %7450 = vmatmul.mubr.msk.bf16.vlgmr.msra.gmra.mxu0 %vm4946_vm7, %v7449_v1 }
 0x843   :  { %v4984_v4 = vpop.f32.mrf.mxu0 }
 0x844   :  { %v11895_v55 = vpack.c.bf16 %v4984_v4, %v4984_v4 }
 0x845   :  { %v4986_v31 = vpop.f32.mrf.mxu0 }
 0x846   :  { %v11897_v18 = vpack.c.bf16 %v4986_v31, %v4986_v31 }
 0x847   :  { %v4988_v50 = vpop.f32.mrf.mxu0 }
 0x848   :  { %6709 = vmatprep.mubr.bf16.mxu1 %v11897_v18 }
 0x849   :  { %v4989_v20 = vpop.f32.mrf.mxu0 }
 0x84b   :  { %v5030_v56 = vpop.f32.mrf.mxu0 }
 0x84c   :  { %v11899_v49 = vpack.c.bf16 %v5030_v56, %v5030_v56 }
 0x84d   :  { %v5032_v2 = vpop.f32.mrf.mxu0 }
 0x84e   :  { %v11901_v3 = vpack.c.bf16 %v5032_v2, %v5032_v2 }
 0x84f   :  { %v5034_v41 = vpop.f32.mrf.mxu0 }
 0x851   :  { %v5035_v16 = vpop.f32.mrf.mxu0 }
 0x853   :  { %v5076_v63 = vpop.f32.mrf.mxu0 }
 0x854   :  { %v11903_v19 = vpack.c.bf16 %v5076_v63, %v5076_v63 }
 0x855   :  { %v5078_v40 = vpop.f32.mrf.mxu0 }
 0x856   :  { %v11905_v5 = vpack.c.bf16 %v5078_v40, %v5078_v40 }
 0x857   :  { %v5080_v25 = vpop.f32.mrf.mxu0 }
 0x859   :  { %v5081_v21 = vpop.f32.mrf.mxu0 }
 0x85b   :  { %v5122_v58 = vpop.f32.mrf.mxu0 }
 0x85c   :  { %v11907_v17 = vpack.c.bf16 %v5122_v58, %v5122_v58 }
 0x85d   :  { %v5124_v61 = vpop.f32.mrf.mxu0 }
 0x85e   :  { %v11909_v39 = vpack.c.bf16 %v5124_v61, %v5124_v61 }
 0x85f   :  { %v5126_v14 = vpop.f32.mrf.mxu0 }
 0x861   :  { %v5127_v15 = vpop.f32.mrf.mxu0 }
 0x862   :  { %8259 = dma.done.wait [#allocation4 + $0x1], 32768 }
 0x863   :  { %8260 = vsyncadd [#allocation4 + $0x1], 4294934528  ;;  %v13408_v57 = vld [vmem:[#allocation173_spill] sm:$0xff]  ;;  %v13409_v8 = vld [vmem:[#allocation171_spill] sm:$0xff]  ;;  %6750 = vmatprep.mubr.bf16.mxu0 %v11901_v3  ;;  %6677 = vmatprep.subr.bf16.mxu1 %v7480_v7 }
 0x864   :  { %v7476_v44 = vcombine.high %v13409_v8, %v13408_v57  ;;  %v13410_v10 = vld [vmem:[#allocation237_spill] sm:$0xff]  ;;  %v13411_v33 = vld [vmem:[#allocation235_spill] sm:$0xff]  ;;  %6718 = vmatprep.subr.bf16.mxu0 %v7544_v43  ;;  %6678 = vmatpush1.bf16.msra.mxu1 %v7479_v62  ;;  %v7475_v52 = vcombine.low %v13409_v8, %v13408_v57 }
 0x865   :  { %v7540_v0 = vcombine.high %v13411_v33, %v13410_v10  ;;  %6719 = vmatpush1.bf16.msra.mxu0 %v7543_v29  ;;  %v7539_v23 = vcombine.low %v13411_v33, %v13410_v10  ;;  %v13412_v22 = vld [vmem:[#allocation169_spill] sm:$0xff]  ;;  %v13413_v60 = vld [vmem:[#allocation167_spill] sm:$0xff] }
 0x866   :  { %6679 = vmatprep.subr.bf16.mxu1 %v7476_v44  ;;  %v7472_v28 = vcombine.high %v13413_v60, %v13412_v22  ;;  %v13414_v51 = vld [vmem:[#allocation233_spill] sm:$0xff]  ;;  %v13415_v53 = vld [vmem:[#allocation231_spill] sm:$0xff]  ;;  %v7471_v13 = vcombine.low %v13413_v60, %v13412_v22 }
 0x867   :  { %6720 = vmatprep.subr.bf16.mxu0 %v7540_v0  ;;  %v7536_v12 = vcombine.high %v13415_v53, %v13414_v51  ;;  %v7535_v11 = vcombine.low %v13415_v53, %v13414_v51  ;;  %v13416_v27 = vld [vmem:[#allocation165_spill] sm:$0xff]  ;;  %v13417_v45 = vld [vmem:[#allocation163_spill] sm:$0xff] }
 0x868   :  { %6680 = vmatpush1.bf16.msra.mxu1 %v7475_v52  ;;  %v7468_v38 = vcombine.high %v13417_v45, %v13416_v27  ;;  %v13418_v34 = vld [vmem:[#allocation229_spill] sm:$0xff]  ;;  %v13419_v6 = vld [vmem:[#allocation227_spill] sm:$0xff]  ;;  %v7467_v26 = vcombine.low %v13417_v45, %v13416_v27 }
 0x869   :  { %6721 = vmatpush1.bf16.msra.mxu0 %v7539_v23  ;;  %6681 = vmatprep.subr.bf16.mxu1 %v7472_v28  ;;  %v7532_v24 = vcombine.high %v13419_v6, %v13418_v34  ;;  %v7531_v37 = vcombine.low %v13419_v6, %v13418_v34  ;;  %v13420_v9 = vld [vmem:[#allocation161_spill] sm:$0xff]  ;;  %v13421_v36 = vld [vmem:[#allocation159_spill] sm:$0xff] }
 0x86a   :  { %6722 = vmatprep.subr.bf16.mxu0 %v7536_v12  ;;  %v7464_v42 = vcombine.high %v13421_v36, %v13420_v9  ;;  %v13422_v54 = vld [vmem:[#allocation225_spill] sm:$0xff]  ;;  %v13423_v59 = vld [vmem:[#allocation223_spill] sm:$0xff]  ;;  %v7463_v30 = vcombine.low %v13421_v36, %v13420_v9 }
 0x86b   :  { %v7528_v48 = vcombine.high %v13423_v59, %v13422_v54  ;;  %v7527_v1 = vcombine.low %v13423_v59, %v13422_v54  ;;  %v13424_v4 = vld [vmem:[#allocation157_spill] sm:$0xff]  ;;  %v13425_v31 = vld [vmem:[#allocation155_spill] sm:$0xff] }
 0x86c   :  { %6682 = vmatpush1.bf16.msra.mxu1 %v7471_v13  ;;  %v7460_v50 = vcombine.high %v13425_v31, %v13424_v4  ;;  %v13426_v20 = vld [vmem:[#allocation221_spill] sm:$0xff]  ;;  %v13427_v56 = vld [vmem:[#allocation219_spill] sm:$0xff]  ;;  %v7459_v41 = vcombine.low %v13425_v31, %v13424_v4 }
 0x86d   :  { %6723 = vmatpush1.bf16.msra.mxu0 %v7535_v11  ;;  %6683 = vmatprep.subr.bf16.mxu1 %v7468_v38  ;;  %v7524_v2 = vcombine.high %v13427_v56, %v13426_v20  ;;  %v7523_v16 = vcombine.low %v13427_v56, %v13426_v20  ;;  %v13428_v63 = vld [vmem:[#allocation153_spill] sm:$0xff]  ;;  %v13429_v40 = vld [vmem:[#allocation151_spill] sm:$0xff] }
 0x86e   :  { %6724 = vmatprep.subr.bf16.mxu0 %v7532_v24  ;;  %v7456_v25 = vcombine.high %v13429_v40, %v13428_v63  ;;  %v13430_v21 = vld [vmem:[#allocation217_spill] sm:$0xff]  ;;  %v13431_v58 = vld [vmem:[#allocation215_spill] sm:$0xff]  ;;  %v7455_v14 = vcombine.low %v13429_v40, %v13428_v63 }
 0x86f   :  { %v7520_v61 = vcombine.high %v13431_v58, %v13430_v21  ;;  %v7519_v15 = vcombine.low %v13431_v58, %v13430_v21  ;;  %v13432_v46 = vld [vmem:[#allocation149_spill] sm:$0xff]  ;;  %v13433_v47 = vld [vmem:[#allocation147_spill] sm:$0xff] }
 0x870   :  { %6684 = vmatpush1.bf16.msra.mxu1 %v7467_v26  ;;  %v7452_v7 = vcombine.high %v13433_v47, %v13432_v46  ;;  %v13434_v32 = vld [vmem:[#allocation213_spill] sm:$0xff]  ;;  %v13435_v35 = vld [vmem:[#allocation211_spill] sm:$0xff]  ;;  %v7451_v62 = vcombine.low %v13433_v47, %v13432_v46 }
 0x871   :  { %6725 = vmatpush1.bf16.msra.mxu0 %v7531_v37  ;;  %6685 = vmatprep.subr.bf16.mxu1 %v7464_v42  ;;  %v7516_v43 = vcombine.high %v13435_v35, %v13434_v32  ;;  %v7515_v29 = vcombine.low %v13435_v35, %v13434_v32  ;;  %v13436_v57 = vld [vmem:[#allocation209_spill] sm:$0xff]  ;;  %v13437_v8 = vld [vmem:[#allocation207_spill] sm:$0xff] }
 0x872   :  { %6726 = vmatprep.subr.bf16.mxu0 %v7528_v48  ;;  %v7512_v44 = vcombine.high %v13437_v8, %v13436_v57  ;;  %v13438_v10 = vld [vmem:[#allocation273_spill] sm:$0xff]  ;;  %v13439_v33 = vld [vmem:[#allocation271_spill] sm:$0xff]  ;;  %v7511_v52 = vcombine.low %v13437_v8, %v13436_v57 }
 0x873   :  { %v7576_v0 = vcombine.high %v13439_v33, %v13438_v10  ;;  %v7575_v23 = vcombine.low %v13439_v33, %v13438_v10  ;;  %v13440_v22 = vld [vmem:[#allocation205_spill] sm:$0xff]  ;;  %v13441_v60 = vld [vmem:[#allocation203_spill] sm:$0xff] }
 0x874   :  { %6686 = vmatpush1.bf16.msra.mxu1 %v7463_v30  ;;  %v7508_v28 = vcombine.high %v13441_v60, %v13440_v22  ;;  %v13442_v51 = vld [vmem:[#allocation269_spill] sm:$0xff]  ;;  %v13443_v53 = vld [vmem:[#allocation267_spill] sm:$0xff]  ;;  %v7507_v13 = vcombine.low %v13441_v60, %v13440_v22 }
 0x875   :  { %6727 = vmatpush1.bf16.msra.mxu0 %v7527_v1  ;;  %6687 = vmatprep.subr.bf16.mxu1 %v7460_v50  ;;  %v7572_v12 = vcombine.high %v13443_v53, %v13442_v51  ;;  %v7571_v11 = vcombine.low %v13443_v53, %v13442_v51  ;;  %v13444_v27 = vld [vmem:[#allocation201_spill] sm:$0xff]  ;;  %v13445_v45 = vld [vmem:[#allocation199_spill] sm:$0xff] }
 0x876   :  { %6728 = vmatprep.subr.bf16.mxu0 %v7524_v2  ;;  %v7504_v38 = vcombine.high %v13445_v45, %v13444_v27  ;;  %v13446_v34 = vld [vmem:[#allocation265_spill] sm:$0xff]  ;;  %v13447_v6 = vld [vmem:[#allocation263_spill] sm:$0xff]  ;;  %v7503_v26 = vcombine.low %v13445_v45, %v13444_v27 }
 0x877   :  { %v7568_v24 = vcombine.high %v13447_v6, %v13446_v34  ;;  %v7567_v37 = vcombine.low %v13447_v6, %v13446_v34  ;;  %v13448_v9 = vld [vmem:[#allocation197_spill] sm:$0xff]  ;;  %v13449_v36 = vld [vmem:[#allocation195_spill] sm:$0xff] }
 0x878   :  { %6688 = vmatpush1.bf16.msra.mxu1 %v7459_v41  ;;  %v7500_v42 = vcombine.high %v13449_v36, %v13448_v9  ;;  %v13450_v54 = vld [vmem:[#allocation261_spill] sm:$0xff]  ;;  %v13451_v59 = vld [vmem:[#allocation259_spill] sm:$0xff]  ;;  %v7499_v30 = vcombine.low %v13449_v36, %v13448_v9 }
 0x879   :  { %6729 = vmatpush1.bf16.msra.mxu0 %v7523_v16  ;;  %6689 = vmatprep.subr.bf16.mxu1 %v7456_v25  ;;  %v7564_v48 = vcombine.high %v13451_v59, %v13450_v54  ;;  %v7563_v1 = vcombine.low %v13451_v59, %v13450_v54  ;;  %v13452_v4 = vld [vmem:[#allocation193_spill] sm:$0xff]  ;;  %v13453_v31 = vld [vmem:[#allocation191_spill] sm:$0xff] }
 0x87a   :  { %6730 = vmatprep.subr.bf16.mxu0 %v7520_v61  ;;  %v7496_v50 = vcombine.high %v13453_v31, %v13452_v4  ;;  %v13454_v20 = vld [vmem:[#allocation257_spill] sm:$0xff]  ;;  %v13455_v56 = vld [vmem:[#allocation255_spill] sm:$0xff]  ;;  %v7495_v41 = vcombine.low %v13453_v31, %v13452_v4 }
 0x87b   :  { %v7560_v2 = vcombine.high %v13455_v56, %v13454_v20  ;;  %v7559_v16 = vcombine.low %v13455_v56, %v13454_v20  ;;  %v13456_v63 = vld [vmem:[#allocation189_spill] sm:$0xff]  ;;  %v13457_v40 = vld [vmem:[#allocation187_spill] sm:$0xff] }
 0x87c   :  { %6690 = vmatpush1.bf16.msra.mxu1 %v7455_v14  ;;  %v7492_v25 = vcombine.high %v13457_v40, %v13456_v63  ;;  %v13458_v21 = vld [vmem:[#allocation253_spill] sm:$0xff]  ;;  %v13459_v58 = vld [vmem:[#allocation251_spill] sm:$0xff]  ;;  %v7491_v14 = vcombine.low %v13457_v40, %v13456_v63 }
 0x87d   :  { %6731 = vmatpush1.bf16.msra.mxu0 %v7519_v15  ;;  %6691 = vmatprep.subr.bf16.mxu1 %v7452_v7  ;;  %v7556_v61 = vcombine.high %v13459_v58, %v13458_v21  ;;  %v7555_v15 = vcombine.low %v13459_v58, %v13458_v21  ;;  %v13460_v46 = vld [vmem:[#allocation185_spill] sm:$0xff]  ;;  %v13461_v47 = vld [vmem:[#allocation183_spill] sm:$0xff] }
 0x87e   :  { %6732 = vmatprep.subr.bf16.mxu0 %v7516_v43  ;;  %v7488_v7 = vcombine.high %v13461_v47, %v13460_v46  ;;  %v13462_v32 = vld [vmem:[#allocation249_spill] sm:$0xff]  ;;  %v13463_v35 = vld [vmem:[#allocation247_spill] sm:$0xff] }
 0x87f   :  { %v7552_v43 = vcombine.high %v13463_v35, %v13462_v32  ;;  %v13464_v57 = vld [vmem:[#allocation181_spill] sm:$0xff]  ;;  %v13465_v8 = vld [vmem:[#allocation179_spill] sm:$0xff] }
 0x880   :  { %6692 = vmatpush1.bf16.msra.mxu1 %v7451_v62  ;;  %v7487_v62 = vcombine.low %v13461_v47, %v13460_v46  ;;  %v13466_v10 = vld [vmem:[#allocation245_spill] sm:$0xff]  ;;  %v13467_v33 = vld [vmem:[#allocation243_spill] sm:$0xff] }
 0x881   :  { %6733 = vmatpush1.bf16.msra.mxu0 %v7515_v29  ;;  %6693 = vmatprep.subr.bf16.mxu1 %v7512_v44  ;;  %v7551_v29 = vcombine.low %v13463_v35, %v13462_v32  ;;  %v7484_v44 = vcombine.high %v13465_v8, %v13464_v57  ;;  %v13468_v22 = vld [vmem:[#allocation305_spill] sm:$0xff]  ;;  %v13469_v60 = vld [vmem:[#allocation303_spill] sm:$0xff] }
 0x882   :  { %6734 = vmatprep.subr.bf16.mxu0 %v7576_v0  ;;  %v7548_v0 = vcombine.high %v13467_v33, %v13466_v10  ;;  %v13470_v51 = vld [vmem:[#allocation369_spill] sm:$0xff]  ;;  %v13471_v53 = vld [vmem:[#allocation367_spill] sm:$0xff] }
 0x883   :  { %v13472_v27 = vld [vmem:[#allocation301_spill] sm:$0xff]  ;;  %v13473_v45 = vld [vmem:[#allocation299_spill] sm:$0xff] }
 0x884   :  { %6694 = vmatpush2.bf16.msra.mxu1 %v7511_v52  ;;  %v7483_v52 = vcombine.low %v13465_v8, %v13464_v57  ;;  %v13474_v34 = vld [vmem:[#allocation365_spill] sm:$0xff]  ;;  %v13475_v6 = vld [vmem:[#allocation363_spill] sm:$0xff] }
 0x885   :  { %6735 = vmatpush2.bf16.msra.mxu0 %v7575_v23  ;;  %6695 = vmatprep.subr.bf16.mxu1 %v7508_v28  ;;  %v7547_v23 = vcombine.low %v13467_v33, %v13466_v10  ;;  %v7608_v28 = vcombine.high %v13469_v60, %v13468_v22  ;;  %v13476_v9 = vld [vmem:[#allocation297_spill] sm:$0xff]  ;;  %v13477_v36 = vld [vmem:[#allocation295_spill] sm:$0xff] }
 0x886   :  { %6736 = vmatprep.subr.bf16.mxu0 %v7572_v12  ;;  %v7672_v12 = vcombine.high %v13471_v53, %v13470_v51  ;;  %v13478_v54 = vld [vmem:[#allocation361_spill] sm:$0xff]  ;;  %v13479_v59 = vld [vmem:[#allocation359_spill] sm:$0xff] }
 0x887   :  { %v13480_v4 = vld [vmem:[#allocation293_spill] sm:$0xff]  ;;  %v13481_v31 = vld [vmem:[#allocation291_spill] sm:$0xff] }
 0x888   :  { %6696 = vmatpush2.bf16.msra.mxu1 %v7507_v13  ;;  %v7607_v13 = vcombine.low %v13469_v60, %v13468_v22  ;;  %v13482_v20 = vld [vmem:[#allocation357_spill] sm:$0xff]  ;;  %v13483_v56 = vld [vmem:[#allocation355_spill] sm:$0xff] }
 0x889   :  { %6737 = vmatpush2.bf16.msra.mxu0 %v7571_v11  ;;  %6697 = vmatprep.subr.bf16.mxu1 %v7504_v38  ;;  %v7671_v11 = vcombine.low %v13471_v53, %v13470_v51  ;;  %v7604_v38 = vcombine.high %v13473_v45, %v13472_v27  ;;  %v13484_v63 = vld [vmem:[#allocation289_spill] sm:$0xff]  ;;  %v13485_v40 = vld [vmem:[#allocation287_spill] sm:$0xff] }
 0x88a   :  { %6738 = vmatprep.subr.bf16.mxu0 %v7568_v24  ;;  %v7668_v24 = vcombine.high %v13475_v6, %v13474_v34  ;;  %v13486_v21 = vld [vmem:[#allocation353_spill] sm:$0xff]  ;;  %v13487_v58 = vld [vmem:[#allocation351_spill] sm:$0xff] }
 0x88b   :  { %v13488_v46 = vld [vmem:[#allocation285_spill] sm:$0xff]  ;;  %v13489_v47 = vld [vmem:[#allocation283_spill] sm:$0xff] }
 0x88c   :  { %6698 = vmatpush2.bf16.msra.mxu1 %v7503_v26  ;;  %v7603_v26 = vcombine.low %v13473_v45, %v13472_v27  ;;  %v13490_v32 = vld [vmem:[#allocation349_spill] sm:$0xff]  ;;  %v13491_v35 = vld [vmem:[#allocation347_spill] sm:$0xff] }
 0x88d   :  { %6739 = vmatpush2.bf16.msra.mxu0 %v7567_v37  ;;  %6699 = vmatprep.subr.bf16.mxu1 %v7500_v42  ;;  %v7667_v37 = vcombine.low %v13475_v6, %v13474_v34  ;;  %v7600_v42 = vcombine.high %v13477_v36, %v13476_v9  ;;  %v13492_v57 = vld [vmem:[#allocation281_spill] sm:$0xff]  ;;  %v13493_v8 = vld [vmem:[#allocation279_spill] sm:$0xff] }
 0x88e   :  { %6740 = vmatprep.subr.bf16.mxu0 %v7564_v48  ;;  %v7664_v48 = vcombine.high %v13479_v59, %v13478_v54  ;;  %v13494_v10 = vld [vmem:[#allocation345_spill] sm:$0xff]  ;;  %v13495_v33 = vld [vmem:[#allocation343_spill] sm:$0xff] }
 0x88f   :  { %v13496_v22 = vld [vmem:[#allocation277_spill] sm:$0xff]  ;;  %v13497_v60 = vld [vmem:[#allocation275_spill] sm:$0xff] }
 0x890   :  { %6700 = vmatpush2.bf16.msra.mxu1 %v7499_v30  ;;  %v7599_v30 = vcombine.low %v13477_v36, %v13476_v9  ;;  %v13498_v51 = vld [vmem:[#allocation341_spill] sm:$0xff]  ;;  %v13499_v53 = vld [vmem:[#allocation339_spill] sm:$0xff] }
 0x891   :  { %6741 = vmatpush2.bf16.msra.mxu0 %v7563_v1  ;;  %6701 = vmatprep.subr.bf16.mxu1 %v7496_v50  ;;  %v7663_v1 = vcombine.low %v13479_v59, %v13478_v54  ;;  %v7596_v50 = vcombine.high %v13481_v31, %v13480_v4  ;;  %v13500_v27 = vld [vmem:[#allocation337_spill] sm:$0xff]  ;;  %v13501_v45 = vld [vmem:[#allocation335_spill] sm:$0xff] }
 0x892   :  { %6742 = vmatprep.subr.bf16.mxu0 %v7560_v2  ;;  %v7660_v2 = vcombine.high %v13483_v56, %v13482_v20  ;;  %v13502_v34 = vld [vmem:[#allocation401_spill] sm:$0xff]  ;;  %v13503_v6 = vld [vmem:[#allocation399_spill] sm:$0xff] }
 0x893   :  { %v13504_v9 = vld [vmem:[#allocation333_spill] sm:$0xff]  ;;  %v13505_v36 = vld [vmem:[#allocation331_spill] sm:$0xff] }
 0x894   :  { %6702 = vmatpush2.bf16.msra.mxu1 %v7495_v41  ;;  %v7595_v41 = vcombine.low %v13481_v31, %v13480_v4  ;;  %v13506_v54 = vld [vmem:[#allocation397_spill] sm:$0xff]  ;;  %v13507_v59 = vld [vmem:[#allocation395_spill] sm:$0xff] }
 0x895   :  { %6743 = vmatpush2.bf16.msra.mxu0 %v7559_v16  ;;  %6703 = vmatprep.subr.bf16.mxu1 %v7492_v25  ;;  %v7659_v16 = vcombine.low %v13483_v56, %v13482_v20  ;;  %v7592_v25 = vcombine.high %v13485_v40, %v13484_v63  ;;  %v13508_v4 = vld [vmem:[#allocation329_spill] sm:$0xff]  ;;  %v13509_v31 = vld [vmem:[#allocation327_spill] sm:$0xff] }
 0x896   :  { %6744 = vmatprep.subr.bf16.mxu0 %v7556_v61  ;;  %v7656_v61 = vcombine.high %v13487_v58, %v13486_v21  ;;  %v13510_v20 = vld [vmem:[#allocation393_spill] sm:$0xff]  ;;  %v13511_v56 = vld [vmem:[#allocation391_spill] sm:$0xff] }
 0x898   :  { %6704 = vmatpush2.bf16.msra.mxu1 %v7491_v14  ;;  %v7591_v14 = vcombine.low %v13485_v40, %v13484_v63  ;;  %v13512_v63 = vld [vmem:[#allocation325_spill] sm:$0xff]  ;;  %v13513_v40 = vld [vmem:[#allocation323_spill] sm:$0xff] }
 0x899   :  { %6745 = vmatpush2.bf16.msra.mxu0 %v7555_v15  ;;  %6705 = vmatprep.subr.bf16.mxu1 %v7488_v7  ;;  %v7655_v15 = vcombine.low %v13487_v58, %v13486_v21  ;;  %v7588_v7 = vcombine.high %v13489_v47, %v13488_v46  ;;  %v13514_v21 = vld [vmem:[#allocation389_spill] sm:$0xff]  ;;  %v13515_v58 = vld [vmem:[#allocation387_spill] sm:$0xff] }
 0x89a   :  { %6746 = vmatprep.subr.bf16.mxu0 %v7552_v43  ;;  %v7652_v43 = vcombine.high %v13491_v35, %v13490_v32 }
 0x89c   :  { %6706 = vmatpush2.bf16.msra.mxu1 %v7487_v62  ;;  %v7587_v62 = vcombine.low %v13489_v47, %v13488_v46  ;;  %v13516_v46 = vld [vmem:[#allocation321_spill] sm:$0xff]  ;;  %v13517_v47 = vld [vmem:[#allocation319_spill] sm:$0xff] }
 0x89d   :  { %6747 = vmatpush2.bf16.msra.mxu0 %v7551_v29  ;;  %6707 = vmatprep.subr.bf16.mxu1 %v7484_v44  ;;  %v7651_v29 = vcombine.low %v13491_v35, %v13490_v32  ;;  %v7584_v44 = vcombine.high %v13493_v8, %v13492_v57  ;;  %v13518_v32 = vld [vmem:[#allocation385_spill] sm:$0xff]  ;;  %v13519_v35 = vld [vmem:[#allocation383_spill] sm:$0xff] }
 0x89e   :  { %6748 = vmatprep.subr.bf16.mxu0 %v7548_v0  ;;  %v7648_v0 = vcombine.high %v13495_v33, %v13494_v10 }
 0x8a0   :  { %6708 = vmatpush2.bf16.msra.mxu1 %v7483_v52  ;;  %v7583_v52 = vcombine.low %v13493_v8, %v13492_v57  ;;  %v13520_v57 = vld [vmem:[#allocation317_spill] sm:$0xff]  ;;  %v13521_v8 = vld [vmem:[#allocation315_spill] sm:$0xff] }
 0x8a1   :  { %6749 = vmatpush2.bf16.msra.mxu0 %v7547_v23  ;;  %6759 = vmatprep.subr.bf16.mxu1 %v7608_v28  ;;  %v7647_v23 = vcombine.low %v13495_v33, %v13494_v10  ;;  %v7580_v28 = vcombine.high %v13497_v60, %v13496_v22  ;;  %v13522_v10 = vld [vmem:[#allocation381_spill] sm:$0xff]  ;;  %v13523_v33 = vld [vmem:[#allocation379_spill] sm:$0xff] }
 0x8a2   :  { %6800 = vmatprep.subr.bf16.mxu0 %v7672_v12  ;;  %v7644_v12 = vcombine.high %v13499_v53, %v13498_v51 }
 0x8a3   :  { %6710 = vmatmul.mubr.bf16.vlgmr.msra.gmra.mxu1 %v11895_v55 }
 0x8a4   :  { %6751 = vmatmul.mubr.bf16.vlgmr.msra.gmra.mxu0 %v11899_v49  ;;  %6760 = vmatpush1.bf16.msra.mxu1 %v7607_v13  ;;  %v7579_v13 = vcombine.low %v13497_v60, %v13496_v22  ;;  %v13524_v22 = vld [vmem:[#allocation313_spill] sm:$0xff]  ;;  %v13525_v60 = vld [vmem:[#allocation311_spill] sm:$0xff] }
 0x8a5   :  { %6801 = vmatpush1.bf16.msra.mxu0 %v7671_v11  ;;  %6761 = vmatprep.subr.bf16.mxu1 %v7604_v38  ;;  %v7643_v11 = vcombine.low %v13499_v53, %v13498_v51  ;;  %v7640_v38 = vcombine.high %v13501_v45, %v13500_v27  ;;  %v13526_v51 = vld [vmem:[#allocation377_spill] sm:$0xff]  ;;  %v13527_v53 = vld [vmem:[#allocation375_spill] sm:$0xff] }
 0x8a6   :  { %6802 = vmatprep.subr.bf16.mxu0 %v7668_v24  ;;  %6791 = vmatprep.mubr.bf16.mxu1 %v11905_v5  ;;  %v7704_v24 = vcombine.high %v13503_v6, %v13502_v34 }
 0x8a7   :  { %6832 = vmatprep.mubr.bf16.mxu0 %v11909_v39 }
 0x8a8   :  { %6762 = vmatpush1.bf16.msra.mxu1 %v7603_v26  ;;  %v7639_v26 = vcombine.low %v13501_v45, %v13500_v27  ;;  %v13528_v27 = vld [vmem:[#allocation309_spill] sm:$0xff]  ;;  %v13529_v45 = vld [vmem:[#allocation307_spill] sm:$0xff] }
 0x8a9   :  { %6803 = vmatpush1.bf16.msra.mxu0 %v7667_v37  ;;  %6763 = vmatprep.subr.bf16.mxu1 %v7600_v42  ;;  %v7703_v37 = vcombine.low %v13503_v6, %v13502_v34  ;;  %v7636_v42 = vcombine.high %v13505_v36, %v13504_v9  ;;  %v13530_v34 = vld [vmem:[#allocation373_spill] sm:$0xff]  ;;  %v13531_v6 = vld [vmem:[#allocation371_spill] sm:$0xff] }
 0x8aa   :  { %6804 = vmatprep.subr.bf16.mxu0 %v7664_v48  ;;  %v7700_v48 = vcombine.high %v13507_v59, %v13506_v54 }
 0x8ac   :  { %6764 = vmatpush1.bf16.msra.mxu1 %v7599_v30  ;;  %v7635_v30 = vcombine.low %v13505_v36, %v13504_v9  ;;  %v13532_v9 = vld [vmem:[#allocation178_spill] sm:$0xff]  ;;  %v13533_v36 = vld [vmem:[#allocation176_spill] sm:$0xff] }
 0x8ad   :  { %6805 = vmatpush1.bf16.msra.mxu0 %v7663_v1  ;;  %6765 = vmatprep.subr.bf16.mxu1 %v7596_v50  ;;  %v7699_v1 = vcombine.low %v13507_v59, %v13506_v54  ;;  %v7632_v50 = vcombine.high %v13509_v31, %v13508_v4  ;;  %v13534_v54 = vld [vmem:[#allocation242_spill] sm:$0xff]  ;;  %v13535_v59 = vld [vmem:[#allocation240_spill] sm:$0xff] }
 0x8ae   :  { %6806 = vmatprep.subr.bf16.mxu0 %v7660_v2  ;;  %v7696_v2 = vcombine.high %v13511_v56, %v13510_v20 }
 0x8b0   :  { %6766 = vmatpush1.bf16.msra.mxu1 %v7595_v41  ;;  %v7631_v41 = vcombine.low %v13509_v31, %v13508_v4  ;;  %v13536_v4 = vld [vmem:[#allocation174_spill] sm:$0xff]  ;;  %v13537_v31 = vld [vmem:[#allocation172_spill] sm:$0xff] }
 0x8b1   :  { %6807 = vmatpush1.bf16.msra.mxu0 %v7659_v16  ;;  %6767 = vmatprep.subr.bf16.mxu1 %v7592_v25  ;;  %v7695_v16 = vcombine.low %v13511_v56, %v13510_v20  ;;  %v7628_v25 = vcombine.high %v13513_v40, %v13512_v63  ;;  %v13538_v20 = vld [vmem:[#allocation238_spill] sm:$0xff]  ;;  %v13539_v56 = vld [vmem:[#allocation236_spill] sm:$0xff] }
 0x8b2   :  { %6808 = vmatprep.subr.bf16.mxu0 %v7656_v61  ;;  %v7692_v61 = vcombine.high %v13515_v58, %v13514_v21 }
 0x8b4   :  { %6768 = vmatpush1.bf16.msra.mxu1 %v7591_v14  ;;  %v7627_v14 = vcombine.low %v13513_v40, %v13512_v63  ;;  %v13540_v63 = vld [vmem:[#allocation170_spill] sm:$0xff]  ;;  %v13541_v40 = vld [vmem:[#allocation168_spill] sm:$0xff] }
 0x8b5   :  { %6809 = vmatpush1.bf16.msra.mxu0 %v7655_v15  ;;  %6769 = vmatprep.subr.bf16.mxu1 %v7588_v7  ;;  %v7691_v15 = vcombine.low %v13515_v58, %v13514_v21  ;;  %v7624_v7 = vcombine.high %v13517_v47, %v13516_v46  ;;  %v13542_v21 = vld [vmem:[#allocation234_spill] sm:$0xff]  ;;  %v13543_v58 = vld [vmem:[#allocation232_spill] sm:$0xff] }
 0x8b6   :  { %6810 = vmatprep.subr.bf16.mxu0 %v7652_v43  ;;  %v7688_v43 = vcombine.high %v13519_v35, %v13518_v32 }
 0x8b8   :  { %6770 = vmatpush1.bf16.msra.mxu1 %v7587_v62  ;;  %v7623_v62 = vcombine.low %v13517_v47, %v13516_v46  ;;  %v13544_v46 = vld [vmem:[#allocation166_spill] sm:$0xff]  ;;  %v13545_v47 = vld [vmem:[#allocation164_spill] sm:$0xff] }
 0x8b9   :  { %6811 = vmatpush1.bf16.msra.mxu0 %v7651_v29  ;;  %6771 = vmatprep.subr.bf16.mxu1 %v7584_v44  ;;  %v7687_v29 = vcombine.low %v13519_v35, %v13518_v32  ;;  %v7620_v44 = vcombine.high %v13521_v8, %v13520_v57  ;;  %v13546_v32 = vld [vmem:[#allocation230_spill] sm:$0xff]  ;;  %v13547_v35 = vld [vmem:[#allocation228_spill] sm:$0xff] }
 0x8ba   :  { %6812 = vmatprep.subr.bf16.mxu0 %v7648_v0  ;;  %v7684_v0 = vcombine.high %v13523_v33, %v13522_v10 }
 0x8bc   :  { %6772 = vmatpush1.bf16.msra.mxu1 %v7583_v52  ;;  %v7619_v52 = vcombine.low %v13521_v8, %v13520_v57  ;;  %v13550_v8 = vld [vmem:[#allocation226_spill] sm:$0xff] }
 0x8bd   :  { %6813 = vmatpush1.bf16.msra.mxu0 %v7647_v23  ;;  %6773 = vmatprep.subr.bf16.mxu1 %v7580_v28  ;;  %v7683_v23 = vcombine.low %v13523_v33, %v13522_v10  ;;  %v7616_v28 = vcombine.high %v13525_v60, %v13524_v22 }
 0x8be   :  { %6814 = vmatprep.subr.bf16.mxu0 %v7644_v12  ;;  %v7680_v12 = vcombine.high %v13527_v53, %v13526_v51 }
 0x8c0   :  { %6774 = vmatpush1.bf16.msra.mxu1 %v7579_v13  ;;  %v7615_v13 = vcombine.low %v13525_v60, %v13524_v22  ;;  %v13554_v60 = vld [vmem:[#allocation222_spill] sm:$0xff] }
 0x8c1   :  { %6815 = vmatpush1.bf16.msra.mxu0 %v7643_v11  ;;  %6775 = vmatprep.subr.bf16.mxu1 %v7640_v38  ;;  %v7679_v11 = vcombine.low %v13527_v53, %v13526_v51  ;;  %v7612_v38 = vcombine.high %v13529_v45, %v13528_v27 }
 0x8c2   :  { %6816 = vmatprep.subr.bf16.mxu0 %v7704_v24  ;;  %v7676_v24 = vcombine.high %v13531_v6, %v13530_v34 }
 0x8c4   :  { %6776 = vmatpush2.bf16.msra.mxu1 %v7639_v26  ;;  %v7611_v26 = vcombine.low %v13529_v45, %v13528_v27  ;;  %v13558_v45 = vld [vmem:[#allocation218_spill] sm:$0xff] }
 0x8c5   :  { %6817 = vmatpush2.bf16.msra.mxu0 %v7703_v37  ;;  %6777 = vmatprep.subr.bf16.mxu1 %v7636_v42  ;;  %v7675_v37 = vcombine.low %v13531_v6, %v13530_v34  ;;  %v7482_v42 = vcombine.high %v13533_v36, %v13532_v9 }
 0x8c6   :  { %6818 = vmatprep.subr.bf16.mxu0 %v7700_v48  ;;  %v7546_v48 = vcombine.high %v13535_v59, %v13534_v54 }
 0x8c8   :  { %6778 = vmatpush2.bf16.msra.mxu1 %v7635_v30  ;;  %v7481_v30 = vcombine.low %v13533_v36, %v13532_v9  ;;  %v13562_v36 = vld [vmem:[#allocation214_spill] sm:$0xff] }
 0x8c9   :  { %6819 = vmatpush2.bf16.msra.mxu0 %v7699_v1  ;;  %6779 = vmatprep.subr.bf16.mxu1 %v7632_v50  ;;  %v7545_v1 = vcombine.low %v13535_v59, %v13534_v54  ;;  %v7478_v50 = vcombine.high %v13537_v31, %v13536_v4 }
 0x8ca   :  { %6820 = vmatprep.subr.bf16.mxu0 %v7696_v2  ;;  %v7542_v2 = vcombine.high %v13539_v56, %v13538_v20 }
 0x8cc   :  { %6780 = vmatpush2.bf16.msra.mxu1 %v7631_v41  ;;  %v7477_v41 = vcombine.low %v13537_v31, %v13536_v4  ;;  %v13566_v31 = vld [vmem:[#allocation274_spill] sm:$0xff] }
 0x8cd   :  { %6821 = vmatpush2.bf16.msra.mxu0 %v7695_v16  ;;  %6781 = vmatprep.subr.bf16.mxu1 %v7628_v25  ;;  %v7541_v16 = vcombine.low %v13539_v56, %v13538_v20  ;;  %v7474_v25 = vcombine.high %v13541_v40, %v13540_v63 }
 0x8ce   :  { %6822 = vmatprep.subr.bf16.mxu0 %v7692_v61  ;;  %v7538_v61 = vcombine.high %v13543_v58, %v13542_v21 }
 0x8d0   :  { %6782 = vmatpush2.bf16.msra.mxu1 %v7627_v14  ;;  %v7473_v14 = vcombine.low %v13541_v40, %v13540_v63  ;;  %v13570_v40 = vld [vmem:[#allocation270_spill] sm:$0xff] }
 0x8d1   :  { %6823 = vmatpush2.bf16.msra.mxu0 %v7691_v15  ;;  %6783 = vmatprep.subr.bf16.mxu1 %v7624_v7  ;;  %v7537_v15 = vcombine.low %v13543_v58, %v13542_v21  ;;  %v7470_v7 = vcombine.high %v13545_v47, %v13544_v46 }
 0x8d2   :  { %6824 = vmatprep.subr.bf16.mxu0 %v7688_v43  ;;  %v7534_v43 = vcombine.high %v13547_v35, %v13546_v32 }
 0x8d4   :  { %6784 = vmatpush2.bf16.msra.mxu1 %v7623_v62  ;;  %v13548_v62 = vld [vmem:[#allocation162_spill] sm:$0xff] }
 0x8d5   :  { %6825 = vmatpush2.bf16.msra.mxu0 %v7687_v29  ;;  %6785 = vmatprep.subr.bf16.mxu1 %v7620_v44  ;;  %v13549_v29 = vld [vmem:[#allocation160_spill] sm:$0xff] }
 0x8d6   :  { %6826 = vmatprep.subr.bf16.mxu0 %v7684_v0  ;;  %v7466_v57 = vcombine.high %v13549_v29, %v13548_v62  ;;  %v13551_v44 = vld [vmem:[#allocation224_spill] sm:$0xff]  ;;  %v7465_v33 = vcombine.low %v13549_v29, %v13548_v62  ;;  %v13578_v29 = vld [vmem:[#allocation262_spill] sm:$0xff] }
 0x8d7   :  { %v7530_v10 = vcombine.high %v13551_v44, %v13550_v8  ;;  %v7529_v0 = vcombine.low %v13551_v44, %v13550_v8 }
 0x8d8   :  { %6786 = vmatpush2.bf16.msra.mxu1 %v7619_v52  ;;  %v13552_v52 = vld [vmem:[#allocation158_spill] sm:$0xff] }
 0x8d9   :  { %6827 = vmatpush2.bf16.msra.mxu0 %v7683_v23  ;;  %6787 = vmatprep.subr.bf16.mxu1 %v7616_v28  ;;  %v13553_v23 = vld [vmem:[#allocation156_spill] sm:$0xff] }
 0x8da   :  { %6828 = vmatprep.subr.bf16.mxu0 %v7680_v12  ;;  %v7462_v22 = vcombine.high %v13553_v23, %v13552_v52  ;;  %v13555_v28 = vld [vmem:[#allocation220_spill] sm:$0xff]  ;;  %v7461_v53 = vcombine.low %v13553_v23, %v13552_v52  ;;  %v13582_v23 = vld [vmem:[#allocation258_spill] sm:$0xff] }
 0x8db   :  { %v7526_v51 = vcombine.high %v13555_v28, %v13554_v60  ;;  %v7525_v12 = vcombine.low %v13555_v28, %v13554_v60 }
 0x8dc   :  { %6788 = vmatpush2.bf16.msra.mxu1 %v7615_v13  ;;  %v13556_v13 = vld [vmem:[#allocation154_spill] sm:$0xff] }
 0x8dd   :  { %6829 = vmatpush2.bf16.msra.mxu0 %v7679_v11  ;;  %6789 = vmatprep.subr.bf16.mxu1 %v7612_v38  ;;  %v13557_v11 = vld [vmem:[#allocation152_spill] sm:$0xff] }
 0x8de   :  { %6830 = vmatprep.subr.bf16.mxu0 %v7676_v24  ;;  %v7458_v27 = vcombine.high %v13557_v11, %v13556_v13  ;;  %v13559_v38 = vld [vmem:[#allocation216_spill] sm:$0xff]  ;;  %v7457_v6 = vcombine.low %v13557_v11, %v13556_v13  ;;  %v13586_v11 = vld [vmem:[#allocation254_spill] sm:$0xff] }
 0x8df   :  { %v7522_v34 = vcombine.high %v13559_v38, %v13558_v45  ;;  %v7521_v24 = vcombine.low %v13559_v38, %v13558_v45 }
 0x8e0   :  { %6790 = vmatpush2.bf16.msra.mxu1 %v7611_v26  ;;  %v13560_v26 = vld [vmem:[#allocation150_spill] sm:$0xff] }
 0x8e1   :  { %6831 = vmatpush2.bf16.msra.mxu0 %v7675_v37  ;;  %6841 = vmatprep.subr.bf16.mxu1 %v7482_v42  ;;  %v13561_v37 = vld [vmem:[#allocation148_spill] sm:$0xff] }
 0x8e2   :  { %6882 = vmatprep.subr.bf16.mxu0 %v7546_v48  ;;  %v7454_v9 = vcombine.high %v13561_v37, %v13560_v26  ;;  %v13563_v42 = vld [vmem:[#allocation212_spill] sm:$0xff]  ;;  %v7453_v59 = vcombine.low %v13561_v37, %v13560_v26  ;;  %v13590_v37 = vld [vmem:[#allocation250_spill] sm:$0xff] }
 0x8e3   :  { %6792 = vmatmul.mubr.bf16.vlgmr.msra.gmra.mxu1 %v11903_v19  ;;  %v7518_v54 = vcombine.high %v13563_v42, %v13562_v36  ;;  %v7517_v48 = vcombine.low %v13563_v42, %v13562_v36 }
 0x8e4   :  { %6833 = vmatmul.mubr.bf16.vlgmr.msra.gmra.mxu0 %v11907_v17  ;;  %6842 = vmatpush1.bf16.msra.mxu1 %v7481_v30  ;;  %v13564_v30 = vld [vmem:[#allocation210_spill] sm:$0xff] }
 0x8e5   :  { %6883 = vmatpush1.bf16.msra.mxu0 %v7545_v1  ;;  %6843 = vmatprep.subr.bf16.mxu1 %v7478_v50  ;;  %v13565_v1 = vld [vmem:[#allocation208_spill] sm:$0xff] }
 0x8e6   :  { %6884 = vmatprep.subr.bf16.mxu0 %v7542_v2  ;;  %6873 = vmatprep.mubr.bf16.mxu1 %v11897_v18  ;;  %v7469_v18 = vcombine.low %v13545_v47, %v13544_v46  ;;  %v7514_v4 = vcombine.high %v13565_v1, %v13564_v30  ;;  %v13567_v50 = vld [vmem:[#allocation272_spill] sm:$0xff]  ;;  %v7513_v56 = vcombine.low %v13565_v1, %v13564_v30  ;;  %v13574_v47 = vld [vmem:[#allocation266_spill] sm:$0xff] }
 0x8e7   :  { %6914 = vmatprep.mubr.bf16.mxu0 %v11901_v3  ;;  %v7533_v3 = vcombine.low %v13547_v35, %v13546_v32  ;;  %v7578_v20 = vcombine.high %v13567_v50, %v13566_v31  ;;  %v7577_v2 = vcombine.low %v13567_v50, %v13566_v31  ;;  %v13594_v1 = vld [vmem:[#allocation246_spill] sm:$0xff] }
 0x8e8   :  { %6844 = vmatpush1.bf16.msra.mxu1 %v7477_v41  ;;  %v13568_v41 = vld [vmem:[#allocation206_spill] sm:$0xff] }
 0x8e9   :  { %6885 = vmatpush1.bf16.msra.mxu0 %v7541_v16  ;;  %6845 = vmatprep.subr.bf16.mxu1 %v7474_v25  ;;  %v13569_v16 = vld [vmem:[#allocation204_spill] sm:$0xff] }
 0x8ea   :  { %6886 = vmatprep.subr.bf16.mxu0 %v7538_v61  ;;  %v7510_v63 = vcombine.high %v13569_v16, %v13568_v41  ;;  %v13571_v25 = vld [vmem:[#allocation268_spill] sm:$0xff]  ;;  %v7509_v58 = vcombine.low %v13569_v16, %v13568_v41  ;;  %v13598_v16 = vld [vmem:[#allocation370_spill] sm:$0xff] }
 0x8eb   :  { %v7574_v21 = vcombine.high %v13571_v25, %v13570_v40  ;;  %v7573_v61 = vcombine.low %v13571_v25, %v13570_v40 }
 0x8ec   :  { %6846 = vmatpush1.bf16.msra.mxu1 %v7473_v14  ;;  %v13572_v14 = vld [vmem:[#allocation202_spill] sm:$0xff] }
 0x8ed   :  { %6887 = vmatpush1.bf16.msra.mxu0 %v7537_v15  ;;  %6847 = vmatprep.subr.bf16.mxu1 %v7470_v7  ;;  %v13573_v15 = vld [vmem:[#allocation200_spill] sm:$0xff] }
 0x8ee   :  { %6888 = vmatprep.subr.bf16.mxu0 %v7534_v43  ;;  %v7506_v46 = vcombine.high %v13573_v15, %v13572_v14  ;;  %v13575_v7 = vld [vmem:[#allocation264_spill] sm:$0xff]  ;;  %v7505_v35 = vcombine.low %v13573_v15, %v13572_v14  ;;  %v13602_v15 = vld [vmem:[#allocation366_spill] sm:$0xff] }
 0x8ef   :  { %v7570_v32 = vcombine.high %v13575_v7, %v13574_v47  ;;  %v7569_v43 = vcombine.low %v13575_v7, %v13574_v47 }
 0x8f0   :  { %6848 = vmatpush1.bf16.msra.mxu1 %v7469_v18  ;;  %v13576_v18 = vld [vmem:[#allocation198_spill] sm:$0xff] }
 0x8f1   :  { %6889 = vmatpush1.bf16.msra.mxu0 %v7533_v3  ;;  %6849 = vmatprep.subr.bf16.mxu1 %v7466_v57  ;;  %v13577_v3 = vld [vmem:[#allocation196_spill] sm:$0xff] }
 0x8f2   :  { %6890 = vmatprep.subr.bf16.mxu0 %v7530_v10  ;;  %v7502_v62 = vcombine.high %v13577_v3, %v13576_v18  ;;  %v13579_v57 = vld [vmem:[#allocation260_spill] sm:$0xff]  ;;  %v7501_v44 = vcombine.low %v13577_v3, %v13576_v18  ;;  %v13606_v3 = vld [vmem:[#allocation362_spill] sm:$0xff] }
 0x8f3   :  { %v7566_v8 = vcombine.high %v13579_v57, %v13578_v29  ;;  %v7565_v10 = vcombine.low %v13579_v57, %v13578_v29  ;;  %v13608_v57 = vld [vmem:[#allocation294_spill] sm:$0xff] }
 0x8f4   :  { %6850 = vmatpush1.bf16.msra.mxu1 %v7465_v33  ;;  %v13580_v33 = vld [vmem:[#allocation194_spill] sm:$0xff] }
 0x8f5   :  { %6891 = vmatpush1.bf16.msra.mxu0 %v7529_v0  ;;  %6851 = vmatprep.subr.bf16.mxu1 %v7462_v22  ;;  %v13581_v0 = vld [vmem:[#allocation192_spill] sm:$0xff] }
 0x8f6   :  { %6892 = vmatprep.subr.bf16.mxu0 %v7526_v51  ;;  %v7498_v52 = vcombine.high %v13581_v0, %v13580_v33  ;;  %v13583_v22 = vld [vmem:[#allocation256_spill] sm:$0xff]  ;;  %v7497_v28 = vcombine.low %v13581_v0, %v13580_v33 }
 0x8f7   :  { %v7562_v60 = vcombine.high %v13583_v22, %v13582_v23  ;;  %v7561_v51 = vcombine.low %v13583_v22, %v13582_v23  ;;  %v13611_v33 = vld [vmem:[#allocation356_spill] sm:$0xff] }
 0x8f8   :  { %6852 = vmatpush1.bf16.msra.mxu1 %v7461_v53  ;;  %v13584_v53 = vld [vmem:[#allocation190_spill] sm:$0xff]  ;;  %v13613_v23 = vld [vmem:[#allocation288_spill] sm:$0xff] }
 0x8f9   :  { %6893 = vmatpush1.bf16.msra.mxu0 %v7525_v12  ;;  %6853 = vmatprep.subr.bf16.mxu1 %v7458_v27  ;;  %v13585_v12 = vld [vmem:[#allocation188_spill] sm:$0xff] }
 0x8fa   :  { %6894 = vmatprep.subr.bf16.mxu0 %v7522_v34  ;;  %v7494_v13 = vcombine.high %v13585_v12, %v13584_v53  ;;  %v13587_v27 = vld [vmem:[#allocation252_spill] sm:$0xff]  ;;  %v7493_v38 = vcombine.low %v13585_v12, %v13584_v53 }
 0x8fb   :  { %v7558_v45 = vcombine.high %v13587_v27, %v13586_v11  ;;  %v7557_v34 = vcombine.low %v13587_v27, %v13586_v11  ;;  %v13617_v11 = vld [vmem:[#allocation284_spill] sm:$0xff] }
 0x8fc   :  { %6854 = vmatpush1.bf16.msra.mxu1 %v7457_v6  ;;  %v13588_v6 = vld [vmem:[#allocation186_spill] sm:$0xff] }
 0x8fd   :  { %6895 = vmatpush1.bf16.msra.mxu0 %v7521_v24  ;;  %6855 = vmatprep.subr.bf16.mxu1 %v7454_v9  ;;  %v13589_v24 = vld [vmem:[#allocation184_spill] sm:$0xff] }
 0x8fe   :  { %6896 = vmatprep.subr.bf16.mxu0 %v7518_v54  ;;  %v7490_v26 = vcombine.high %v13589_v24, %v13588_v6  ;;  %v13591_v9 = vld [vmem:[#allocation248_spill] sm:$0xff]  ;;  %v7489_v42 = vcombine.low %v13589_v24, %v13588_v6 }
 0x8ff   :  { %v7554_v36 = vcombine.high %v13591_v9, %v13590_v37  ;;  %v7553_v54 = vcombine.low %v13591_v9, %v13590_v37  ;;  %v13621_v37 = vld [vmem:[#allocation280_spill] sm:$0xff] }
 0x900   :  { %6856 = vmatpush1.bf16.msra.mxu1 %v7453_v59  ;;  %v13592_v59 = vld [vmem:[#allocation182_spill] sm:$0xff] }
 0x901   :  { %6897 = vmatpush1.bf16.msra.mxu0 %v7517_v48  ;;  %6857 = vmatprep.subr.bf16.mxu1 %v7514_v4  ;;  %v13593_v48 = vld [vmem:[#allocation180_spill] sm:$0xff] }
 0x902   :  { %6898 = vmatprep.subr.bf16.mxu0 %v7578_v20  ;;  %v7486_v30 = vcombine.high %v13593_v48, %v13592_v59  ;;  %v13595_v4 = vld [vmem:[#allocation244_spill] sm:$0xff]  ;;  %v7485_v50 = vcombine.low %v13593_v48, %v13592_v59 }
 0x903   :  { %v7550_v31 = vcombine.high %v13595_v4, %v13594_v1  ;;  %v7549_v20 = vcombine.low %v13595_v4, %v13594_v1  ;;  %v13625_v1 = vld [vmem:[#allocation276_spill] sm:$0xff] }
 0x904   :  { %6858 = vmatpush2.bf16.msra.mxu1 %v7513_v56  ;;  %v13596_v56 = vld [vmem:[#allocation306_spill] sm:$0xff] }
 0x905   :  { %6899 = vmatpush2.bf16.msra.mxu0 %v7577_v2  ;;  %6859 = vmatprep.subr.bf16.mxu1 %v7510_v63  ;;  %v13597_v2 = vld [vmem:[#allocation304_spill] sm:$0xff] }
 0x906   :  { %6900 = vmatprep.subr.bf16.mxu0 %v7574_v21  ;;  %v7610_v41 = vcombine.high %v13597_v2, %v13596_v56  ;;  %v13599_v63 = vld [vmem:[#allocation368_spill] sm:$0xff]  ;;  %v7609_v25 = vcombine.low %v13597_v2, %v13596_v56 }
 0x907   :  { %v7674_v40 = vcombine.high %v13599_v63, %v13598_v16  ;;  %v7673_v21 = vcombine.low %v13599_v63, %v13598_v16  ;;  %v13629_v16 = vld [vmem:[#allocation336_spill] sm:$0xff] }
 0x908   :  { %6860 = vmatpush2.bf16.msra.mxu1 %v7509_v58  ;;  %v13600_v58 = vld [vmem:[#allocation302_spill] sm:$0xff] }
 0x909   :  { %6901 = vmatpush2.bf16.msra.mxu0 %v7573_v61  ;;  %6861 = vmatprep.subr.bf16.mxu1 %v7506_v46  ;;  %v13601_v61 = vld [vmem:[#allocation300_spill] sm:$0xff] }
 0x90a   :  { %6902 = vmatprep.subr.bf16.mxu0 %v7570_v32  ;;  %v7606_v14 = vcombine.high %v13601_v61, %v13600_v58  ;;  %v13603_v46 = vld [vmem:[#allocation364_spill] sm:$0xff]  ;;  %v7605_v7 = vcombine.low %v13601_v61, %v13600_v58 }
 0x90b   :  { %v7670_v47 = vcombine.high %v13603_v46, %v13602_v15  ;;  %v7669_v32 = vcombine.low %v13603_v46, %v13602_v15  ;;  %v13633_v15 = vld [vmem:[#allocation332_spill] sm:$0xff] }
 0x90c   :  { %6862 = vmatpush2.bf16.msra.mxu1 %v7505_v35  ;;  %v13604_v35 = vld [vmem:[#allocation298_spill] sm:$0xff] }
 0x90d   :  { %6903 = vmatpush2.bf16.msra.mxu0 %v7569_v43  ;;  %6863 = vmatprep.subr.bf16.mxu1 %v7502_v62  ;;  %v13605_v43 = vld [vmem:[#allocation296_spill] sm:$0xff] }
 0x90e   :  { %6904 = vmatprep.subr.bf16.mxu0 %v7566_v8  ;;  %v7602_v18 = vcombine.high %v13605_v43, %v13604_v35  ;;  %v13607_v62 = vld [vmem:[#allocation360_spill] sm:$0xff] }
 0x90f   :  { %v7666_v29 = vcombine.high %v13607_v62, %v13606_v3  ;;  %v13609_v8 = vld [vmem:[#allocation292_spill] sm:$0xff] }
 0x910   :  { %6864 = vmatpush2.bf16.msra.mxu1 %v7501_v44  ;;  %v7598_v44 = vcombine.high %v13609_v8, %v13608_v57 }
 0x911   :  { %6905 = vmatpush2.bf16.msra.mxu0 %v7565_v10  ;;  %6865 = vmatprep.subr.bf16.mxu1 %v7498_v52  ;;  %v13610_v10 = vld [vmem:[#allocation358_spill] sm:$0xff] }
 0x912   :  { %6906 = vmatprep.subr.bf16.mxu0 %v7562_v60  ;;  %v7662_v0 = vcombine.high %v13611_v33, %v13610_v10  ;;  %v13612_v52 = vld [vmem:[#allocation290_spill] sm:$0xff] }
 0x913   :  { %v7594_v22 = vcombine.high %v13613_v23, %v13612_v52  ;;  %v13614_v60 = vld [vmem:[#allocation354_spill] sm:$0xff]  ;;  %v7593_v53 = vcombine.low %v13613_v23, %v13612_v52 }
 0x914   :  { %6866 = vmatpush2.bf16.msra.mxu1 %v7497_v28  ;;  %v13615_v28 = vld [vmem:[#allocation352_spill] sm:$0xff] }
 0x915   :  { %6907 = vmatpush2.bf16.msra.mxu0 %v7561_v51  ;;  %6867 = vmatprep.subr.bf16.mxu1 %v7494_v13  ;;  %v7658_v51 = vcombine.high %v13615_v28, %v13614_v60  ;;  %v7657_v12 = vcombine.low %v13615_v28, %v13614_v60  ;;  %v13616_v13 = vld [vmem:[#allocation286_spill] sm:$0xff]  ;;  %v13645_v60 = vld [vmem:[#allocation320_spill] sm:$0xff] }
 0x916   :  { %6908 = vmatprep.subr.bf16.mxu0 %v7558_v45  ;;  %v7590_v27 = vcombine.high %v13617_v11, %v13616_v13  ;;  %v13618_v45 = vld [vmem:[#allocation350_spill] sm:$0xff]  ;;  %v7589_v6 = vcombine.low %v13617_v11, %v13616_v13 }
 0x918   :  { %6868 = vmatpush2.bf16.msra.mxu1 %v7493_v38  ;;  %v13619_v38 = vld [vmem:[#allocation348_spill] sm:$0xff] }
 0x919   :  { %6909 = vmatpush2.bf16.msra.mxu0 %v7557_v34  ;;  %6869 = vmatprep.subr.bf16.mxu1 %v7490_v26  ;;  %v7654_v34 = vcombine.high %v13619_v38, %v13618_v45  ;;  %v7653_v24 = vcombine.low %v13619_v38, %v13618_v45  ;;  %v13620_v26 = vld [vmem:[#allocation282_spill] sm:$0xff]  ;;  %v13649_v45 = vld [vmem:[#allocation316_spill] sm:$0xff] }
 0x91a   :  { %6910 = vmatprep.subr.bf16.mxu0 %v7554_v36  ;;  %v7586_v9 = vcombine.high %v13621_v37, %v13620_v26  ;;  %v13622_v36 = vld [vmem:[#allocation346_spill] sm:$0xff]  ;;  %v7585_v59 = vcombine.low %v13621_v37, %v13620_v26 }
 0x91c   :  { %6870 = vmatpush2.bf16.msra.mxu1 %v7489_v42  ;;  %v13623_v42 = vld [vmem:[#allocation344_spill] sm:$0xff] }
 0x91d   :  { %6911 = vmatpush2.bf16.msra.mxu0 %v7553_v54  ;;  %6871 = vmatprep.subr.bf16.mxu1 %v7486_v30  ;;  %v7650_v54 = vcombine.high %v13623_v42, %v13622_v36  ;;  %v7649_v48 = vcombine.low %v13623_v42, %v13622_v36  ;;  %v13624_v30 = vld [vmem:[#allocation278_spill] sm:$0xff]  ;;  %v13653_v36 = vld [vmem:[#allocation312_spill] sm:$0xff] }
 0x91e   :  { %6912 = vmatprep.subr.bf16.mxu0 %v7550_v31  ;;  %v7582_v4 = vcombine.high %v13625_v1, %v13624_v30  ;;  %v13626_v31 = vld [vmem:[#allocation342_spill] sm:$0xff]  ;;  %v7581_v56 = vcombine.low %v13625_v1, %v13624_v30 }
 0x920   :  { %6872 = vmatpush2.bf16.msra.mxu1 %v7485_v50  ;;  %v13627_v50 = vld [vmem:[#allocation340_spill] sm:$0xff] }
 0x921   :  { %6913 = vmatpush2.bf16.msra.mxu0 %v7549_v20  ;;  %6923 = vmatprep.subr.bf16.mxu1 %v7610_v41  ;;  %v7646_v20 = vcombine.high %v13627_v50, %v13626_v31  ;;  %v7645_v2 = vcombine.low %v13627_v50, %v13626_v31  ;;  %v13628_v41 = vld [vmem:[#allocation338_spill] sm:$0xff]  ;;  %v13657_v31 = vld [vmem:[#allocation308_spill] sm:$0xff] }
 0x922   :  { %6964 = vmatprep.subr.bf16.mxu0 %v7674_v40  ;;  %v7642_v63 = vcombine.high %v13629_v16, %v13628_v41  ;;  %v13630_v40 = vld [vmem:[#allocation402_spill] sm:$0xff]  ;;  %v7641_v58 = vcombine.low %v13629_v16, %v13628_v41 }
 0x923   :  { %6874 = vmatmul.mubr.bf16.vlgmr.msra.gmra.mxu1 %v11895_v55  ;;  %v7601_v55 = vcombine.low %v13605_v43, %v13604_v35 }
 0x924   :  { %6915 = vmatmul.mubr.bf16.vlgmr.msra.gmra.mxu0 %v11899_v49  ;;  %6924 = vmatpush1.bf16.msra.mxu1 %v7609_v25  ;;  %v7665_v49 = vcombine.low %v13607_v62, %v13606_v3  ;;  %v13631_v25 = vld [vmem:[#allocation400_spill] sm:$0xff] }
 0x925   :  { %6965 = vmatpush1.bf16.msra.mxu0 %v7673_v21  ;;  %6925 = vmatprep.subr.bf16.mxu1 %v7606_v14  ;;  %v7706_v21 = vcombine.high %v13631_v25, %v13630_v40  ;;  %v7705_v61 = vcombine.low %v13631_v25, %v13630_v40  ;;  %v13632_v14 = vld [vmem:[#allocation334_spill] sm:$0xff]  ;;  %v13637_v3 = vld [vmem:[#allocation328_spill] sm:$0xff] }
 0x926   :  { %6966 = vmatprep.subr.bf16.mxu0 %v7670_v47  ;;  %6955 = vmatprep.mubr.bf16.mxu1 %v11905_v5  ;;  %v7597_v5 = vcombine.low %v13609_v8, %v13608_v57  ;;  %v7638_v46 = vcombine.high %v13633_v15, %v13632_v14  ;;  %v13634_v47 = vld [vmem:[#allocation398_spill] sm:$0xff]  ;;  %v7637_v35 = vcombine.low %v13633_v15, %v13632_v14 }
 0x927   :  { %6996 = vmatprep.mubr.bf16.mxu0 %v11909_v39  ;;  %v7661_v39 = vcombine.low %v13611_v33, %v13610_v10  ;;  %v13641_v10 = vld [vmem:[#allocation324_spill] sm:$0xff] }
 0x928   :  { %6926 = vmatpush1.bf16.msra.mxu1 %v7605_v7  ;;  %v13635_v7 = vld [vmem:[#allocation396_spill] sm:$0xff] }
 0x929   :  { %6967 = vmatpush1.bf16.msra.mxu0 %v7669_v32  ;;  %6927 = vmatprep.subr.bf16.mxu1 %v7602_v18  ;;  %v7702_v32 = vcombine.high %v13635_v7, %v13634_v47  ;;  %v7701_v43 = vcombine.low %v13635_v7, %v13634_v47  ;;  %v13636_v18 = vld [vmem:[#allocation330_spill] sm:$0xff] }
 0x92a   :  { %6968 = vmatprep.subr.bf16.mxu0 %v7666_v29  ;;  %v7634_v62 = vcombine.high %v13637_v3, %v13636_v18  ;;  %v13638_v29 = vld [vmem:[#allocation394_spill] sm:$0xff]  ;;  %v7633_v57 = vcombine.low %v13637_v3, %v13636_v18 }
 0x92c   :  { %6928 = vmatpush1.bf16.msra.mxu1 %v7601_v55  ;;  %v13639_v55 = vld [vmem:[#allocation392_spill] sm:$0xff] }
 0x92d   :  { %6969 = vmatpush1.bf16.msra.mxu0 %v7665_v49  ;;  %6929 = vmatprep.subr.bf16.mxu1 %v7598_v44  ;;  %v7698_v49 = vcombine.high %v13639_v55, %v13638_v29  ;;  %v7697_v8 = vcombine.low %v13639_v55, %v13638_v29  ;;  %v13640_v44 = vld [vmem:[#allocation326_spill] sm:$0xff] }
 0x92e   :  { %6970 = vmatprep.subr.bf16.mxu0 %v7662_v0  ;;  %v7630_v33 = vcombine.high %v13641_v10, %v13640_v44  ;;  %v13642_v0 = vld [vmem:[#allocation390_spill] sm:$0xff]  ;;  %v7629_v52 = vcombine.low %v13641_v10, %v13640_v44 }
 0x930   :  { %6930 = vmatpush1.bf16.msra.mxu1 %v7597_v5  ;;  %v13643_v5 = vld [vmem:[#allocation388_spill] sm:$0xff] }
 0x931   :  { %6971 = vmatpush1.bf16.msra.mxu0 %v7661_v39  ;;  %6931 = vmatprep.subr.bf16.mxu1 %v7594_v22  ;;  %v7694_v39 = vcombine.high %v13643_v5, %v13642_v0  ;;  %v7693_v23 = vcombine.low %v13643_v5, %v13642_v0  ;;  %v13644_v22 = vld [vmem:[#allocation322_spill] sm:$0xff] }
 0x932   :  { %6972 = vmatprep.subr.bf16.mxu0 %v7658_v51  ;;  %v7626_v28 = vcombine.high %v13645_v60, %v13644_v22  ;;  %v13646_v51 = vld [vmem:[#allocation386_spill] sm:$0xff]  ;;  %v7625_v13 = vcombine.low %v13645_v60, %v13644_v22 }
 0x934   :  { %6932 = vmatpush1.bf16.msra.mxu1 %v7593_v53  ;;  %v13647_v53 = vld [vmem:[#allocation384_spill] sm:$0xff] }
 0x935   :  { %6973 = vmatpush1.bf16.msra.mxu0 %v7657_v12  ;;  %6933 = vmatprep.subr.bf16.mxu1 %v7590_v27  ;;  %v7690_v12 = vcombine.high %v13647_v53, %v13646_v51  ;;  %v7689_v11 = vcombine.low %v13647_v53, %v13646_v51  ;;  %v13648_v27 = vld [vmem:[#allocation318_spill] sm:$0xff] }
 0x936   :  { %6974 = vmatprep.subr.bf16.mxu0 %v7654_v34  ;;  %v7622_v38 = vcombine.high %v13649_v45, %v13648_v27  ;;  %v13650_v34 = vld [vmem:[#allocation382_spill] sm:$0xff]  ;;  %v7621_v26 = vcombine.low %v13649_v45, %v13648_v27 }
 0x938   :  { %6934 = vmatpush1.bf16.msra.mxu1 %v7589_v6  ;;  %v13651_v6 = vld [vmem:[#allocation380_spill] sm:$0xff] }
 0x939   :  { %6975 = vmatpush1.bf16.msra.mxu0 %v7653_v24  ;;  %6935 = vmatprep.subr.bf16.mxu1 %v7586_v9  ;;  %v7686_v24 = vcombine.high %v13651_v6, %v13650_v34  ;;  %v7685_v37 = vcombine.low %v13651_v6, %v13650_v34  ;;  %v13652_v9 = vld [vmem:[#allocation314_spill] sm:$0xff] }
 0x93a   :  { %6976 = vmatprep.subr.bf16.mxu0 %v7650_v54  ;;  %v7618_v42 = vcombine.high %v13653_v36, %v13652_v9  ;;  %v13654_v54 = vld [vmem:[#allocation378_spill] sm:$0xff]  ;;  %v7617_v30 = vcombine.low %v13653_v36, %v13652_v9 }
 0x93c   :  { %6936 = vmatpush1.bf16.msra.mxu1 %v7585_v59  ;;  %v13655_v59 = vld [vmem:[#allocation376_spill] sm:$0xff] }
 0x93d   :  { %6977 = vmatpush1.bf16.msra.mxu0 %v7649_v48  ;;  %6937 = vmatprep.subr.bf16.mxu1 %v7582_v4  ;;  %v7682_v48 = vcombine.high %v13655_v59, %v13654_v54  ;;  %v7681_v1 = vcombine.low %v13655_v59, %v13654_v54  ;;  %v13656_v4 = vld [vmem:[#allocation310_spill] sm:$0xff] }
 0x93e   :  { %6978 = vmatprep.subr.bf16.mxu0 %v7646_v20  ;;  %v7614_v50 = vcombine.high %v13657_v31, %v13656_v4  ;;  %v13658_v20 = vld [vmem:[#allocation374_spill] sm:$0xff]  ;;  %v7613_v41 = vcombine.low %v13657_v31, %v13656_v4 }
 0x940   :  { %6938 = vmatpush1.bf16.msra.mxu1 %v7581_v56  ;;  %v13659_v56 = vld [vmem:[#allocation372_spill] sm:$0xff] }
 0x941   :  { %6979 = vmatpush1.bf16.msra.mxu0 %v7645_v2  ;;  %6939 = vmatprep.subr.bf16.mxu1 %v7642_v63  ;;  %v7678_v2 = vcombine.high %v13659_v56, %v13658_v20  ;;  %v7677_v16 = vcombine.low %v13659_v56, %v13658_v20 }
 0x942   :  { %6980 = vmatprep.subr.bf16.mxu0 %v7706_v21 }
 0x944   :  { %6940 = vmatpush2.bf16.msra.mxu1 %v7641_v58 }
 0x945   :  { %6981 = vmatpush2.bf16.msra.mxu0 %v7705_v61  ;;  %6941 = vmatprep.subr.bf16.mxu1 %v7638_v46 }
 0x946   :  { %6982 = vmatprep.subr.bf16.mxu0 %v7702_v32 }
 0x948   :  { %6942 = vmatpush2.bf16.msra.mxu1 %v7637_v35 }
 0x949   :  { %6983 = vmatpush2.bf16.msra.mxu0 %v7701_v43  ;;  %6943 = vmatprep.subr.bf16.mxu1 %v7634_v62 }
 0x94a   :  { %6984 = vmatprep.subr.bf16.mxu0 %v7698_v49 }
 0x94c   :  { %6944 = vmatpush2.bf16.msra.mxu1 %v7633_v57 }
 0x94d   :  { %6985 = vmatpush2.bf16.msra.mxu0 %v7697_v8  ;;  %6945 = vmatprep.subr.bf16.mxu1 %v7630_v33 }
 0x94e   :  { %6986 = vmatprep.subr.bf16.mxu0 %v7694_v39 }
 0x950   :  { %6946 = vmatpush2.bf16.msra.mxu1 %v7629_v52 }
 0x951   :  { %6987 = vmatpush2.bf16.msra.mxu0 %v7693_v23  ;;  %6947 = vmatprep.subr.bf16.mxu1 %v7626_v28 }
 0x952   :  { %6988 = vmatprep.subr.bf16.mxu0 %v7690_v12 }
 0x954   :  { %6948 = vmatpush2.bf16.msra.mxu1 %v7625_v13 }
 0x955   :  { %6989 = vmatpush2.bf16.msra.mxu0 %v7689_v11  ;;  %6949 = vmatprep.subr.bf16.mxu1 %v7622_v38 }
 0x956   :  { %6990 = vmatprep.subr.bf16.mxu0 %v7686_v24 }
 0x958   :  { %6950 = vmatpush2.bf16.msra.mxu1 %v7621_v26 }
 0x959   :  { %6991 = vmatpush2.bf16.msra.mxu0 %v7685_v37  ;;  %6951 = vmatprep.subr.bf16.mxu1 %v7618_v42 }
 0x95a   :  { %6992 = vmatprep.subr.bf16.mxu0 %v7682_v48 }
 0x95c   :  { %6952 = vmatpush2.bf16.msra.mxu1 %v7617_v30 }
 0x95d   :  { %6993 = vmatpush2.bf16.msra.mxu0 %v7681_v1  ;;  %6953 = vmatprep.subr.bf16.mxu1 %v7614_v50 }
 0x95e   :  { %6994 = vmatprep.subr.bf16.mxu0 %v7678_v2 }
 0x960   :  { %6954 = vmatpush2.bf16.msra.mxu1 %v7613_v41 }
 0x961   :  { %6995 = vmatpush2.bf16.msra.mxu0 %v7677_v16 }
 0x963   :  { %v6711_v63 = vpop.f32.mrf.mxu1  ;;  %6956 = vmatmul.mubr.bf16.vlgmr.msra.gmra.mxu1 %v11903_v19 }
 0x964   :  { %v6752_v40 = vpop.f32.mrf.mxu0  ;;  %6997 = vmatmul.mubr.bf16.vlgmr.msra.gmra.mxu0 %v11907_v17 }
 0x965   :  { %v6713_v25 = vpop.f32.mrf.mxu1  ;;  %v6753_v46 = vadd.f32 %v6752_v40, %v6711_v63 }
 0x966   :  { %v6754_v21 = vpop.f32.mrf.mxu0 }
 0x967   :  { %v6715_v58 = vpop.f32.mrf.mxu1  ;;  %v6755_v32 = vadd.f32 %v6754_v21, %v6713_v25 }
 0x968   :  { %v6756_v61 = vpop.f32.mrf.mxu0 }
 0x969   :  { %v6716_v14 = vpop.f32.mrf.mxu1 }
 0x96a   :  { %v6757_v15 = vpop.f32.mrf.mxu0 }
 0x9a3   :  { %v6793_v47 = vpop.f32.mrf.mxu1 }
 0x9a4   :  { %v6834_v7 = vpop.f32.mrf.mxu0  ;;  %v6794_v35 = vadd.f32 %v6793_v47, %v6753_v46 }
 0x9a5   :  { %v6795_v43 = vpop.f32.mrf.mxu1 }
 0x9a6   :  { %v6836_v18 = vpop.f32.mrf.mxu0  ;;  %v6835_v3 = vadd.f32 %v6834_v7, %v6794_v35  ;;  %v6796_v62 = vadd.f32 %v6795_v43, %v6755_v32 }
 0x9a7   :  { %v6797_v29 = vpop.f32.mrf.mxu1 }
 0x9a8   :  { %v6838_v55 = vpop.f32.mrf.mxu0  ;;  %v6837_v19 = vadd.f32 %v6836_v18, %v6796_v62  ;;  %7005 = vst [vmem:[%s12465_s14] sm:$0xff] %v6835_v3 }
 0x9a9   :  { %v6798_v17 = vpop.f32.mrf.mxu1 }
 0x9aa   :  { %v6839_v49 = vpop.f32.mrf.mxu0  ;;  %7006 = vst [vmem:[%s12465_s14 + $0x8] sm:$0xff] %v6837_v19 }
 0x9e3   :  { %v6875_v57 = vpop.f32.mrf.mxu1 }
 0x9e4   :  { %v6916_v8 = vpop.f32.mrf.mxu0 }
 0x9e5   :  { %v6877_v44 = vpop.f32.mrf.mxu1  ;;  %v6917_v52 = vadd.f32 %v6916_v8, %v6875_v57 }
 0x9e6   :  { %v6918_v10 = vpop.f32.mrf.mxu0 }
 0x9e7   :  { %v6879_v33 = vpop.f32.mrf.mxu1  ;;  %v6919_v60 = vadd.f32 %v6918_v10, %v6877_v44 }
 0x9e8   :  { %v6920_v0 = vpop.f32.mrf.mxu0 }
 0x9e9   :  { %v6880_v5 = vpop.f32.mrf.mxu1 }
 0x9ea   :  { %v6921_v39 = vpop.f32.mrf.mxu0 }
 0xa23   :  { %v6957_v23 = vpop.f32.mrf.mxu1 }
 0xa24   :  { %v6998_v22 = vpop.f32.mrf.mxu0  ;;  %v6958_v28 = vadd.f32 %v6957_v23, %v6917_v52 }
 0xa25   :  { %v6959_v51 = vpop.f32.mrf.mxu1 }
 0xa26   :  { %v7000_v53 = vpop.f32.mrf.mxu0  ;;  %v6999_v12 = vadd.f32 %v6998_v22, %v6958_v28  ;;  %v6960_v13 = vadd.f32 %v6959_v51, %v6919_v60 }
 0xa27   :  { %v6961_v11 = vpop.f32.mrf.mxu1 }
 0xa28   :  { %v7002_v27 = vpop.f32.mrf.mxu0  ;;  %7007 = vst [vmem:[%s12465_s14 + $0x10] sm:$0xff] %v6999_v12  ;;  %v7001_v45 = vadd.f32 %v7000_v53, %v6960_v13 }
 0xa29   :  { %v6962_v38 = vpop.f32.mrf.mxu1 }
 0xa2a   :  { %v7003_v34 = vpop.f32.mrf.mxu0  ;;  %7008 = vst [vmem:[%s12465_s14 + $0x18] sm:$0xff] %v7001_v45 }
 0xa2b   :  { %7013 = vsyncmov [#allocation4] }
 0xa2e   :  { %s7014_s16 = vpop.sfrf %7013 }
 0xa2f   :  { %p7707_p0 = scmp.ne.s32.totalorder %s7014_s16, 0 }
 0xa31   :  { %7018 = shalt.err (%p7707_p0)  }
 0xa32   :  { %7020 = vsyncmov [#allocation4 + $0x1] }
 0xa35   :  { %s7021_s13 = vpop.sfrf %7020 }
 0xa36   :  { %p7708_p1 = scmp.ne.s32.totalorder %s7021_s13, 0 }
 0xa38   :  { %7025 = shalt.err (%p7708_p1)  }

</bundles_post_ra>
